<compile_context>
chip_gen: v6e
topology: v6e:2x2x1
jax: 0.10.0
libtpu: 0.0.40
codegen_flags: <defaults>
</compile_context>

<pallas_src>
import functools
import math

import jax
import jax.numpy as jnp
from jax.experimental import pallas as pl
from jax.experimental.pallas import tpu as pltpu


# 48 MiB: above the 16/32 MiB scoped defaults, below v7x's 64 MiB physical VMEM
# (leaves double-buffering headroom on every generation).
_VMEM_LIMIT_BYTES = 48 * 1024 * 1024


def _round_up(x, m):
    return ((x + m - 1) // m) * m


# ---------------------------------------------------------------------------
# Pallas kernel 1: tiled matmul + bias + activation (the conv hot path)
# ---------------------------------------------------------------------------
def _matmul_kernel(x_ref, w_ref, b_ref, o_ref, acc_ref, *, act):
    @pl.when(pl.program_id(2) == 0)
    def _init():
        acc_ref[...] = jnp.zeros_like(acc_ref)

    acc_ref[...] += jnp.dot(
        x_ref[...], w_ref[...], preferred_element_type=jnp.float32
    )

    @pl.when(pl.program_id(2) == pl.num_programs(2) - 1)
    def _finalize():
        # f32 epilogue: bias add + activation (keeps elementwise math f32 on v5e)
        r = acc_ref[...] + b_ref[...]
        if act == "relu":
            r = jnp.maximum(r, 0.0)
        elif act == "sigmoid":
            r = jax.nn.sigmoid(r)
        o_ref[...] = r.astype(o_ref.dtype)


def pallas_matmul(x, w, b, act="none"):
    """(M,K) @ (K,N) + b with fused activation.

    Tiled grid over (M, N, K); bf16 MXU inputs, f32 accumulate; output written
    to a 128-lane-padded slab and sliced back to (M, N).
    """
    M, K = x.shape
    K2, N = w.shape
    assert K == K2

    # Lane-dense / tile-aligned padded extents.
    Np = _round_up(N, 128)
    Kp = _round_up(K, 128)
    M8 = _round_up(M, 8)
    tm = M8 if M8 <= 256 else 256
    Mp = _round_up(M8, tm)
    tn = 256 if (Np % 256 == 0) else 128
    tk = math.gcd(Kp, 512)  # multiple of 128 that divides Kp

    xp = jnp.pad(x, ((0, Mp - M), (0, Kp - K))).astype(jnp.bfloat16)
    wp = jnp.pad(w, ((0, Kp - K), (0, Np - N))).astype(jnp.bfloat16)
    bp = jnp.pad(b.astype(jnp.float32).reshape(1, N), ((0, 0), (0, Np - N)))

    grid = (Mp // tm, Np // tn, Kp // tk)
    kern = functools.partial(_matmul_kernel, act=act)

    out = pl.pallas_call(
        kern,
        out_shape=jax.ShapeDtypeStruct((Mp, Np), jnp.float32),
        grid_spec=pltpu.PrefetchScalarGridSpec(
            num_scalar_prefetch=0,
            grid=grid,
            in_specs=[
                pl.BlockSpec((tm, tk), lambda i, j, k: (i, k)),
                pl.BlockSpec((tk, tn), lambda i, j, k: (k, j)),
                pl.BlockSpec((1, tn), lambda i, j, k: (0, j)),
            ],
            out_specs=pl.BlockSpec((tm, tn), lambda i, j, k: (i, j)),
            scratch_shapes=[pltpu.VMEM((tm, tn), jnp.float32)],
        ),
        compiler_params=pltpu.CompilerParams(
            dimension_semantics=("parallel", "parallel", "arbitrary"),
            vmem_limit_bytes=_VMEM_LIMIT_BYTES,
        ),
    )(xp, wp, bp)
    return out[:M, :N]


# ---------------------------------------------------------------------------
# Pallas kernel 2: fused scSE gating
#   out = x * (channel_gate + sigmoid(x @ SW + SB))
# channel_gate is broadcast in-kernel (no HBM broadcast); SW is a (C,C)
# block/repeated-column matrix so both branches' spatial gates come out of one
# lane-friendly dot (no lane-dim slicing).
# ---------------------------------------------------------------------------
def _scse_kernel(x_ref, cg_ref, sw_ref, sb_ref, o_ref):
    x = x_ref[0]                                     # (thw, C) f32
    sg = jax.nn.sigmoid(
        jnp.dot(x, sw_ref[...], preferred_element_type=jnp.float32) + sb_ref[...]
    )                                                # (thw, C)
    o_ref[0] = x * (cg_ref[0] + sg)                  # cg (1, C) broadcast in-kernel


def _pick_hw_tile(hw, cap=1024):
    if hw <= cap:
        return hw
    for t in range(cap, 7, -8):
        if hw % t == 0:
            return t
    return hw


def pallas_scse(x3, cg3, sw, sb):
    """x3: (Nb, HW, C); cg3: (Nb, 1, C); sw: (C, C); sb: (1, C)."""
    Nb, HW, C = x3.shape
    thw = _pick_hw_tile(HW)
    grid = (Nb, HW // thw)
    return pl.pallas_call(
        _scse_kernel,
        out_shape=jax.ShapeDtypeStruct((Nb, HW, C), jnp.float32),
        grid_spec=pltpu.PrefetchScalarGridSpec(
            num_scalar_prefetch=0,
            grid=grid,
            in_specs=[
                pl.BlockSpec((1, thw, C), lambda b, m: (b, m, 0)),
                pl.BlockSpec((1, 1, C), lambda b, m: (b, 0, 0)),
                pl.BlockSpec((C, C), lambda b, m: (0, 0)),
                pl.BlockSpec((1, C), lambda b, m: (0, 0)),
            ],
            out_specs=pl.BlockSpec((1, thw, C), lambda b, m: (b, m, 0)),
        ),
        compiler_params=pltpu.CompilerParams(
            dimension_semantics=("parallel", "parallel"),
            vmem_limit_bytes=_VMEM_LIMIT_BYTES,
        ),
    )(x3, cg3, sw, sb)


# ---------------------------------------------------------------------------
# Conv = im2col (XLA glue) + tiled Pallas matmul (hot path)
# ---------------------------------------------------------------------------
def _im2col(x, kh, kw, stride, pad):
    N, H, W, C = x.shape
    xp = jnp.pad(x, ((0, 0), (pad, pad), (pad, pad), (0, 0)))
    Ho = (H + 2 * pad - kh) // stride + 1
    Wo = (W + 2 * pad - kw) // stride + 1
    patches = []
    for i in range(kh):
        for j in range(kw):
            patches.append(
                xp[:, i:i + stride * Ho:stride, j:j + stride * Wo:stride, :]
            )
    cols = jnp.concatenate(patches, axis=-1)          # (N, Ho, Wo, kh*kw*C)
    return cols.reshape(N * Ho * Wo, kh * kw * C), (N, Ho, Wo)


def conv2d(x, w, b, stride=1, pad=None, act="none"):
    # w: (kh, kw, Cin, Cout)
    kh, kw, cin, cout = w.shape
    if pad is None:
        pad = kh // 2
    cols, (N, Ho, Wo) = _im2col(x, kh, kw, stride, pad)
    out = pallas_matmul(cols, w.reshape(kh * kw * cin, cout), b, act=act)
    return out.reshape(N, Ho, Wo, cout)


# ---------------------------------------------------------------------------
# Fused (A|B) scSE attention + decoder block
# ---------------------------------------------------------------------------
def scse_fused(x, p):
    N, H, W, C = x.shape
    # Tiny channel-SE MLP: left to XLA (block-diagonal fused weights keep the
    # two branches independent).
    pooled = jnp.mean(x, axis=(1, 2))                                   # (N, C)
    h = jnp.maximum(pooled @ p["c_w1"] + p["c_b1"], 0.0)
    cg = jax.nn.sigmoid(h @ p["c_w2"] + p["c_b2"])                      # (N, C)
    x3 = x.reshape(N, H * W, C)
    out = pallas_scse(x3, cg[:, None, :], p["s_w"], p["s_b"])
    return out.reshape(N, H, W, C)


def decoder_block(x, skip, p):
    # nearest 2x upsample, concat skip, fused (A|B) conv3x3+ReLU, fused scSE
    x = jnp.repeat(jnp.repeat(x, 2, axis=1), 2, axis=2)
    # TODO(synk): avoid this channel concat (and double im2col of the upsampled
    # tensor) by splitting the conv into two accumulating K-blocks over
    # (upsampled, skip) inside the matmul grid.
    x = jnp.concatenate([x, skip], axis=-1)
    x = conv2d(x, p["conv_w"], p["conv_b"], act="relu")
    return scse_fused(x, p["scse"])


# ---------------------------------------------------------------------------
# Parameter initialization (deterministic, in-script) + A/B weight fusion
# ---------------------------------------------------------------------------
E0, E1, E2 = 8, 16, 32      # encoder channels
D1, D0 = 16, 8              # per-branch decoder channels


def _conv_p(key, kh, kw, cin, cout):
    kw_, kb_ = jax.random.split(key)
    scale = 1.0 / math.sqrt(kh * kw * cin)
    w = jax.random.normal(kw_, (kh, kw, cin, cout), jnp.float32) * scale
    b = jax.random.normal(kb_, (cout,), jnp.float32) * 0.01
    return w, b


def _scse_p(key, c, r=2):
    # TODO(synk): smp default scSE reduction is 16; r=2 used for these tiny widths.
    k1, k2, k3 = jax.random.split(key, 3)
    cr = max(c // r, 1)
    w1 = jax.random.normal(k1, (c, cr), jnp.float32) / math.sqrt(c)
    w2 = jax.random.normal(k2, (cr, c), jnp.float32) / math.sqrt(cr)
    sw, sb = _conv_p(k3, 1, 1, c, 1)
    return {"c_w1": w1, "c_b1": jnp.zeros((cr,), jnp.float32),
            "c_w2": w2, "c_b2": jnp.zeros((c,), jnp.float32),
            "s_w": sw.reshape(c, 1), "s_b": sb}


def _fuse_scse(pA, pB, chA, chB):
    """Block-structured fusion of two independent scSE blocks (A then B)."""
    C = chA + chB
    crA = pA["c_w1"].shape[1]
    crB = pB["c_w1"].shape[1]
    w1 = (jnp.zeros((C, crA + crB), jnp.float32)
          .at[:chA, :crA].set(pA["c_w1"])
          .at[chA:, crA:].set(pB["c_w1"]))
    b1 = jnp.concatenate([pA["c_b1"], pB["c_b1"]])
    w2 = (jnp.zeros((crA + crB, C), jnp.float32)
          .at[:crA, :chA].set(pA["c_w2"])
          .at[crA:, chA:].set(pB["c_w2"]))
    b2 = jnp.concatenate([pA["c_b2"], pB["c_b2"]])
    # Fused spatial-SE: (C, C) weight whose columns 0:chA all produce gate_A
    # and columns chA: all produce gate_B (repeated columns, zero cross blocks).
    sw = (jnp.zeros((C, C), jnp.float32)
          .at[:chA, :chA].set(jnp.broadcast_to(pA["s_w"], (chA, chA)))
          .at[chA:, chA:].set(jnp.broadcast_to(pB["s_w"], (chB, chB))))
    sb = (jnp.zeros((1, C), jnp.float32)
          .at[0, :chA].set(pA["s_b"][0])
          .at[0, chA:].set(pB["s_b"][0]))
    return {"c_w1": w1, "c_b1": b1, "c_w2": w2, "c_b2": b2, "s_w": sw, "s_b": sb}


def init_params(key):
    ks = jax.random.split(key, 13)
    p = {}
    # shared encoder (full-res, /2, /4)
    p["enc0_w"], p["enc0_b"] = _conv_p(ks[0], 3, 3, 3, E0)
    p["enc1_w"], p["enc1_b"] = _conv_p(ks[1], 3, 3, E0, E1)
    p["enc2_w"], p["enc2_b"] = _conv_p(ks[2], 3, 3, E1, E2)

    # decoder stage 1: input = concat(up(f2)[E2], f1[E1]); identical input for
    # A and B, so the fused conv is a plain Cout concatenation.
    wA1, bA1 = _conv_p(ks[3], 3, 3, E2 + E1, D1)
    wB1, bB1 = _conv_p(ks[4], 3, 3, E2 + E1, D1)
    p["dec1"] = {
        "conv_w": jnp.concatenate([wA1, wB1], axis=-1),          # (3,3,48,32)
        "conv_b": jnp.concatenate([bA1, bB1]),
        "scse": _fuse_scse(_scse_p(ks[5], D1), _scse_p(ks[6], D1), D1, D1),
    }

    # decoder stage 0: input channels = [up(d1)_A 0:D1 | up(d1)_B D1:2D1 | f0]
    # -> block-structured Cin x Cout weight (f0 rows shared by both branches).
    wA0, bA0 = _conv_p(ks[7], 3, 3, D1 + E0, D0)
    wB0, bB0 = _conv_p(ks[8], 3, 3, D1 + E0, D0)
    cin_f = 2 * D1 + E0
    wf = (jnp.zeros((3, 3, cin_f, 2 * D0), jnp.float32)
          .at[:, :, 0:D1, 0:D0].set(wA0[:, :, 0:D1, :])
          .at[:, :, 2 * D1:, 0:D0].set(wA0[:, :, D1:, :])
          .at[:, :, D1:2 * D1, D0:].set(wB0[:, :, 0:D1, :])
          .at[:, :, 2 * D1:, D0:].set(wB0[:, :, D1:, :]))
    p["dec0"] = {
        "conv_w": wf,                                            # (3,3,40,16)
        "conv_b": jnp.concatenate([bA0, bB0]),
        "scse": _fuse_scse(_scse_p(ks[9], D0), _scse_p(ks[10], D0), D0, D0),
    }

    # fused segmentation heads: A -> 2 classes (masks[:, :2]), B -> 1 (masks[:, 2])
    hwA, hbA = _conv_p(ks[11], 3, 3, D0, 2)
    hwB, hbB = _conv_p(ks[12], 3, 3, D0, 1)
    hw = (jnp.zeros((3, 3, 2 * D0, 3), jnp.float32)
          .at[:, :, :D0, :2].set(hwA)
          .at[:, :, D0:, 2:].set(hwB))
    p["head_w"] = hw                                             # (3,3,16,3)
    p["head_b"] = jnp.concatenate([hbA, hbB])
    return p


# ---------------------------------------------------------------------------
# NC_Net forward
# ---------------------------------------------------------------------------
def nc_net_forward(params, x_nchw):
    x = jnp.transpose(x_nchw, (0, 2, 3, 1))                      # NCHW -> NHWC
    # shared encoder
    f0 = conv2d(x, params["enc0_w"], params["enc0_b"], act="relu")             # (N,H,  W,  8)
    f1 = conv2d(f0, params["enc1_w"], params["enc1_b"], stride=2, act="relu")  # (N,H/2,W/2,16)
    f2 = conv2d(f1, params["enc2_w"], params["enc2_b"], stride=2, act="relu")  # (N,H/4,W/4,32)
    # fused dual scSE decoders (A channels 0:D, B channels D:2D) — numerically
    # identical to running the two decoders separately (block weights).
    d1 = decoder_block(f2, f1, params["dec1"])                   # (N,H/2,W/2,32)
    d0 = decoder_block(d1, f0, params["dec0"])                   # (N,H,  W, 16)
    # fused heads: masks[..., :2] = decoder A head, masks[..., 2] = decoder B head
    masks_nhwc = conv2d(d0, params["head_w"], params["head_b"])  # (N,H,W,3)
    return jnp.transpose(masks_nhwc, (0, 3, 1, 2))               # NHWC -> NCHW


if __name__ == "__main__":
    key = jax.random.PRNGKey(0)
    k_param, k_x = jax.random.split(key)
    params = init_params(k_param)
    x = jax.random.normal(k_x, (2, 3, 16, 16), jnp.float32)      # NCHW input

    fwd = jax.jit(nc_net_forward)
    masks = jax.block_until_ready(fwd(params, x))

    assert masks.shape == (2, 3, 16, 16), masks.shape
    assert masks.dtype == jnp.float32
    assert bool(jnp.all(jnp.isfinite(masks)))
    print("KERNEL_OK")
</pallas_src>

<mosaic_0001>
module attributes {stable_mosaic.version = 11 : i64} {
  func.func @_matmul_kernel(%arg0: i32, %arg1: i32, %arg2: i32, %arg3: memref<256x128xbf16, #tpu.memory_space<vmem>>, %arg4: memref<128x128xbf16, #tpu.memory_space<vmem>>, %arg5: memref<1x128xf32, #tpu.memory_space<vmem>>, %arg6: memref<256x128xf32, #tpu.memory_space<vmem>>, %arg7: memref<256x128xf32, #tpu.memory_space<vmem>>) attributes {dimension_semantics = [#tpu.dimension_semantics<parallel>, #tpu.dimension_semantics<parallel>, #tpu.dimension_semantics<arbitrary>], iteration_bounds = array<i64: 2, 1, 1>, scalar_prefetch = 0 : i64, scratch_operands = 1 : i64, tpu.core_type = #tpu.core_type<tc>, window_params = [{transform_indices = @transform_0, window_bounds = array<i64: 256, 128>}, {transform_indices = @transform_1, window_bounds = array<i64: 128, 128>}, {transform_indices = @transform_2, window_bounds = array<i64: 1, 128>}, {transform_indices = @transform_3, window_bounds = array<i64: 256, 128>}]} {
    %c0_i32 = arith.constant 0 : i32
    %0 = arith.cmpi eq, %arg2, %c0_i32 : i32
    %1 = arith.extui %0 : i1 to i32
    %c0_i32_0 = arith.constant 0 : i32
    %2 = arith.cmpi ne, %1, %c0_i32_0 : i32
    scf.if %2 {
      %cst_10 = arith.constant 0.000000e+00 : f32
      %12 = vector.broadcast %cst_10 : f32 to vector<256x128xf32>
      %c0_11 = arith.constant 0 : index
      %c0_12 = arith.constant 0 : index
      %13 = vector.load %arg7[%c0_11, %c0_12] : memref<256x128xf32, #tpu.memory_space<vmem>>, vector<256x128xf32>
      tpu.vector_store %arg7[%c0_11, %c0_12], %12 {strides = array<i32>} : memref<256x128xf32, #tpu.memory_space<vmem>>, vector<256x128xf32>,
    } else {
    }
    %c0 = arith.constant 0 : index
    %c0_1 = arith.constant 0 : index
    %3 = vector.load %arg7[%c0, %c0_1] : memref<256x128xf32, #tpu.memory_space<vmem>>, vector<256x128xf32>
    %c0_2 = arith.constant 0 : index
    %c0_3 = arith.constant 0 : index
    %4 = vector.load %arg3[%c0_2, %c0_3] : memref<256x128xbf16, #tpu.memory_space<vmem>>, vector<256x128xbf16>
    %c0_4 = arith.constant 0 : index
    %c0_5 = arith.constant 0 : index
    %5 = vector.load %arg4[%c0_4, %c0_5] : memref<128x128xbf16, #tpu.memory_space<vmem>>, vector<128x128xbf16>
    %cst = arith.constant dense<0.000000e+00> : vector<256x128xf32>
    %6 = tpu.matmul %4, %5, %cst {dimension_numbers = #tpu.dot_dimension_numbers<[1], [0], [0], [1], [0, 0, 1, 1], [], []>} : vector<256x128xbf16>, vector<128x128xbf16>, vector<256x128xf32> -> vector<256x128xf32>
    %7 = arith.addf %3, %6 : vector<256x128xf32>
    %c0_6 = arith.constant 0 : index
    %c0_7 = arith.constant 0 : index
    %8 = vector.load %arg7[%c0_6, %c0_7] : memref<256x128xf32, #tpu.memory_space<vmem>>, vector<256x128xf32>
    tpu.vector_store %arg7[%c0_6, %c0_7], %7 {strides = array<i32>} : memref<256x128xf32, #tpu.memory_space<vmem>>, vector<256x128xf32>,
    %c0_i32_8 = arith.constant 0 : i32
    %9 = arith.cmpi eq, %arg2, %c0_i32_8 : i32
    %10 = arith.extui %9 : i1 to i32
    %c0_i32_9 = arith.constant 0 : i32
    %11 = arith.cmpi ne, %10, %c0_i32_9 : i32
    scf.if %11 {
      %c0_10 = arith.constant 0 : index
      %c0_11 = arith.constant 0 : index
      %12 = vector.load %arg7[%c0_10, %c0_11] : memref<256x128xf32, #tpu.memory_space<vmem>>, vector<256x128xf32>
      %c0_12 = arith.constant 0 : index
      %c0_13 = arith.constant 0 : index
      %13 = vector.load %arg5[%c0_12, %c0_13] : memref<1x128xf32, #tpu.memory_space<vmem>>, vector<1x128xf32>
      %14 = vector.broadcast %13 : vector<1x128xf32> to vector<256x128xf32>
      %15 = arith.addf %12, %14 : vector<256x128xf32>
      %cst_14 = arith.constant 0.000000e+00 : f32
      %16 = vector.broadcast %cst_14 : f32 to vector<256x128xf32>
      %17 = arith.maximumf %15, %16 : vector<256x128xf32>
      %c0_15 = arith.constant 0 : index
      %c0_16 = arith.constant 0 : index
      %18 = vector.load %arg6[%c0_15, %c0_16] : memref<256x128xf32, #tpu.memory_space<vmem>>, vector<256x128xf32>
      tpu.vector_store %arg6[%c0_15, %c0_16], %17 {strides = array<i32>} : memref<256x128xf32, #tpu.memory_space<vmem>>, vector<256x128xf32>,
    } else {
    }
    return
  }
  func.func @transform_0(%arg0: i32, %arg1: i32, %arg2: i32) -> (i32, i32) {
    %c0_i32 = arith.constant 0 : i32
    return %arg0, %arg2 : i32, i32
  }
  func.func @transform_1(%arg0: i32, %arg1: i32, %arg2: i32) -> (i32, i32) {
    %c0_i32 = arith.constant 0 : i32
    return %arg2, %arg1 : i32, i32
  }
  func.func @transform_2(%arg0: i32, %arg1: i32, %arg2: i32) -> (i32, i32) {
    %c0_i32 = arith.constant 0 : i32
    %c0_i32_0 = arith.constant 0 : i32
    return %c0_i32, %arg1 : i32, i32
  }
  func.func @transform_3(%arg0: i32, %arg1: i32, %arg2: i32) -> (i32, i32) {
    %c0_i32 = arith.constant 0 : i32
    return %arg0, %arg1 : i32, i32
  }
}

module attributes {stable_mosaic.version = 11 : i64} {
  func.func @_matmul_kernel(%arg0: i32, %arg1: i32, %arg2: i32, %arg3: memref<128x128xbf16, #tpu.memory_space<vmem>>, %arg4: memref<128x128xbf16, #tpu.memory_space<vmem>>, %arg5: memref<1x128xf32, #tpu.memory_space<vmem>>, %arg6: memref<128x128xf32, #tpu.memory_space<vmem>>, %arg7: memref<128x128xf32, #tpu.memory_space<vmem>>) attributes {dimension_semantics = [#tpu.dimension_semantics<parallel>, #tpu.dimension_semantics<parallel>, #tpu.dimension_semantics<arbitrary>], iteration_bounds = array<i64: 1, 1, 1>, scalar_prefetch = 0 : i64, scratch_operands = 1 : i64, tpu.core_type = #tpu.core_type<tc>, window_params = [{transform_indices = @transform_0, window_bounds = array<i64: 128, 128>}, {transform_indices = @transform_1, window_bounds = array<i64: 128, 128>}, {transform_indices = @transform_2, window_bounds = array<i64: 1, 128>}, {transform_indices = @transform_3, window_bounds = array<i64: 128, 128>}]} {
    %c0_i32 = arith.constant 0 : i32
    %0 = arith.cmpi eq, %arg2, %c0_i32 : i32
    %1 = arith.extui %0 : i1 to i32
    %c0_i32_0 = arith.constant 0 : i32
    %2 = arith.cmpi ne, %1, %c0_i32_0 : i32
    scf.if %2 {
      %cst_10 = arith.constant 0.000000e+00 : f32
      %12 = vector.broadcast %cst_10 : f32 to vector<128x128xf32>
      %c0_11 = arith.constant 0 : index
      %c0_12 = arith.constant 0 : index
      %13 = vector.load %arg7[%c0_11, %c0_12] : memref<128x128xf32, #tpu.memory_space<vmem>>, vector<128x128xf32>
      tpu.vector_store %arg7[%c0_11, %c0_12], %12 {strides = array<i32>} : memref<128x128xf32, #tpu.memory_space<vmem>>, vector<128x128xf32>,
    } else {
    }
    %c0 = arith.constant 0 : index
    %c0_1 = arith.constant 0 : index
    %3 = vector.load %arg7[%c0, %c0_1] : memref<128x128xf32, #tpu.memory_space<vmem>>, vector<128x128xf32>
    %c0_2 = arith.constant 0 : index
    %c0_3 = arith.constant 0 : index
    %4 = vector.load %arg3[%c0_2, %c0_3] : memref<128x128xbf16, #tpu.memory_space<vmem>>, vector<128x128xbf16>
    %c0_4 = arith.constant 0 : index
    %c0_5 = arith.constant 0 : index
    %5 = vector.load %arg4[%c0_4, %c0_5] : memref<128x128xbf16, #tpu.memory_space<vmem>>, vector<128x128xbf16>
    %cst = arith.constant dense<0.000000e+00> : vector<128x128xf32>
    %6 = tpu.matmul %4, %5, %cst {dimension_numbers = #tpu.dot_dimension_numbers<[1], [0], [0], [1], [0, 0, 1, 1], [], []>} : vector<128x128xbf16>, vector<128x128xbf16>, vector<128x128xf32> -> vector<128x128xf32>
    %7 = arith.addf %3, %6 : vector<128x128xf32>
    %c0_6 = arith.constant 0 : index
    %c0_7 = arith.constant 0 : index
    %8 = vector.load %arg7[%c0_6, %c0_7] : memref<128x128xf32, #tpu.memory_space<vmem>>, vector<128x128xf32>
    tpu.vector_store %arg7[%c0_6, %c0_7], %7 {strides = array<i32>} : memref<128x128xf32, #tpu.memory_space<vmem>>, vector<128x128xf32>,
    %c0_i32_8 = arith.constant 0 : i32
    %9 = arith.cmpi eq, %arg2, %c0_i32_8 : i32
    %10 = arith.extui %9 : i1 to i32
    %c0_i32_9 = arith.constant 0 : i32
    %11 = arith.cmpi ne, %10, %c0_i32_9 : i32
    scf.if %11 {
      %c0_10 = arith.constant 0 : index
      %c0_11 = arith.constant 0 : index
      %12 = vector.load %arg7[%c0_10, %c0_11] : memref<128x128xf32, #tpu.memory_space<vmem>>, vector<128x128xf32>
      %c0_12 = arith.constant 0 : index
      %c0_13 = arith.constant 0 : index
      %13 = vector.load %arg5[%c0_12, %c0_13] : memref<1x128xf32, #tpu.memory_space<vmem>>, vector<1x128xf32>
      %14 = vector.broadcast %13 : vector<1x128xf32> to vector<128x128xf32>
      %15 = arith.addf %12, %14 : vector<128x128xf32>
      %cst_14 = arith.constant 0.000000e+00 : f32
      %16 = vector.broadcast %cst_14 : f32 to vector<128x128xf32>
      %17 = arith.maximumf %15, %16 : vector<128x128xf32>
      %c0_15 = arith.constant 0 : index
      %c0_16 = arith.constant 0 : index
      %18 = vector.load %arg6[%c0_15, %c0_16] : memref<128x128xf32, #tpu.memory_space<vmem>>, vector<128x128xf32>
      tpu.vector_store %arg6[%c0_15, %c0_16], %17 {strides = array<i32>} : memref<128x128xf32, #tpu.memory_space<vmem>>, vector<128x128xf32>,
    } else {
    }
    return
  }
  func.func @transform_0(%arg0: i32, %arg1: i32, %arg2: i32) -> (i32, i32) {
    %c0_i32 = arith.constant 0 : i32
    return %arg0, %arg2 : i32, i32
  }
  func.func @transform_1(%arg0: i32, %arg1: i32, %arg2: i32) -> (i32, i32) {
    %c0_i32 = arith.constant 0 : i32
    return %arg2, %arg1 : i32, i32
  }
  func.func @transform_2(%arg0: i32, %arg1: i32, %arg2: i32) -> (i32, i32) {
    %c0_i32 = arith.constant 0 : i32
    %c0_i32_0 = arith.constant 0 : i32
    return %c0_i32, %arg1 : i32, i32
  }
  func.func @transform_3(%arg0: i32, %arg1: i32, %arg2: i32) -> (i32, i32) {
    %c0_i32 = arith.constant 0 : i32
    return %arg0, %arg1 : i32, i32
  }
}

module attributes {stable_mosaic.version = 11 : i64} {
  func.func @_matmul_kernel(%arg0: i32, %arg1: i32, %arg2: i32, %arg3: memref<32x256xbf16, #tpu.memory_space<vmem>>, %arg4: memref<256x128xbf16, #tpu.memory_space<vmem>>, %arg5: memref<1x128xf32, #tpu.memory_space<vmem>>, %arg6: memref<32x128xf32, #tpu.memory_space<vmem>>, %arg7: memref<32x128xf32, #tpu.memory_space<vmem>>) attributes {dimension_semantics = [#tpu.dimension_semantics<parallel>, #tpu.dimension_semantics<parallel>, #tpu.dimension_semantics<arbitrary>], iteration_bounds = array<i64: 1, 1, 1>, scalar_prefetch = 0 : i64, scratch_operands = 1 : i64, tpu.core_type = #tpu.core_type<tc>, window_params = [{transform_indices = @transform_0, window_bounds = array<i64: 32, 256>}, {transform_indices = @transform_1, window_bounds = array<i64: 256, 128>}, {transform_indices = @transform_2, window_bounds = array<i64: 1, 128>}, {transform_indices = @transform_3, window_bounds = array<i64: 32, 128>}]} {
    %c0_i32 = arith.constant 0 : i32
    %0 = arith.cmpi eq, %arg2, %c0_i32 : i32
    %1 = arith.extui %0 : i1 to i32
    %c0_i32_0 = arith.constant 0 : i32
    %2 = arith.cmpi ne, %1, %c0_i32_0 : i32
    scf.if %2 {
      %cst_10 = arith.constant 0.000000e+00 : f32
      %12 = vector.broadcast %cst_10 : f32 to vector<32x128xf32>
      %c0_11 = arith.constant 0 : index
      %c0_12 = arith.constant 0 : index
      %13 = vector.load %arg7[%c0_11, %c0_12] : memref<32x128xf32, #tpu.memory_space<vmem>>, vector<32x128xf32>
      tpu.vector_store %arg7[%c0_11, %c0_12], %12 {strides = array<i32>} : memref<32x128xf32, #tpu.memory_space<vmem>>, vector<32x128xf32>,
    } else {
    }
    %c0 = arith.constant 0 : index
    %c0_1 = arith.constant 0 : index
    %3 = vector.load %arg7[%c0, %c0_1] : memref<32x128xf32, #tpu.memory_space<vmem>>, vector<32x128xf32>
    %c0_2 = arith.constant 0 : index
    %c0_3 = arith.constant 0 : index
    %4 = vector.load %arg3[%c0_2, %c0_3] : memref<32x256xbf16, #tpu.memory_space<vmem>>, vector<32x256xbf16>
    %c0_4 = arith.constant 0 : index
    %c0_5 = arith.constant 0 : index
    %5 = vector.load %arg4[%c0_4, %c0_5] : memref<256x128xbf16, #tpu.memory_space<vmem>>, vector<256x128xbf16>
    %cst = arith.constant dense<0.000000e+00> : vector<32x128xf32>
    %6 = tpu.matmul %4, %5, %cst {dimension_numbers = #tpu.dot_dimension_numbers<[1], [0], [0], [1], [0, 0, 1, 1], [], []>} : vector<32x256xbf16>, vector<256x128xbf16>, vector<32x128xf32> -> vector<32x128xf32>
    %7 = arith.addf %3, %6 : vector<32x128xf32>
    %c0_6 = arith.constant 0 : index
    %c0_7 = arith.constant 0 : index
    %8 = vector.load %arg7[%c0_6, %c0_7] : memref<32x128xf32, #tpu.memory_space<vmem>>, vector<32x128xf32>
    tpu.vector_store %arg7[%c0_6, %c0_7], %7 {strides = array<i32>} : memref<32x128xf32, #tpu.memory_space<vmem>>, vector<32x128xf32>,
    %c0_i32_8 = arith.constant 0 : i32
    %9 = arith.cmpi eq, %arg2, %c0_i32_8 : i32
    %10 = arith.extui %9 : i1 to i32
    %c0_i32_9 = arith.constant 0 : i32
    %11 = arith.cmpi ne, %10, %c0_i32_9 : i32
    scf.if %11 {
      %c0_10 = arith.constant 0 : index
      %c0_11 = arith.constant 0 : index
      %12 = vector.load %arg7[%c0_10, %c0_11] : memref<32x128xf32, #tpu.memory_space<vmem>>, vector<32x128xf32>
      %c0_12 = arith.constant 0 : index
      %c0_13 = arith.constant 0 : index
      %13 = vector.load %arg5[%c0_12, %c0_13] : memref<1x128xf32, #tpu.memory_space<vmem>>, vector<1x128xf32>
      %14 = vector.broadcast %13 : vector<1x128xf32> to vector<32x128xf32>
      %15 = arith.addf %12, %14 : vector<32x128xf32>
      %cst_14 = arith.constant 0.000000e+00 : f32
      %16 = vector.broadcast %cst_14 : f32 to vector<32x128xf32>
      %17 = arith.maximumf %15, %16 : vector<32x128xf32>
      %c0_15 = arith.constant 0 : index
      %c0_16 = arith.constant 0 : index
      %18 = vector.load %arg6[%c0_15, %c0_16] : memref<32x128xf32, #tpu.memory_space<vmem>>, vector<32x128xf32>
      tpu.vector_store %arg6[%c0_15, %c0_16], %17 {strides = array<i32>} : memref<32x128xf32, #tpu.memory_space<vmem>>, vector<32x128xf32>,
    } else {
    }
    return
  }
  func.func @transform_0(%arg0: i32, %arg1: i32, %arg2: i32) -> (i32, i32) {
    %c0_i32 = arith.constant 0 : i32
    return %arg0, %arg2 : i32, i32
  }
  func.func @transform_1(%arg0: i32, %arg1: i32, %arg2: i32) -> (i32, i32) {
    %c0_i32 = arith.constant 0 : i32
    return %arg2, %arg1 : i32, i32
  }
  func.func @transform_2(%arg0: i32, %arg1: i32, %arg2: i32) -> (i32, i32) {
    %c0_i32 = arith.constant 0 : i32
    %c0_i32_0 = arith.constant 0 : i32
    return %c0_i32, %arg1 : i32, i32
  }
  func.func @transform_3(%arg0: i32, %arg1: i32, %arg2: i32) -> (i32, i32) {
    %c0_i32 = arith.constant 0 : i32
    return %arg0, %arg1 : i32, i32
  }
}

module attributes {stable_mosaic.version = 11 : i64} {
  func.func @_matmul_kernel(%arg0: i32, %arg1: i32, %arg2: i32, %arg3: memref<128x512xbf16, #tpu.memory_space<vmem>>, %arg4: memref<512x128xbf16, #tpu.memory_space<vmem>>, %arg5: memref<1x128xf32, #tpu.memory_space<vmem>>, %arg6: memref<128x128xf32, #tpu.memory_space<vmem>>, %arg7: memref<128x128xf32, #tpu.memory_space<vmem>>) attributes {dimension_semantics = [#tpu.dimension_semantics<parallel>, #tpu.dimension_semantics<parallel>, #tpu.dimension_semantics<arbitrary>], iteration_bounds = array<i64: 1, 1, 1>, scalar_prefetch = 0 : i64, scratch_operands = 1 : i64, tpu.core_type = #tpu.core_type<tc>, window_params = [{transform_indices = @transform_0, window_bounds = array<i64: 128, 512>}, {transform_indices = @transform_1, window_bounds = array<i64: 512, 128>}, {transform_indices = @transform_2, window_bounds = array<i64: 1, 128>}, {transform_indices = @transform_3, window_bounds = array<i64: 128, 128>}]} {
    %c0_i32 = arith.constant 0 : i32
    %0 = arith.cmpi eq, %arg2, %c0_i32 : i32
    %1 = arith.extui %0 : i1 to i32
    %c0_i32_0 = arith.constant 0 : i32
    %2 = arith.cmpi ne, %1, %c0_i32_0 : i32
    scf.if %2 {
      %cst_10 = arith.constant 0.000000e+00 : f32
      %12 = vector.broadcast %cst_10 : f32 to vector<128x128xf32>
      %c0_11 = arith.constant 0 : index
      %c0_12 = arith.constant 0 : index
      %13 = vector.load %arg7[%c0_11, %c0_12] : memref<128x128xf32, #tpu.memory_space<vmem>>, vector<128x128xf32>
      tpu.vector_store %arg7[%c0_11, %c0_12], %12 {strides = array<i32>} : memref<128x128xf32, #tpu.memory_space<vmem>>, vector<128x128xf32>,
    } else {
    }
    %c0 = arith.constant 0 : index
    %c0_1 = arith.constant 0 : index
    %3 = vector.load %arg7[%c0, %c0_1] : memref<128x128xf32, #tpu.memory_space<vmem>>, vector<128x128xf32>
    %c0_2 = arith.constant 0 : index
    %c0_3 = arith.constant 0 : index
    %4 = vector.load %arg3[%c0_2, %c0_3] : memref<128x512xbf16, #tpu.memory_space<vmem>>, vector<128x512xbf16>
    %c0_4 = arith.constant 0 : index
    %c0_5 = arith.constant 0 : index
    %5 = vector.load %arg4[%c0_4, %c0_5] : memref<512x128xbf16, #tpu.memory_space<vmem>>, vector<512x128xbf16>
    %cst = arith.constant dense<0.000000e+00> : vector<128x128xf32>
    %6 = tpu.matmul %4, %5, %cst {dimension_numbers = #tpu.dot_dimension_numbers<[1], [0], [0], [1], [0, 0, 1, 1], [], []>} : vector<128x512xbf16>, vector<512x128xbf16>, vector<128x128xf32> -> vector<128x128xf32>
    %7 = arith.addf %3, %6 : vector<128x128xf32>
    %c0_6 = arith.constant 0 : index
    %c0_7 = arith.constant 0 : index
    %8 = vector.load %arg7[%c0_6, %c0_7] : memref<128x128xf32, #tpu.memory_space<vmem>>, vector<128x128xf32>
    tpu.vector_store %arg7[%c0_6, %c0_7], %7 {strides = array<i32>} : memref<128x128xf32, #tpu.memory_space<vmem>>, vector<128x128xf32>,
    %c0_i32_8 = arith.constant 0 : i32
    %9 = arith.cmpi eq, %arg2, %c0_i32_8 : i32
    %10 = arith.extui %9 : i1 to i32
    %c0_i32_9 = arith.constant 0 : i32
    %11 = arith.cmpi ne, %10, %c0_i32_9 : i32
    scf.if %11 {
      %c0_10 = arith.constant 0 : index
      %c0_11 = arith.constant 0 : index
      %12 = vector.load %arg7[%c0_10, %c0_11] : memref<128x128xf32, #tpu.memory_space<vmem>>, vector<128x128xf32>
      %c0_12 = arith.constant 0 : index
      %c0_13 = arith.constant 0 : index
      %13 = vector.load %arg5[%c0_12, %c0_13] : memref<1x128xf32, #tpu.memory_space<vmem>>, vector<1x128xf32>
      %14 = vector.broadcast %13 : vector<1x128xf32> to vector<128x128xf32>
      %15 = arith.addf %12, %14 : vector<128x128xf32>
      %cst_14 = arith.constant 0.000000e+00 : f32
      %16 = vector.broadcast %cst_14 : f32 to vector<128x128xf32>
      %17 = arith.maximumf %15, %16 : vector<128x128xf32>
      %c0_15 = arith.constant 0 : index
      %c0_16 = arith.constant 0 : index
      %18 = vector.load %arg6[%c0_15, %c0_16] : memref<128x128xf32, #tpu.memory_space<vmem>>, vector<128x128xf32>
      tpu.vector_store %arg6[%c0_15, %c0_16], %17 {strides = array<i32>} : memref<128x128xf32, #tpu.memory_space<vmem>>, vector<128x128xf32>,
    } else {
    }
    return
  }
  func.func @transform_0(%arg0: i32, %arg1: i32, %arg2: i32) -> (i32, i32) {
    %c0_i32 = arith.constant 0 : i32
    return %arg0, %arg2 : i32, i32
  }
  func.func @transform_1(%arg0: i32, %arg1: i32, %arg2: i32) -> (i32, i32) {
    %c0_i32 = arith.constant 0 : i32
    return %arg2, %arg1 : i32, i32
  }
  func.func @transform_2(%arg0: i32, %arg1: i32, %arg2: i32) -> (i32, i32) {
    %c0_i32 = arith.constant 0 : i32
    %c0_i32_0 = arith.constant 0 : i32
    return %c0_i32, %arg1 : i32, i32
  }
  func.func @transform_3(%arg0: i32, %arg1: i32, %arg2: i32) -> (i32, i32) {
    %c0_i32 = arith.constant 0 : i32
    return %arg0, %arg1 : i32, i32
  }
}

module attributes {stable_mosaic.version = 11 : i64} {
  func.func @_scse_kernel(%arg0: i32, %arg1: i32, %arg2: memref<1x64x32xf32, #tpu.memory_space<vmem>>, %arg3: memref<1x1x32xf32, #tpu.memory_space<vmem>>, %arg4: memref<32x32xf32, #tpu.memory_space<vmem>>, %arg5: memref<1x32xf32, #tpu.memory_space<vmem>>, %arg6: memref<1x64x32xf32, #tpu.memory_space<vmem>>) attributes {dimension_semantics = [#tpu.dimension_semantics<parallel>, #tpu.dimension_semantics<parallel>], iteration_bounds = array<i64: 2, 1>, scalar_prefetch = 0 : i64, scratch_operands = 0 : i64, tpu.core_type = #tpu.core_type<tc>, window_params = [{transform_indices = @transform_0, window_bounds = array<i64: 1, 64, 32>}, {transform_indices = @transform_1, window_bounds = array<i64: 1, 1, 32>}, {pipeline_mode = #tpu.pipeline_mode<synchronous>, transform_indices = @transform_2, window_bounds = array<i64: 32, 32>}, {pipeline_mode = #tpu.pipeline_mode<synchronous>, transform_indices = @transform_3, window_bounds = array<i64: 1, 32>}, {transform_indices = @transform_4, window_bounds = array<i64: 1, 64, 32>}]} {
    %c0 = arith.constant 0 : index
    %c0_0 = arith.constant 0 : index
    %c0_1 = arith.constant 0 : index
    %0 = vector.load %arg2[%c0, %c0_0, %c0_1] : memref<1x64x32xf32, #tpu.memory_space<vmem>>, vector<1x64x32xf32>
    %1 = vector.shape_cast %0 : vector<1x64x32xf32> to vector<64x32xf32>
    %c0_2 = arith.constant 0 : index
    %c0_3 = arith.constant 0 : index
    %2 = vector.load %arg4[%c0_2, %c0_3] : memref<32x32xf32, #tpu.memory_space<vmem>>, vector<32x32xf32>
    %cst = arith.constant dense<0.000000e+00> : vector<64x32xf32>
    %3 = tpu.matmul %1, %2, %cst {dimension_numbers = #tpu.dot_dimension_numbers<[1], [0], [0], [1], [0, 0, 1, 1], [], []>} : vector<64x32xf32>, vector<32x32xf32>, vector<64x32xf32> -> vector<64x32xf32>
    %c0_4 = arith.constant 0 : index
    %c0_5 = arith.constant 0 : index
    %4 = vector.load %arg5[%c0_4, %c0_5] : memref<1x32xf32, #tpu.memory_space<vmem>>, vector<1x32xf32>
    %5 = vector.broadcast %4 : vector<1x32xf32> to vector<64x32xf32>
    %6 = arith.addf %3, %5 : vector<64x32xf32>
    %7 = arith.negf %6 : vector<64x32xf32>
    %8 = math.exp %7 : vector<64x32xf32>
    %cst_6 = arith.constant 1.000000e+00 : f32
    %9 = vector.broadcast %cst_6 : f32 to vector<64x32xf32>
    %10 = arith.addf %9, %8 : vector<64x32xf32>
    %11 = arith.divf %9, %10 : vector<64x32xf32>
    %c0_7 = arith.constant 0 : index
    %c0_8 = arith.constant 0 : index
    %c0_9 = arith.constant 0 : index
    %12 = vector.load %arg3[%c0_7, %c0_8, %c0_9] : memref<1x1x32xf32, #tpu.memory_space<vmem>>, vector<1x1x32xf32>
    %13 = vector.shape_cast %12 : vector<1x1x32xf32> to vector<1x32xf32>
    %14 = vector.broadcast %13 : vector<1x32xf32> to vector<64x32xf32>
    %15 = arith.addf %14, %11 : vector<64x32xf32>
    %16 = arith.mulf %1, %15 : vector<64x32xf32>
    %c0_10 = arith.constant 0 : index
    %c0_11 = arith.constant 0 : index
    %c0_12 = arith.constant 0 : index
    %17 = vector.load %arg6[%c0_10, %c0_11, %c0_12] : memref<1x64x32xf32, #tpu.memory_space<vmem>>, vector<1x64x32xf32>
    %18 = vector.shape_cast %17 : vector<1x64x32xf32> to vector<64x32xf32>
    %19 = vector.shape_cast %16 : vector<64x32xf32> to vector<1x64x32xf32>
    tpu.vector_store %arg6[%c0_10, %c0_11, %c0_12], %19 {strides = array<i32>} : memref<1x64x32xf32, #tpu.memory_space<vmem>>, vector<1x64x32xf32>,
    return
  }
  func.func @transform_0(%arg0: i32, %arg1: i32) -> (i32, i32, i32) {
    %c0_i32 = arith.constant 0 : i32
    %c0_i32_0 = arith.constant 0 : i32
    return %arg0, %arg1, %c0_i32 : i32, i32, i32
  }
  func.func @transform_1(%arg0: i32, %arg1: i32) -> (i32, i32, i32) {
    %c0_i32 = arith.constant 0 : i32
    %c0_i32_0 = arith.constant 0 : i32
    %c0_i32_1 = arith.constant 0 : i32
    return %arg0, %c0_i32, %c0_i32_0 : i32, i32, i32
  }
  func.func @transform_2(%arg0: i32, %arg1: i32) -> (i32, i32) {
    %c0_i32 = arith.constant 0 : i32
    %c0_i32_0 = arith.constant 0 : i32
    %c0_i32_1 = arith.constant 0 : i32
    return %c0_i32, %c0_i32_0 : i32, i32
  }
  func.func @transform_3(%arg0: i32, %arg1: i32) -> (i32, i32) {
    %c0_i32 = arith.constant 0 : i32
    %c0_i32_0 = arith.constant 0 : i32
    %c0_i32_1 = arith.constant 0 : i32
    return %c0_i32, %c0_i32_0 : i32, i32
  }
  func.func @transform_4(%arg0: i32, %arg1: i32) -> (i32, i32, i32) {
    %c0_i32 = arith.constant 0 : i32
    %c0_i32_0 = arith.constant 0 : i32
    return %arg0, %arg1, %c0_i32 : i32, i32, i32
  }
}

module attributes {stable_mosaic.version = 11 : i64} {
  func.func @_matmul_kernel(%arg0: i32, %arg1: i32, %arg2: i32, %arg3: memref<256x128xbf16, #tpu.memory_space<vmem>>, %arg4: memref<128x128xbf16, #tpu.memory_space<vmem>>, %arg5: memref<1x128xf32, #tpu.memory_space<vmem>>, %arg6: memref<256x128xf32, #tpu.memory_space<vmem>>, %arg7: memref<256x128xf32, #tpu.memory_space<vmem>>) attributes {dimension_semantics = [#tpu.dimension_semantics<parallel>, #tpu.dimension_semantics<parallel>, #tpu.dimension_semantics<arbitrary>], iteration_bounds = array<i64: 2, 1, 3>, scalar_prefetch = 0 : i64, scratch_operands = 1 : i64, tpu.core_type = #tpu.core_type<tc>, window_params = [{transform_indices = @transform_0, window_bounds = array<i64: 256, 128>}, {transform_indices = @transform_1, window_bounds = array<i64: 128, 128>}, {transform_indices = @transform_2, window_bounds = array<i64: 1, 128>}, {transform_indices = @transform_3, window_bounds = array<i64: 256, 128>}]} {
    %c0_i32 = arith.constant 0 : i32
    %0 = arith.cmpi eq, %arg2, %c0_i32 : i32
    %1 = arith.extui %0 : i1 to i32
    %c0_i32_0 = arith.constant 0 : i32
    %2 = arith.cmpi ne, %1, %c0_i32_0 : i32
    scf.if %2 {
      %cst_9 = arith.constant 0.000000e+00 : f32
      %12 = vector.broadcast %cst_9 : f32 to vector<256x128xf32>
      %c0_10 = arith.constant 0 : index
      %c0_11 = arith.constant 0 : index
      %13 = vector.load %arg7[%c0_10, %c0_11] : memref<256x128xf32, #tpu.memory_space<vmem>>, vector<256x128xf32>
      tpu.vector_store %arg7[%c0_10, %c0_11], %12 {strides = array<i32>} : memref<256x128xf32, #tpu.memory_space<vmem>>, vector<256x128xf32>,
    } else {
    }
    %c0 = arith.constant 0 : index
    %c0_1 = arith.constant 0 : index
    %3 = vector.load %arg7[%c0, %c0_1] : memref<256x128xf32, #tpu.memory_space<vmem>>, vector<256x128xf32>
    %c0_2 = arith.constant 0 : index
    %c0_3 = arith.constant 0 : index
    %4 = vector.load %arg3[%c0_2, %c0_3] : memref<256x128xbf16, #tpu.memory_space<vmem>>, vector<256x128xbf16>
    %c0_4 = arith.constant 0 : index
    %c0_5 = arith.constant 0 : index
    %5 = vector.load %arg4[%c0_4, %c0_5] : memref<128x128xbf16, #tpu.memory_space<vmem>>, vector<128x128xbf16>
    %cst = arith.constant dense<0.000000e+00> : vector<256x128xf32>
    %6 = tpu.matmul %4, %5, %cst {dimension_numbers = #tpu.dot_dimension_numbers<[1], [0], [0], [1], [0, 0, 1, 1], [], []>} : vector<256x128xbf16>, vector<128x128xbf16>, vector<256x128xf32> -> vector<256x128xf32>
    %7 = arith.addf %3, %6 : vector<256x128xf32>
    %c0_6 = arith.constant 0 : index
    %c0_7 = arith.constant 0 : index
    %8 = vector.load %arg7[%c0_6, %c0_7] : memref<256x128xf32, #tpu.memory_space<vmem>>, vector<256x128xf32>
    tpu.vector_store %arg7[%c0_6, %c0_7], %7 {strides = array<i32>} : memref<256x128xf32, #tpu.memory_space<vmem>>, vector<256x128xf32>,
    %c2_i32 = arith.constant 2 : i32
    %9 = arith.cmpi eq, %arg2, %c2_i32 : i32
    %10 = arith.extui %9 : i1 to i32
    %c0_i32_8 = arith.constant 0 : i32
    %11 = arith.cmpi ne, %10, %c0_i32_8 : i32
    scf.if %11 {
      %c0_9 = arith.constant 0 : index
      %c0_10 = arith.constant 0 : index
      %12 = vector.load %arg7[%c0_9, %c0_10] : memref<256x128xf32, #tpu.memory_space<vmem>>, vector<256x128xf32>
      %c0_11 = arith.constant 0 : index
      %c0_12 = arith.constant 0 : index
      %13 = vector.load %arg5[%c0_11, %c0_12] : memref<1x128xf32, #tpu.memory_space<vmem>>, vector<1x128xf32>
      %14 = vector.broadcast %13 : vector<1x128xf32> to vector<256x128xf32>
      %15 = arith.addf %12, %14 : vector<256x128xf32>
      %cst_13 = arith.constant 0.000000e+00 : f32
      %16 = vector.broadcast %cst_13 : f32 to vector<256x128xf32>
      %17 = arith.maximumf %15, %16 : vector<256x128xf32>
      %c0_14 = arith.constant 0 : index
      %c0_15 = arith.constant 0 : index
      %18 = vector.load %arg6[%c0_14, %c0_15] : memref<256x128xf32, #tpu.memory_space<vmem>>, vector<256x128xf32>
      tpu.vector_store %arg6[%c0_14, %c0_15], %17 {strides = array<i32>} : memref<256x128xf32, #tpu.memory_space<vmem>>, vector<256x128xf32>,
    } else {
    }
    return
  }
  func.func @transform_0(%arg0: i32, %arg1: i32, %arg2: i32) -> (i32, i32) {
    %c0_i32 = arith.constant 0 : i32
    return %arg0, %arg2 : i32, i32
  }
  func.func @transform_1(%arg0: i32, %arg1: i32, %arg2: i32) -> (i32, i32) {
    %c0_i32 = arith.constant 0 : i32
    return %arg2, %arg1 : i32, i32
  }
  func.func @transform_2(%arg0: i32, %arg1: i32, %arg2: i32) -> (i32, i32) {
    %c0_i32 = arith.constant 0 : i32
    %c0_i32_0 = arith.constant 0 : i32
    return %c0_i32, %arg1 : i32, i32
  }
  func.func @transform_3(%arg0: i32, %arg1: i32, %arg2: i32) -> (i32, i32) {
    %c0_i32 = arith.constant 0 : i32
    return %arg0, %arg1 : i32, i32
  }
}

module attributes {stable_mosaic.version = 11 : i64} {
  func.func @_scse_kernel(%arg0: i32, %arg1: i32, %arg2: memref<1x256x16xf32, #tpu.memory_space<vmem>>, %arg3: memref<1x1x16xf32, #tpu.memory_space<vmem>>, %arg4: memref<16x16xf32, #tpu.memory_space<vmem>>, %arg5: memref<1x16xf32, #tpu.memory_space<vmem>>, %arg6: memref<1x256x16xf32, #tpu.memory_space<vmem>>) attributes {dimension_semantics = [#tpu.dimension_semantics<parallel>, #tpu.dimension_semantics<parallel>], iteration_bounds = array<i64: 2, 1>, scalar_prefetch = 0 : i64, scratch_operands = 0 : i64, tpu.core_type = #tpu.core_type<tc>, window_params = [{transform_indices = @transform_0, window_bounds = array<i64: 1, 256, 16>}, {transform_indices = @transform_1, window_bounds = array<i64: 1, 1, 16>}, {pipeline_mode = #tpu.pipeline_mode<synchronous>, transform_indices = @transform_2, window_bounds = array<i64: 16, 16>}, {pipeline_mode = #tpu.pipeline_mode<synchronous>, transform_indices = @transform_3, window_bounds = array<i64: 1, 16>}, {transform_indices = @transform_4, window_bounds = array<i64: 1, 256, 16>}]} {
    %c0 = arith.constant 0 : index
    %c0_0 = arith.constant 0 : index
    %c0_1 = arith.constant 0 : index
    %0 = vector.load %arg2[%c0, %c0_0, %c0_1] : memref<1x256x16xf32, #tpu.memory_space<vmem>>, vector<1x256x16xf32>
    %1 = vector.shape_cast %0 : vector<1x256x16xf32> to vector<256x16xf32>
    %c0_2 = arith.constant 0 : index
    %c0_3 = arith.constant 0 : index
    %2 = vector.load %arg4[%c0_2, %c0_3] : memref<16x16xf32, #tpu.memory_space<vmem>>, vector<16x16xf32>
    %cst = arith.constant dense<0.000000e+00> : vector<256x16xf32>
    %3 = tpu.matmul %1, %2, %cst {dimension_numbers = #tpu.dot_dimension_numbers<[1], [0], [0], [1], [0, 0, 1, 1], [], []>} : vector<256x16xf32>, vector<16x16xf32>, vector<256x16xf32> -> vector<256x16xf32>
    %c0_4 = arith.constant 0 : index
    %c0_5 = arith.constant 0 : index
    %4 = vector.load %arg5[%c0_4, %c0_5] : memref<1x16xf32, #tpu.memory_space<vmem>>, vector<1x16xf32>
    %5 = vector.broadcast %4 : vector<1x16xf32> to vector<256x16xf32>
    %6 = arith.addf %3, %5 : vector<256x16xf32>
    %7 = arith.negf %6 : vector<256x16xf32>
    %8 = math.exp %7 : vector<256x16xf32>
    %cst_6 = arith.constant 1.000000e+00 : f32
    %9 = vector.broadcast %cst_6 : f32 to vector<256x16xf32>
    %10 = arith.addf %9, %8 : vector<256x16xf32>
    %11 = arith.divf %9, %10 : vector<256x16xf32>
    %c0_7 = arith.constant 0 : index
    %c0_8 = arith.constant 0 : index
    %c0_9 = arith.constant 0 : index
    %12 = vector.load %arg3[%c0_7, %c0_8, %c0_9] : memref<1x1x16xf32, #tpu.memory_space<vmem>>, vector<1x1x16xf32>
    %13 = vector.shape_cast %12 : vector<1x1x16xf32> to vector<1x16xf32>
    %14 = vector.broadcast %13 : vector<1x16xf32> to vector<256x16xf32>
    %15 = arith.addf %14, %11 : vector<256x16xf32>
    %16 = arith.mulf %1, %15 : vector<256x16xf32>
    %c0_10 = arith.constant 0 : index
    %c0_11 = arith.constant 0 : index
    %c0_12 = arith.constant 0 : index
    %17 = vector.load %arg6[%c0_10, %c0_11, %c0_12] : memref<1x256x16xf32, #tpu.memory_space<vmem>>, vector<1x256x16xf32>
    %18 = vector.shape_cast %17 : vector<1x256x16xf32> to vector<256x16xf32>
    %19 = vector.shape_cast %16 : vector<256x16xf32> to vector<1x256x16xf32>
    tpu.vector_store %arg6[%c0_10, %c0_11, %c0_12], %19 {strides = array<i32>} : memref<1x256x16xf32, #tpu.memory_space<vmem>>, vector<1x256x16xf32>,
    return
  }
  func.func @transform_0(%arg0: i32, %arg1: i32) -> (i32, i32, i32) {
    %c0_i32 = arith.constant 0 : i32
    %c0_i32_0 = arith.constant 0 : i32
    return %arg0, %arg1, %c0_i32 : i32, i32, i32
  }
  func.func @transform_1(%arg0: i32, %arg1: i32) -> (i32, i32, i32) {
    %c0_i32 = arith.constant 0 : i32
    %c0_i32_0 = arith.constant 0 : i32
    %c0_i32_1 = arith.constant 0 : i32
    return %arg0, %c0_i32, %c0_i32_0 : i32, i32, i32
  }
  func.func @transform_2(%arg0: i32, %arg1: i32) -> (i32, i32) {
    %c0_i32 = arith.constant 0 : i32
    %c0_i32_0 = arith.constant 0 : i32
    %c0_i32_1 = arith.constant 0 : i32
    return %c0_i32, %c0_i32_0 : i32, i32
  }
  func.func @transform_3(%arg0: i32, %arg1: i32) -> (i32, i32) {
    %c0_i32 = arith.constant 0 : i32
    %c0_i32_0 = arith.constant 0 : i32
    %c0_i32_1 = arith.constant 0 : i32
    return %c0_i32, %c0_i32_0 : i32, i32
  }
  func.func @transform_4(%arg0: i32, %arg1: i32) -> (i32, i32, i32) {
    %c0_i32 = arith.constant 0 : i32
    %c0_i32_0 = arith.constant 0 : i32
    return %arg0, %arg1, %c0_i32 : i32, i32, i32
  }
}

module attributes {stable_mosaic.version = 11 : i64} {
  func.func @_matmul_kernel(%arg0: i32, %arg1: i32, %arg2: i32, %arg3: memref<256x256xbf16, #tpu.memory_space<vmem>>, %arg4: memref<256x128xbf16, #tpu.memory_space<vmem>>, %arg5: memref<1x128xf32, #tpu.memory_space<vmem>>, %arg6: memref<256x128xf32, #tpu.memory_space<vmem>>, %arg7: memref<256x128xf32, #tpu.memory_space<vmem>>) attributes {dimension_semantics = [#tpu.dimension_semantics<parallel>, #tpu.dimension_semantics<parallel>, #tpu.dimension_semantics<arbitrary>], iteration_bounds = array<i64: 2, 1, 1>, scalar_prefetch = 0 : i64, scratch_operands = 1 : i64, tpu.core_type = #tpu.core_type<tc>, window_params = [{transform_indices = @transform_0, window_bounds = array<i64: 256, 256>}, {transform_indices = @transform_1, window_bounds = array<i64: 256, 128>}, {transform_indices = @transform_2, window_bounds = array<i64: 1, 128>}, {transform_indices = @transform_3, window_bounds = array<i64: 256, 128>}]} {
    %c0_i32 = arith.constant 0 : i32
    %0 = arith.cmpi eq, %arg2, %c0_i32 : i32
    %1 = arith.extui %0 : i1 to i32
    %c0_i32_0 = arith.constant 0 : i32
    %2 = arith.cmpi ne, %1, %c0_i32_0 : i32
    scf.if %2 {
      %cst_10 = arith.constant 0.000000e+00 : f32
      %12 = vector.broadcast %cst_10 : f32 to vector<256x128xf32>
      %c0_11 = arith.constant 0 : index
      %c0_12 = arith.constant 0 : index
      %13 = vector.load %arg7[%c0_11, %c0_12] : memref<256x128xf32, #tpu.memory_space<vmem>>, vector<256x128xf32>
      tpu.vector_store %arg7[%c0_11, %c0_12], %12 {strides = array<i32>} : memref<256x128xf32, #tpu.memory_space<vmem>>, vector<256x128xf32>,
    } else {
    }
    %c0 = arith.constant 0 : index
    %c0_1 = arith.constant 0 : index
    %3 = vector.load %arg7[%c0, %c0_1] : memref<256x128xf32, #tpu.memory_space<vmem>>, vector<256x128xf32>
    %c0_2 = arith.constant 0 : index
    %c0_3 = arith.constant 0 : index
    %4 = vector.load %arg3[%c0_2, %c0_3] : memref<256x256xbf16, #tpu.memory_space<vmem>>, vector<256x256xbf16>
    %c0_4 = arith.constant 0 : index
    %c0_5 = arith.constant 0 : index
    %5 = vector.load %arg4[%c0_4, %c0_5] : memref<256x128xbf16, #tpu.memory_space<vmem>>, vector<256x128xbf16>
    %cst = arith.constant dense<0.000000e+00> : vector<256x128xf32>
    %6 = tpu.matmul %4, %5, %cst {dimension_numbers = #tpu.dot_dimension_numbers<[1], [0], [0], [1], [0, 0, 1, 1], [], []>} : vector<256x256xbf16>, vector<256x128xbf16>, vector<256x128xf32> -> vector<256x128xf32>
    %7 = arith.addf %3, %6 : vector<256x128xf32>
    %c0_6 = arith.constant 0 : index
    %c0_7 = arith.constant 0 : index
    %8 = vector.load %arg7[%c0_6, %c0_7] : memref<256x128xf32, #tpu.memory_space<vmem>>, vector<256x128xf32>
    tpu.vector_store %arg7[%c0_6, %c0_7], %7 {strides = array<i32>} : memref<256x128xf32, #tpu.memory_space<vmem>>, vector<256x128xf32>,
    %c0_i32_8 = arith.constant 0 : i32
    %9 = arith.cmpi eq, %arg2, %c0_i32_8 : i32
    %10 = arith.extui %9 : i1 to i32
    %c0_i32_9 = arith.constant 0 : i32
    %11 = arith.cmpi ne, %10, %c0_i32_9 : i32
    scf.if %11 {
      %c0_10 = arith.constant 0 : index
      %c0_11 = arith.constant 0 : index
      %12 = vector.load %arg7[%c0_10, %c0_11] : memref<256x128xf32, #tpu.memory_space<vmem>>, vector<256x128xf32>
      %c0_12 = arith.constant 0 : index
      %c0_13 = arith.constant 0 : index
      %13 = vector.load %arg5[%c0_12, %c0_13] : memref<1x128xf32, #tpu.memory_space<vmem>>, vector<1x128xf32>
      %14 = vector.broadcast %13 : vector<1x128xf32> to vector<256x128xf32>
      %15 = arith.addf %12, %14 : vector<256x128xf32>
      %c0_14 = arith.constant 0 : index
      %c0_15 = arith.constant 0 : index
      %16 = vector.load %arg6[%c0_14, %c0_15] : memref<256x128xf32, #tpu.memory_space<vmem>>, vector<256x128xf32>
      tpu.vector_store %arg6[%c0_14, %c0_15], %15 {strides = array<i32>} : memref<256x128xf32, #tpu.memory_space<vmem>>, vector<256x128xf32>,
    } else {
    }
    return
  }
  func.func @transform_0(%arg0: i32, %arg1: i32, %arg2: i32) -> (i32, i32) {
    %c0_i32 = arith.constant 0 : i32
    return %arg0, %arg2 : i32, i32
  }
  func.func @transform_1(%arg0: i32, %arg1: i32, %arg2: i32) -> (i32, i32) {
    %c0_i32 = arith.constant 0 : i32
    return %arg2, %arg1 : i32, i32
  }
  func.func @transform_2(%arg0: i32, %arg1: i32, %arg2: i32) -> (i32, i32) {
    %c0_i32 = arith.constant 0 : i32
    %c0_i32_0 = arith.constant 0 : i32
    return %c0_i32, %arg1 : i32, i32
  }
  func.func @transform_3(%arg0: i32, %arg1: i32, %arg2: i32) -> (i32, i32) {
    %c0_i32 = arith.constant 0 : i32
    return %arg0, %arg1 : i32, i32
  }
}

</mosaic_0001>

<bundles_post_ra>
// kernel: nc_net_forward.8
= control target key start
LH: loop header
LB: loop body
LE: loop exit
PB: predicated region body
PF: predicated region fallthrough
CT: control target
= control target key end

     0   :  { %s1212_s12 = smov 0   ;;  %s1214_s13 = smov 0   ;;  %s1362_s0 = inlined_call_operand.vmem [shape: bf16[512,128], index: 0, kind: input, shape index: {}]   ;;  %s1363_s1 = inlined_call_operand.vmem [shape: bf16[128,128], index: 1, kind: input, shape index: {}]   ;;  %s1364_s2 = inlined_call_operand.vmem [shape: f32[1,128], index: 2, kind: input, shape index: {}]   ;;  %s1365_s3 = inlined_call_operand.vmem [shape: f32[512,128], index: 3, kind: output, shape index: {}]  }
   0x1   :  { %s1216_s14 = smov 0  }
   0x2 LB: > { %s32_s15 = sadd.s32 1, %s1186_s13  ;;  %p1000_p0 = scmp.ge.s32.totalorder %s1190_s14, 1  ;;  %s1190_s14 = sphi %s1216_s14, %s13_s14   ;;  %s1186_s13 = sphi %s1214_s13, %s1367_s13   ;;  %s1182_s12 = sphi %s1212_s12, %s1366_s12  }
   0x3   : > { %p34_p1 = scmp.ge.s32.totalorder %s32_s15, 2  ;;  %p188_p2 = scmp.lt.s32.totalorder %s1190_s14, 3 }
   0x5   : > { %s1369_s15 = smov (%p34_p1, %s32_s15), 0  ;;  %p189_p3 = pnand %p1000_p0, %p188_p2 }
   0x6   : > { %s1001_s18 = sshll.u32 (!%p189_p3), %s1182_s12, 5 }
   0x7   : > { %192 = sbr.rel (%p189_p3) target bundleno = 273 (0x111), region = 32  ;;  %p230_p4 = scmp.lt.s32.totalorder (!%p189_p3), %s1001_s18, 63 }
   0xc   : > { %v1144_v0 = vld [vmem:[%s1363_s1 + $0x38] sm:$0xff]   ;;  %v1145_v1 = vld [vmem:[%s1363_s1 + $0x30] sm:$0xff]   ;;  %s1371_s18 = smov (!%p230_p4, %s1001_s18), 63  ;;  %v1146_v2 = vld [vmem:[%s1363_s1 + $0x28] sm:$0xff]  }
   0xd   : > { %1056 = vmatprep.subr.bf16.mxu0 %v1144_v0  ;;  %1104 = vmatprep.subr.bf16.mxu1 %v1144_v0  ;;  %s1002_s23 = sshll.u32 %s1371_s18, 2  ;;  %v1147_v3 = vld [vmem:[%s1363_s1 + $0x20] sm:$0xff]   ;;  %v1148_v6 = vld [vmem:[%s1363_s1 + $0x18] sm:$0xff]   ;;  %v1149_v7 = vld [vmem:[%s1363_s1 + $0x10] sm:$0xff]   ;;  %s1004_s12 = sshll.u32 %s1371_s18, 3 }
   0xe   : > { %1057 = vmatpush3.bf16.msra.mxu0 %v1144_v0  ;;  %1112 = vmatpush3.bf16.msra.mxu1 %v1144_v0  ;;  %s1245_s26 = scalar_lea.vmem %s1362_s0, %s1002_s23  ;;  %v1150_v8 = vld [vmem:[%s1363_s1 + $0x8] sm:$0xff]   ;;  %v1151_v9 = vld [vmem:[%s1363_s1] sm:$0xff]   ;;  %s1289_s19 = scalar_lea.vmem %s1365_s3, %s1004_s12 }
   0xf   : > { %1058 = vmatprep.subr.bf16.mxu0 %v1145_v1  ;;  %1105 = vmatprep.subr.bf16.mxu1 %v1145_v1  ;;  %v1152_v4 = vld [vmem:[%s1245_s26] sm:$0xff]   ;;  %v1154_v10 = vld [vmem:[%s1245_s26 + $0x8] sm:$0xff]   ;;  %v1156_v12 = vld [vmem:[%s1245_s26 + $0x10] sm:$0xff]  }
  0x10   : > { %v1153_v5 = vld [vmem:[%s1245_s26 + $0x40] sm:$0xff]   ;;  %1072 = vmatprep.mubr.bf16.mxu0 %v1152_v4  ;;  %v1155_v11 = vld [vmem:[%s1245_s26 + $0x48] sm:$0xff]   ;;  %v1157_v13 = vld [vmem:[%s1245_s26 + $0x50] sm:$0xff]  }
  0x11   : > { %1088 = vmatprep.mubr.bf16.mxu1 %v1153_v5  ;;  %v1158_v14 = vld [vmem:[%s1245_s26 + $0x18] sm:$0xff]   ;;  %v1160_v16 = vld [vmem:[%s1245_s26 + $0x20] sm:$0xff]   ;;  %v1162_v18 = vld [vmem:[%s1245_s26 + $0x28] sm:$0xff]  }
  0x12   : > { %1059 = vmatpush3.bf16.msra.mxu0 %v1145_v1  ;;  %1113 = vmatpush3.bf16.msra.mxu1 %v1145_v1  ;;  %v1159_v15 = vld [vmem:[%s1245_s26 + $0x58] sm:$0xff]   ;;  %v1161_v17 = vld [vmem:[%s1245_s26 + $0x60] sm:$0xff]   ;;  %v1163_v19 = vld [vmem:[%s1245_s26 + $0x68] sm:$0xff]  }
  0x13   : > { %1060 = vmatprep.subr.bf16.mxu0 %v1146_v2  ;;  %1106 = vmatprep.subr.bf16.mxu1 %v1146_v2  ;;  %v1164_v20 = vld [vmem:[%s1245_s26 + $0x30] sm:$0xff]   ;;  %v1166_v22 = vld [vmem:[%s1245_s26 + $0x38] sm:$0xff]   ;;  %v1281_v24 = vld [vmem:[%s1364_s2] ss:$0 sm:$0xff] }
  0x14   : > { %v1165_v21 = vld [vmem:[%s1245_s26 + $0x70] sm:$0xff]   ;;  %v1167_v23 = vld [vmem:[%s1245_s26 + $0x78] sm:$0xff]  }
  0x16   : > { %1061 = vmatpush3.bf16.msra.mxu0 %v1146_v2  ;;  %1114 = vmatpush3.bf16.msra.mxu1 %v1146_v2 }
  0x17   : > { %1062 = vmatprep.subr.bf16.mxu0 %v1147_v3  ;;  %1107 = vmatprep.subr.bf16.mxu1 %v1147_v3 }
  0x1a   : > { %1063 = vmatpush3.bf16.msra.mxu0 %v1147_v3  ;;  %1115 = vmatpush3.bf16.msra.mxu1 %v1147_v3 }
  0x1b   : > { %1064 = vmatprep.subr.bf16.mxu0 %v1148_v6  ;;  %1108 = vmatprep.subr.bf16.mxu1 %v1148_v6 }
  0x1e   : > { %1065 = vmatpush3.bf16.msra.mxu0 %v1148_v6  ;;  %1116 = vmatpush3.bf16.msra.mxu1 %v1148_v6 }
  0x1f   : > { %1066 = vmatprep.subr.bf16.mxu0 %v1149_v7  ;;  %1109 = vmatprep.subr.bf16.mxu1 %v1149_v7 }
  0x22   : > { %1067 = vmatpush3.bf16.msra.mxu0 %v1149_v7  ;;  %1117 = vmatpush3.bf16.msra.mxu1 %v1149_v7 }
  0x23   : > { %1068 = vmatprep.subr.bf16.mxu0 %v1150_v8  ;;  %1110 = vmatprep.subr.bf16.mxu1 %v1150_v8 }
  0x26   : > { %1069 = vmatpush3.bf16.msra.mxu0 %v1150_v8  ;;  %1118 = vmatpush3.bf16.msra.mxu1 %v1150_v8 }
  0x27   : > { %1070 = vmatprep.subr.bf16.mxu0 %v1151_v9  ;;  %1111 = vmatprep.subr.bf16.mxu1 %v1151_v9 }
  0x2a   : > { %1071 = vmatpush3.bf16.msra.mxu0 %v1151_v9  ;;  %1119 = vmatpush3.bf16.msra.mxu1 %v1151_v9 }
  0x2d   : > { %1073 = vmatmul.mubr.bf16.vlgmr.msra.gmra.mxu0 %v1154_v10  ;;  %1089 = vmatmul.mubr.bf16.vlgmr.msra.gmra.mxu1 %v1155_v11 }
  0x2e   : > { %1076 = vmatprep.mubr.bf16.mxu0 %v1156_v12  ;;  %1092 = vmatprep.mubr.bf16.mxu1 %v1157_v13 }
  0x35   : > { %1077 = vmatmul.mubr.bf16.gmra.mxu0 %v1158_v14  ;;  %1093 = vmatmul.mubr.bf16.gmra.mxu1 %v1159_v15 }
  0x36   : > { %1080 = vmatprep.mubr.bf16.mxu0 %v1160_v16  ;;  %1096 = vmatprep.mubr.bf16.mxu1 %v1161_v17 }
  0x3d   : > { %1081 = vmatmul.mubr.bf16.gmra.mxu0 %v1162_v18  ;;  %1097 = vmatmul.mubr.bf16.gmra.mxu1 %v1163_v19 }
  0x3e   : > { %1084 = vmatprep.mubr.bf16.mxu0 %v1164_v20  ;;  %1100 = vmatprep.mubr.bf16.mxu1 %v1165_v21 }
  0x45   : > { %1085 = vmatmul.mubr.bf16.gmra.mxu0 %v1166_v22  ;;  %1101 = vmatmul.mubr.bf16.gmra.mxu1 %v1167_v23 }
  0xed   : > { %v1074_v25 = vpop.f32.mrf.mxu0  ;;  %v1090_v26 = vpop.f32.mrf.mxu1 }
  0xee   : > { %v789_v27 = vadd.f32 %v1074_v25, %v1281_v24  ;;  %v805_v28 = vadd.f32 %v1090_v26, %v1281_v24 }
  0xef   : > { %v554_v29 = vpop.f32.mrf.mxu0  ;;  %v618_v30 = vpop.f32.mrf.mxu1 }
  0xf0   : > { %v821_v31 = vmax.f32 %v789_v27, 0.0  ;;  %v837_v32 = vmax.f32 %v805_v28, 0.0  ;;  %v787_v33 = vadd.f32 %v1281_v24, %v554_v29  ;;  %v803_v34 = vadd.f32 %v1281_v24, %v618_v30 }
  0xf1   : > { %v1075_v35 = vpop.f32.mrf.mxu0  ;;  %v1091_v36 = vpop.f32.mrf.mxu1 }
  0xf2   : > { %853 = vst [vmem:[%s1289_s19 + $0x10] sm:$0xff] %v821_v31  ;;  %869 = vst [vmem:[%s1289_s19 + $0x90] sm:$0xff] %v837_v32  ;;  %v819_v37 = vmax.f32 %v787_v33, 0.0  ;;  %v835_v38 = vmax.f32 %v803_v34, 0.0  ;;  %v790_v39 = vadd.f32 %v1075_v35, %v1281_v24  ;;  %v806_v40 = vadd.f32 %v1091_v36, %v1281_v24 }
  0xf3   : > { %v557_v41 = vpop.f32.mrf.mxu0  ;;  %v621_v42 = vpop.f32.mrf.mxu1 }
  0xf4   : > { %851 = vst [vmem:[%s1289_s19] sm:$0xff] %v819_v37  ;;  %867 = vst [vmem:[%s1289_s19 + $0x80] sm:$0xff] %v835_v38  ;;  %v822_v43 = vmax.f32 %v790_v39, 0.0  ;;  %v838_v44 = vmax.f32 %v806_v40, 0.0  ;;  %v788_v45 = vadd.f32 %v1281_v24, %v557_v41  ;;  %v804_v46 = vadd.f32 %v1281_v24, %v621_v42 }
  0xf5   : > { %v1078_v47 = vpop.f32.mrf.mxu0  ;;  %v1094_v48 = vpop.f32.mrf.mxu1 }
  0xf6   : > { %854 = vst [vmem:[%s1289_s19 + $0x18] sm:$0xff] %v822_v43  ;;  %870 = vst [vmem:[%s1289_s19 + $0x98] sm:$0xff] %v838_v44  ;;  %v820_v49 = vmax.f32 %v788_v45, 0.0  ;;  %v836_v50 = vmax.f32 %v804_v46, 0.0  ;;  %v793_v51 = vadd.f32 %v1078_v47, %v1281_v24  ;;  %v809_v52 = vadd.f32 %v1094_v48, %v1281_v24 }
  0xf7   : > { %v570_v53 = vpop.f32.mrf.mxu0  ;;  %v634_v54 = vpop.f32.mrf.mxu1 }
  0xf8   : > { %852 = vst [vmem:[%s1289_s19 + $0x8] sm:$0xff] %v820_v49  ;;  %868 = vst [vmem:[%s1289_s19 + $0x88] sm:$0xff] %v836_v50  ;;  %v825_v55 = vmax.f32 %v793_v51, 0.0  ;;  %v841_v56 = vmax.f32 %v809_v52, 0.0  ;;  %v791_v57 = vadd.f32 %v1281_v24, %v570_v53  ;;  %v807_v58 = vadd.f32 %v1281_v24, %v634_v54 }
  0xf9   : > { %v1079_v59 = vpop.f32.mrf.mxu0  ;;  %v1095_v60 = vpop.f32.mrf.mxu1 }
  0xfa   : > { %857 = vst [vmem:[%s1289_s19 + $0x30] sm:$0xff] %v825_v55  ;;  %873 = vst [vmem:[%s1289_s19 + $0xb0] sm:$0xff] %v841_v56  ;;  %v823_v61 = vmax.f32 %v791_v57, 0.0  ;;  %v839_v62 = vmax.f32 %v807_v58, 0.0  ;;  %v794_v63 = vadd.f32 %v1079_v59, %v1281_v24  ;;  %v810_v0 = vadd.f32 %v1095_v60, %v1281_v24 }
  0xfb   : > { %v573_v1 = vpop.f32.mrf.mxu0  ;;  %v637_v2 = vpop.f32.mrf.mxu1 }
  0xfc   : > { %855 = vst [vmem:[%s1289_s19 + $0x20] sm:$0xff] %v823_v61  ;;  %871 = vst [vmem:[%s1289_s19 + $0xa0] sm:$0xff] %v839_v62  ;;  %v826_v3 = vmax.f32 %v794_v63, 0.0  ;;  %v842_v4 = vmax.f32 %v810_v0, 0.0  ;;  %v792_v5 = vadd.f32 %v1281_v24, %v573_v1  ;;  %v808_v6 = vadd.f32 %v1281_v24, %v637_v2 }
  0xfd   : > { %v1082_v7 = vpop.f32.mrf.mxu0  ;;  %v1098_v8 = vpop.f32.mrf.mxu1 }
  0xfe   : > { %858 = vst [vmem:[%s1289_s19 + $0x38] sm:$0xff] %v826_v3  ;;  %874 = vst [vmem:[%s1289_s19 + $0xb8] sm:$0xff] %v842_v4  ;;  %v824_v9 = vmax.f32 %v792_v5, 0.0  ;;  %v840_v10 = vmax.f32 %v808_v6, 0.0  ;;  %v797_v11 = vadd.f32 %v1082_v7, %v1281_v24  ;;  %v813_v12 = vadd.f32 %v1098_v8, %v1281_v24 }
  0xff   : > { %v586_v13 = vpop.f32.mrf.mxu0  ;;  %v650_v14 = vpop.f32.mrf.mxu1 }
 0x100   : > { %856 = vst [vmem:[%s1289_s19 + $0x28] sm:$0xff] %v824_v9  ;;  %872 = vst [vmem:[%s1289_s19 + $0xa8] sm:$0xff] %v840_v10  ;;  %v829_v15 = vmax.f32 %v797_v11, 0.0  ;;  %v845_v16 = vmax.f32 %v813_v12, 0.0  ;;  %v795_v17 = vadd.f32 %v1281_v24, %v586_v13  ;;  %v811_v18 = vadd.f32 %v1281_v24, %v650_v14 }
 0x101   : > { %v1083_v19 = vpop.f32.mrf.mxu0  ;;  %v1099_v20 = vpop.f32.mrf.mxu1 }
 0x102   : > { %861 = vst [vmem:[%s1289_s19 + $0x50] sm:$0xff] %v829_v15  ;;  %877 = vst [vmem:[%s1289_s19 + $0xd0] sm:$0xff] %v845_v16  ;;  %v827_v21 = vmax.f32 %v795_v17, 0.0  ;;  %v843_v22 = vmax.f32 %v811_v18, 0.0  ;;  %v798_v23 = vadd.f32 %v1083_v19, %v1281_v24  ;;  %v814_v25 = vadd.f32 %v1099_v20, %v1281_v24 }
 0x103   : > { %v589_v26 = vpop.f32.mrf.mxu0  ;;  %v653_v27 = vpop.f32.mrf.mxu1 }
 0x104   : > { %859 = vst [vmem:[%s1289_s19 + $0x40] sm:$0xff] %v827_v21  ;;  %875 = vst [vmem:[%s1289_s19 + $0xc0] sm:$0xff] %v843_v22  ;;  %v830_v28 = vmax.f32 %v798_v23, 0.0  ;;  %v846_v29 = vmax.f32 %v814_v25, 0.0  ;;  %v796_v30 = vadd.f32 %v1281_v24, %v589_v26  ;;  %v812_v31 = vadd.f32 %v1281_v24, %v653_v27 }
 0x105   : > { %v1086_v32 = vpop.f32.mrf.mxu0  ;;  %v1102_v33 = vpop.f32.mrf.mxu1 }
 0x106   : > { %862 = vst [vmem:[%s1289_s19 + $0x58] sm:$0xff] %v830_v28  ;;  %878 = vst [vmem:[%s1289_s19 + $0xd8] sm:$0xff] %v846_v29  ;;  %v828_v34 = vmax.f32 %v796_v30, 0.0  ;;  %v844_v35 = vmax.f32 %v812_v31, 0.0  ;;  %v801_v36 = vadd.f32 %v1086_v32, %v1281_v24  ;;  %v817_v37 = vadd.f32 %v1102_v33, %v1281_v24 }
 0x107   : > { %v602_v38 = vpop.f32.mrf.mxu0  ;;  %v666_v39 = vpop.f32.mrf.mxu1 }
 0x108   : > { %860 = vst [vmem:[%s1289_s19 + $0x48] sm:$0xff] %v828_v34  ;;  %876 = vst [vmem:[%s1289_s19 + $0xc8] sm:$0xff] %v844_v35  ;;  %v833_v40 = vmax.f32 %v801_v36, 0.0  ;;  %v849_v41 = vmax.f32 %v817_v37, 0.0  ;;  %v799_v42 = vadd.f32 %v1281_v24, %v602_v38  ;;  %v815_v43 = vadd.f32 %v1281_v24, %v666_v39 }
 0x109   : > { %v1087_v44 = vpop.f32.mrf.mxu0  ;;  %v1103_v45 = vpop.f32.mrf.mxu1 }
 0x10a   : > { %865 = vst [vmem:[%s1289_s19 + $0x70] sm:$0xff] %v833_v40  ;;  %881 = vst [vmem:[%s1289_s19 + $0xf0] sm:$0xff] %v849_v41  ;;  %v831_v46 = vmax.f32 %v799_v42, 0.0  ;;  %v847_v47 = vmax.f32 %v815_v43, 0.0  ;;  %v802_v48 = vadd.f32 %v1087_v44, %v1281_v24  ;;  %v818_v49 = vadd.f32 %v1103_v45, %v1281_v24 }
 0x10b   : > { %v605_v50 = vpop.f32.mrf.mxu0  ;;  %v669_v51 = vpop.f32.mrf.mxu1 }
 0x10c   : > { %863 = vst [vmem:[%s1289_s19 + $0x60] sm:$0xff] %v831_v46  ;;  %879 = vst [vmem:[%s1289_s19 + $0xe0] sm:$0xff] %v847_v47  ;;  %v834_v52 = vmax.f32 %v802_v48, 0.0  ;;  %v850_v53 = vmax.f32 %v818_v49, 0.0  ;;  %v800_v54 = vadd.f32 %v1281_v24, %v605_v50  ;;  %v816_v55 = vadd.f32 %v1281_v24, %v669_v51 }
 0x10e   : > { %866 = vst [vmem:[%s1289_s19 + $0x78] sm:$0xff] %v834_v52  ;;  %882 = vst [vmem:[%s1289_s19 + $0xf8] sm:$0xff] %v850_v53  ;;  %v832_v56 = vmax.f32 %v800_v54, 0.0  ;;  %v848_v57 = vmax.f32 %v816_v55, 0.0 }
 0x110   : > { %864 = vst [vmem:[%s1289_s19 + $0x68] sm:$0xff] %v832_v56  ;;  %880 = vst [vmem:[%s1289_s19 + $0xe8] sm:$0xff] %v848_v57 }
 0x111 PF: > { %s13_s14 = sadd.s32 1, %s1190_s14   ;;  %s1366_s12 = smov %s1186_s13 }
 0x112   : > { %p10_p5 = scmp.ge.s32.totalorder %s13_s14, 4   ;;  %s1367_s13 = smov %s1369_s15 }
 0x114   :  { %12 = sbr.rel (!%p10_p5) target bundleno = 2 (0x2), region = 76 }

// kernel: nc_net_forward.9
= control target key start
LH: loop header
LB: loop body
LE: loop exit
PB: predicated region body
PF: predicated region fallthrough
CT: control target
= control target key end

     0   :  { %s602_s1 = inlined_call_operand.vmem [shape: bf16[128,128], index: 1, kind: input, shape index: {}]   ;;  %s603_s0 = inlined_call_operand.vmem [shape: bf16[128,128], index: 0, kind: input, shape index: {}]   ;;  %s604_s2 = inlined_call_operand.vmem [shape: f32[1,128], index: 2, kind: input, shape index: {}]   ;;  %s605_s3 = inlined_call_operand.vmem [shape: f32[128,128], index: 3, kind: output, shape index: {}]  }
   0x1   :  { %v467_v0 = vld [vmem:[%s602_s1 + $0x38] sm:$0xff]   ;;  %v468_v1 = vld [vmem:[%s602_s1 + $0x30] sm:$0xff]   ;;  %v469_v2 = vld [vmem:[%s602_s1 + $0x28] sm:$0xff]  }
   0x2   :  { %419 = vmatprep.subr.bf16.mxu0 %v467_v0  ;;  %451 = vmatprep.subr.bf16.mxu1 %v467_v0  ;;  %v470_v3 = vld [vmem:[%s602_s1 + $0x20] sm:$0xff]   ;;  %v471_v6 = vld [vmem:[%s602_s1 + $0x18] sm:$0xff]   ;;  %v472_v7 = vld [vmem:[%s602_s1 + $0x10] sm:$0xff]  }
   0x3   :  { %420 = vmatpush3.bf16.msra.mxu0 %v467_v0  ;;  %459 = vmatpush3.bf16.msra.mxu1 %v467_v0  ;;  %v475_v4 = vld [vmem:[%s603_s0] sm:$0xff]   ;;  %v473_v8 = vld [vmem:[%s602_s1 + $0x8] sm:$0xff]   ;;  %v479_v12 = vld [vmem:[%s603_s0 + $0x10] sm:$0xff]  }
   0x4   :  { %421 = vmatprep.subr.bf16.mxu0 %v468_v1  ;;  %452 = vmatprep.subr.bf16.mxu1 %v468_v1  ;;  %v476_v5 = vld [vmem:[%s603_s0 + $0x20] sm:$0xff]   ;;  %v477_v10 = vld [vmem:[%s603_s0 + $0x8] sm:$0xff]   ;;  %v480_v13 = vld [vmem:[%s603_s0 + $0x30] sm:$0xff]  }
   0x5   :  { %435 = vmatprep.mubr.bf16.mxu0 %v475_v4  ;;  %443 = vmatprep.mubr.bf16.mxu1 %v476_v5  ;;  %v474_v9 = vld [vmem:[%s602_s1] sm:$0xff]   ;;  %v478_v11 = vld [vmem:[%s603_s0 + $0x28] sm:$0xff]   ;;  %v481_v14 = vld [vmem:[%s603_s0 + $0x18] sm:$0xff]  }
   0x6   :  { %v482_v15 = vld [vmem:[%s603_s0 + $0x38] sm:$0xff]   ;;  %v402_v16 = vld [vmem:[%s604_s2] ss:$0 sm:$0xff] }
   0x7   :  { %422 = vmatpush3.bf16.msra.mxu0 %v468_v1  ;;  %460 = vmatpush3.bf16.msra.mxu1 %v468_v1 }
   0x8   :  { %423 = vmatprep.subr.bf16.mxu0 %v469_v2  ;;  %453 = vmatprep.subr.bf16.mxu1 %v469_v2 }
   0xb   :  { %424 = vmatpush3.bf16.msra.mxu0 %v469_v2  ;;  %461 = vmatpush3.bf16.msra.mxu1 %v469_v2 }
   0xc   :  { %425 = vmatprep.subr.bf16.mxu0 %v470_v3  ;;  %454 = vmatprep.subr.bf16.mxu1 %v470_v3 }
   0xf   :  { %426 = vmatpush3.bf16.msra.mxu0 %v470_v3  ;;  %462 = vmatpush3.bf16.msra.mxu1 %v470_v3 }
  0x10   :  { %427 = vmatprep.subr.bf16.mxu0 %v471_v6  ;;  %455 = vmatprep.subr.bf16.mxu1 %v471_v6 }
  0x13   :  { %428 = vmatpush3.bf16.msra.mxu0 %v471_v6  ;;  %463 = vmatpush3.bf16.msra.mxu1 %v471_v6 }
  0x14   :  { %429 = vmatprep.subr.bf16.mxu0 %v472_v7  ;;  %456 = vmatprep.subr.bf16.mxu1 %v472_v7 }
  0x17   :  { %430 = vmatpush3.bf16.msra.mxu0 %v472_v7  ;;  %464 = vmatpush3.bf16.msra.mxu1 %v472_v7 }
  0x18   :  { %431 = vmatprep.subr.bf16.mxu0 %v473_v8  ;;  %457 = vmatprep.subr.bf16.mxu1 %v473_v8 }
  0x1b   :  { %432 = vmatpush3.bf16.msra.mxu0 %v473_v8  ;;  %465 = vmatpush3.bf16.msra.mxu1 %v473_v8 }
  0x1c   :  { %433 = vmatprep.subr.bf16.mxu0 %v474_v9  ;;  %458 = vmatprep.subr.bf16.mxu1 %v474_v9 }
  0x1f   :  { %434 = vmatpush3.bf16.msra.mxu0 %v474_v9  ;;  %466 = vmatpush3.bf16.msra.mxu1 %v474_v9 }
  0x22   :  { %436 = vmatmul.mubr.bf16.vlgmr.msra.gmra.mxu0 %v477_v10  ;;  %444 = vmatmul.mubr.bf16.vlgmr.msra.gmra.mxu1 %v478_v11 }
  0x23   :  { %439 = vmatprep.mubr.bf16.mxu0 %v479_v12  ;;  %447 = vmatprep.mubr.bf16.mxu1 %v480_v13 }
  0x2a   :  { %440 = vmatmul.mubr.bf16.gmra.mxu0 %v481_v14  ;;  %448 = vmatmul.mubr.bf16.gmra.mxu1 %v482_v15 }
  0xe2   :  { %v437_v17 = vpop.f32.mrf.mxu0  ;;  %v445_v18 = vpop.f32.mrf.mxu1 }
  0xe3   :  { %v336_v19 = vadd.f32 %v437_v17, %v402_v16  ;;  %v344_v20 = vadd.f32 %v445_v18, %v402_v16 }
  0xe4   :  { %v213_v21 = vpop.f32.mrf.mxu0  ;;  %v245_v22 = vpop.f32.mrf.mxu1 }
  0xe5   :  { %v352_v23 = vmax.f32 %v336_v19, 0.0  ;;  %v360_v24 = vmax.f32 %v344_v20, 0.0  ;;  %v334_v25 = vadd.f32 %v402_v16, %v213_v21  ;;  %v342_v26 = vadd.f32 %v402_v16, %v245_v22 }
  0xe6   :  { %v438_v27 = vpop.f32.mrf.mxu0  ;;  %v446_v28 = vpop.f32.mrf.mxu1 }
  0xe7   :  { %368 = vst [vmem:[%s605_s3 + $0x10] sm:$0xff] %v352_v23  ;;  %376 = vst [vmem:[%s605_s3 + $0x50] sm:$0xff] %v360_v24  ;;  %v350_v29 = vmax.f32 %v334_v25, 0.0  ;;  %v358_v30 = vmax.f32 %v342_v26, 0.0  ;;  %v337_v31 = vadd.f32 %v438_v27, %v402_v16  ;;  %v345_v32 = vadd.f32 %v446_v28, %v402_v16 }
  0xe8   :  { %v216_v33 = vpop.f32.mrf.mxu0  ;;  %v248_v34 = vpop.f32.mrf.mxu1 }
  0xe9   :  { %366 = vst [vmem:[%s605_s3] sm:$0xff] %v350_v29  ;;  %374 = vst [vmem:[%s605_s3 + $0x40] sm:$0xff] %v358_v30  ;;  %v353_v35 = vmax.f32 %v337_v31, 0.0  ;;  %v361_v36 = vmax.f32 %v345_v32, 0.0  ;;  %v335_v37 = vadd.f32 %v402_v16, %v216_v33  ;;  %v343_v38 = vadd.f32 %v402_v16, %v248_v34 }
  0xea   :  { %v441_v39 = vpop.f32.mrf.mxu0  ;;  %v449_v40 = vpop.f32.mrf.mxu1 }
  0xeb   :  { %369 = vst [vmem:[%s605_s3 + $0x18] sm:$0xff] %v353_v35  ;;  %377 = vst [vmem:[%s605_s3 + $0x58] sm:$0xff] %v361_v36  ;;  %v351_v41 = vmax.f32 %v335_v37, 0.0  ;;  %v359_v42 = vmax.f32 %v343_v38, 0.0  ;;  %v340_v43 = vadd.f32 %v441_v39, %v402_v16  ;;  %v348_v44 = vadd.f32 %v449_v40, %v402_v16 }
  0xec   :  { %v229_v45 = vpop.f32.mrf.mxu0  ;;  %v261_v46 = vpop.f32.mrf.mxu1 }
  0xed   :  { %367 = vst [vmem:[%s605_s3 + $0x8] sm:$0xff] %v351_v41  ;;  %375 = vst [vmem:[%s605_s3 + $0x48] sm:$0xff] %v359_v42  ;;  %v356_v47 = vmax.f32 %v340_v43, 0.0  ;;  %v364_v48 = vmax.f32 %v348_v44, 0.0  ;;  %v338_v49 = vadd.f32 %v402_v16, %v229_v45  ;;  %v346_v50 = vadd.f32 %v402_v16, %v261_v46 }
  0xee   :  { %v442_v51 = vpop.f32.mrf.mxu0  ;;  %v450_v52 = vpop.f32.mrf.mxu1 }
  0xef   :  { %372 = vst [vmem:[%s605_s3 + $0x30] sm:$0xff] %v356_v47  ;;  %380 = vst [vmem:[%s605_s3 + $0x70] sm:$0xff] %v364_v48  ;;  %v354_v53 = vmax.f32 %v338_v49, 0.0  ;;  %v362_v54 = vmax.f32 %v346_v50, 0.0  ;;  %v341_v55 = vadd.f32 %v442_v51, %v402_v16  ;;  %v349_v56 = vadd.f32 %v450_v52, %v402_v16 }
  0xf0   :  { %v232_v57 = vpop.f32.mrf.mxu0  ;;  %v264_v58 = vpop.f32.mrf.mxu1 }
  0xf1   :  { %370 = vst [vmem:[%s605_s3 + $0x20] sm:$0xff] %v354_v53  ;;  %378 = vst [vmem:[%s605_s3 + $0x60] sm:$0xff] %v362_v54  ;;  %v357_v59 = vmax.f32 %v341_v55, 0.0  ;;  %v365_v60 = vmax.f32 %v349_v56, 0.0  ;;  %v339_v61 = vadd.f32 %v402_v16, %v232_v57  ;;  %v347_v62 = vadd.f32 %v402_v16, %v264_v58 }
  0xf3   :  { %373 = vst [vmem:[%s605_s3 + $0x38] sm:$0xff] %v357_v59  ;;  %381 = vst [vmem:[%s605_s3 + $0x78] sm:$0xff] %v365_v60  ;;  %v355_v63 = vmax.f32 %v339_v61, 0.0  ;;  %v363_v0 = vmax.f32 %v347_v62, 0.0 }
  0xf5   :  { %371 = vst [vmem:[%s605_s3 + $0x28] sm:$0xff] %v355_v63  ;;  %379 = vst [vmem:[%s605_s3 + $0x68] sm:$0xff] %v363_v0 }

// kernel: nc_net_forward.10
= control target key start
LH: loop header
LB: loop body
LE: loop exit
PB: predicated region body
PF: predicated region fallthrough
CT: control target
= control target key end

     0   :  { %s448_s1 = inlined_call_operand.vmem [shape: bf16[256,128], index: 1, kind: input, shape index: {}]   ;;  %s449_s0 = inlined_call_operand.vmem [shape: bf16[32,256], index: 0, kind: input, shape index: {}]   ;;  %s450_s2 = inlined_call_operand.vmem [shape: f32[1,128], index: 2, kind: input, shape index: {}]   ;;  %s451_s3 = inlined_call_operand.vmem [shape: f32[32,128], index: 3, kind: output, shape index: {}]  }
   0x1   :  { %v331_v0 = vld [vmem:[%s448_s1 + $0x78] sm:$0xff]   ;;  %v333_v2 = vld [vmem:[%s448_s1 + $0x70] sm:$0xff]   ;;  %v335_v4 = vld [vmem:[%s448_s1 + $0x68] sm:$0xff]  }
   0x2   :  { %v332_v1 = vld [vmem:[%s448_s1 + $0x38] sm:$0xff]   ;;  %287 = vmatprep.subr.bf16.mxu0 %v331_v0  ;;  %315 = vmatprep.subr.bf16.mxu1 %v331_v0  ;;  %v334_v3 = vld [vmem:[%s448_s1 + $0x30] sm:$0xff]   ;;  %v336_v5 = vld [vmem:[%s448_s1 + $0x28] sm:$0xff]  }
   0x3   :  { %288 = vmatpush3.bf16.msra.mxu0 %v332_v1  ;;  %323 = vmatpush3.bf16.msra.mxu1 %v332_v1  ;;  %v337_v6 = vld [vmem:[%s448_s1 + $0x60] sm:$0xff]   ;;  %v339_v8 = vld [vmem:[%s448_s1 + $0x58] sm:$0xff]   ;;  %v341_v10 = vld [vmem:[%s448_s1 + $0x50] sm:$0xff]  }
   0x4   :  { %289 = vmatprep.subr.bf16.mxu0 %v333_v2  ;;  %316 = vmatprep.subr.bf16.mxu1 %v333_v2  ;;  %v338_v7 = vld [vmem:[%s448_s1 + $0x20] sm:$0xff]   ;;  %v340_v9 = vld [vmem:[%s448_s1 + $0x18] sm:$0xff]   ;;  %v342_v13 = vld [vmem:[%s448_s1 + $0x10] sm:$0xff]  }
   0x5   :  { %v349_v11 = vld [vmem:[%s449_s0 + $0x4] ss:$8 sps:$4 sm:$0xff]   ;;  %v352_v12 = vld [vmem:[%s449_s0 + $0x14] ss:$8 sps:$4 sm:$0xff]   ;;  %v347_v18 = vld [vmem:[%s449_s0] ss:$8 sps:$4 sm:$0xff]  }
   0x6   :  { %v343_v14 = vld [vmem:[%s448_s1 + $0x48] sm:$0xff]   ;;  %211 = vmatprep.mubr.bf16.mxu0 %v349_v11  ;;  %219 = vmatprep.mubr.bf16.mxu1 %v352_v12  ;;  %v345_v16 = vld [vmem:[%s448_s1 + $0x40] sm:$0xff]   ;;  %v350_v19 = vld [vmem:[%s449_s0 + $0x10] ss:$8 sps:$4 sm:$0xff]  }
   0x7   :  { %290 = vmatpush3.bf16.msra.mxu0 %v334_v3  ;;  %324 = vmatpush3.bf16.msra.mxu1 %v334_v3  ;;  %v344_v15 = vld [vmem:[%s448_s1 + $0x8] sm:$0xff]   ;;  %v346_v17 = vld [vmem:[%s448_s1] sm:$0xff]  }
   0x8   :  { %291 = vmatprep.subr.bf16.mxu0 %v335_v4  ;;  %317 = vmatprep.subr.bf16.mxu1 %v335_v4  ;;  %v286_v23 = vld [vmem:[%s450_s2] ss:$0 sm:$0xff] }
   0xb   :  { %292 = vmatpush3.bf16.msra.mxu0 %v336_v5  ;;  %325 = vmatpush3.bf16.msra.mxu1 %v336_v5 }
   0xc   :  { %293 = vmatprep.subr.bf16.mxu0 %v337_v6  ;;  %318 = vmatprep.subr.bf16.mxu1 %v337_v6 }
   0xf   :  { %294 = vmatpush3.bf16.msra.mxu0 %v338_v7  ;;  %326 = vmatpush3.bf16.msra.mxu1 %v338_v7 }
  0x10   :  { %295 = vmatprep.subr.bf16.mxu0 %v339_v8  ;;  %319 = vmatprep.subr.bf16.mxu1 %v339_v8 }
  0x13   :  { %296 = vmatpush3.bf16.msra.mxu0 %v340_v9  ;;  %327 = vmatpush3.bf16.msra.mxu1 %v340_v9 }
  0x14   :  { %297 = vmatprep.subr.bf16.mxu0 %v341_v10  ;;  %320 = vmatprep.subr.bf16.mxu1 %v341_v10 }
  0x17   :  { %298 = vmatpush3.bf16.msra.mxu0 %v342_v13  ;;  %328 = vmatpush3.bf16.msra.mxu1 %v342_v13 }
  0x18   :  { %299 = vmatprep.subr.bf16.mxu0 %v343_v14  ;;  %321 = vmatprep.subr.bf16.mxu1 %v343_v14 }
  0x1b   :  { %300 = vmatpush3.bf16.msra.mxu0 %v344_v15  ;;  %329 = vmatpush3.bf16.msra.mxu1 %v344_v15 }
  0x1c   :  { %301 = vmatprep.subr.bf16.mxu0 %v345_v16  ;;  %322 = vmatprep.subr.bf16.mxu1 %v345_v16 }
  0x1f   :  { %302 = vmatpush3.bf16.msra.mxu0 %v346_v17  ;;  %330 = vmatpush3.bf16.msra.mxu1 %v346_v17 }
  0x22   :  { %212 = vmatmul.mubr.bf16.vlgmr.msra.gmra.mxu0 %v347_v18  ;;  %220 = vmatmul.mubr.bf16.vlgmr.msra.gmra.mxu1 %v350_v19 }
  0xe2   :  { %v303_v20 = vpop.f32.mrf.mxu0  ;;  %v309_v21 = vpop.f32.mrf.mxu1 }
  0xe4   :  { %v304_v22 = vpop.f32.mrf.mxu0  ;;  %v310_v24 = vpop.f32.mrf.mxu1 }
  0xe5   :  { %v305_v25 = vadd.f32 %v304_v22, %v303_v20  ;;  %v311_v26 = vadd.f32 %v310_v24, %v309_v21 }
  0xe6   :  { %v306_v27 = vpop.f32.mrf.mxu0  ;;  %v312_v28 = vpop.f32.mrf.mxu1 }
  0xe7   :  { %v250_v29 = vadd.f32 %v305_v25, %v286_v23  ;;  %v252_v30 = vadd.f32 %v311_v26, %v286_v23 }
  0xe8   :  { %v307_v31 = vpop.f32.mrf.mxu0  ;;  %v313_v32 = vpop.f32.mrf.mxu1 }
  0xe9   :  { %v254_v33 = vmax.f32 %v250_v29, 0.0  ;;  %v256_v34 = vmax.f32 %v252_v30, 0.0  ;;  %v308_v35 = vadd.f32 %v307_v31, %v306_v27  ;;  %v314_v36 = vadd.f32 %v313_v32, %v312_v28 }
  0xeb   :  { %258 = vst [vmem:[%s451_s3] sm:$0xff] %v254_v33  ;;  %260 = vst [vmem:[%s451_s3 + $0x10] sm:$0xff] %v256_v34  ;;  %v251_v37 = vadd.f32 %v308_v35, %v286_v23  ;;  %v253_v38 = vadd.f32 %v314_v36, %v286_v23 }
  0xed   :  { %v255_v39 = vmax.f32 %v251_v37, 0.0  ;;  %v257_v40 = vmax.f32 %v253_v38, 0.0 }
  0xef   :  { %259 = vst [vmem:[%s451_s3 + $0x8] sm:$0xff] %v255_v39  ;;  %261 = vst [vmem:[%s451_s3 + $0x18] sm:$0xff] %v257_v40 }

// kernel: nc_net_forward.12
= control target key start
LH: loop header
LB: loop body
LE: loop exit
PB: predicated region body
PF: predicated region fallthrough
CT: control target
= control target key end

     0   :  { %s751_s15 = smov 0   ;;  %s753_s16 = smov 0   ;;  %s858_s0 = inlined_call_operand.vmem [shape: f32[2,64,32], index: 0, kind: input, shape index: {}]   ;;  %s859_s1 = inlined_call_operand.vmem [shape: f32[2,1,32], index: 1, kind: input, shape index: {}]   ;;  %s860_s2 = inlined_call_operand.vmem [shape: f32[32,32], index: 2, kind: input, shape index: {}]   ;;  %s861_s3 = inlined_call_operand.vmem [shape: f32[1,32], index: 3, kind: input, shape index: {}]   ;;  %s862_s4 = inlined_call_operand.vmem [shape: f32[2,64,32], index: 4, kind: output, shape index: {}]  }
   0x1   :  { %s755_s17 = smov 0  }
   0x2 LB: > { %s26_s18 = sadd.s32 1, %s720_s16  ;;  %p579_p0 = scmp.ge.s32.totalorder %s724_s17, 1  ;;  %s724_s17 = sphi %s755_s17, %s14_s17   ;;  %s720_s16 = sphi %s753_s16, %s864_s16   ;;  %s716_s15 = sphi %s751_s15, %s863_s15  }
   0x3   : > { %p28_p1 = scmp.ge.s32.totalorder %s26_s18, 2  ;;  %p191_p2 = scmp.lt.s32.totalorder %s724_s17, 3 }
   0x5   : > { %s866_s18 = smov (%p28_p1, %s26_s18), 0  ;;  %p192_p3 = pnand %p579_p0, %p191_p2 }
   0x6   : > { %p229_p4 = scmp.lt.s32.totalorder (!%p192_p3), %s716_s15, 1 }
   0x7   : > { %195 = sbr.rel (%p192_p3) target bundleno = 261 (0x105), region = 36 }
   0xc   : > { %v262_v0 = vld [vmem:[%s860_s2 + $0x18] sm:$0xff]  ;;  %v261_v1 = vld [vmem:[%s860_s2 + $0x10] sm:$0xff]  ;;  %v260_v2 = vld [vmem:[%s860_s2 + $0x8] sm:$0xff]  ;;  %s868_s15 = smov (!%p229_p4, %s716_s15), 1  ;;  %vm270_vm0 = vcmask 261120  }
   0xd   : > { %618 = vmatprep.subr.mxu0 %v262_v0  ;;  %638 = vmatprep.subr.mxu1 %v262_v0  ;;  %v259_v3 = vld [vmem:[%s860_s2] sm:$0xff]  ;;  %s604_s27 = sshll.u32 %s868_s15, 6  ;;  %s240_s9 = scalar_lea.vmem %s859_s1, %s868_s15 }
   0xe   : > { %619 = vmatpush3.msra.mxu0 %v262_v0  ;;  %642 = vmatpush3.msra.mxu1 %v262_v0  ;;  %s236_s30 = scalar_lea.vmem %s858_s0, %s604_s27  ;;  %v584_v12 = vld [vmem:[%s861_s3] ss:$0 sm:$0xff]  ;;  %s249_s12 = scalar_lea.vmem %s862_s4, %s604_s27 }
   0xf   : > { %620 = vmatprep.subr.mxu0 %v261_v1  ;;  %639 = vmatprep.subr.mxu1 %v261_v1  ;;  %v789_v4 = vld [vmem:[%s236_s30] sm:$0xff]  ;;  %v793_v6 = vld [vmem:[%s236_s30 + $0x8] sm:$0xff]  ;;  %v797_v8 = vld [vmem:[%s236_s30 + $0x10] sm:$0xff] }
  0x10   : > { %621 = vmatpush3.msra.mxu0 %v261_v1  ;;  %643 = vmatpush3.msra.mxu1 %v261_v1  ;;  %v791_v5 = vld [vmem:[%s236_s30 + $0x20] sm:$0xff]  ;;  %v795_v7 = vld [vmem:[%s236_s30 + $0x28] sm:$0xff]  ;;  %v799_v9 = vld [vmem:[%s236_s30 + $0x30] sm:$0xff] }
  0x11   : > { %622 = vmatprep.subr.mxu0 %v260_v2  ;;  %640 = vmatprep.subr.mxu1 %v260_v2  ;;  %v813_v10 = vld [vmem:[%s236_s30 + $0x18] sm:$0xff]  ;;  %v601_v53 = vld [vmem:[%s240_s9] ss:$0 sm:$0xff] }
  0x12   : > { %623 = vmatpush3.msra.mxu0 %v260_v2  ;;  %644 = vmatpush3.msra.mxu1 %v260_v2  ;;  %v815_v11 = vld [vmem:[%s236_s30 + $0x38] sm:$0xff] }
  0x13   : > { %624 = vmatprep.subr.mxu0 %v259_v3  ;;  %641 = vmatprep.subr.mxu1 %v259_v3 }
  0x14   : > { %625 = vmatpush3.msra.mxu0 %v259_v3  ;;  %645 = vmatpush3.msra.mxu1 %v259_v3 }
  0x15   : > { %626 = vmatprep.mubr.msk.f32.mxu0 %vm270_vm0, %v789_v4  ;;  %632 = vmatprep.mubr.msk.f32.mxu1 %vm270_vm0, %v791_v5 }
  0x16   : > { %627 = vmatmul.mubr.msk.f32.vlgmr.msra.gmra.mxu0 %vm270_vm0, %v793_v6  ;;  %633 = vmatmul.mubr.msk.f32.vlgmr.msra.gmra.mxu1 %vm270_vm0, %v795_v7 }
  0x17   : > { %629 = vmatprep.mubr.msk.f32.mxu0 %vm270_vm0, %v797_v8  ;;  %635 = vmatprep.mubr.msk.f32.mxu1 %vm270_vm0, %v799_v9 }
  0x1a   : > { %630 = vmatmul.mubr.msk.f32.gmra.mxu0 %vm270_vm0, %v813_v10  ;;  %636 = vmatmul.mubr.msk.f32.gmra.mxu1 %vm270_vm0, %v815_v11 }
  0xd6   : > { %v628_v13 = vpop.f32.mrf.mxu0  ;;  %v634_v14 = vpop.f32.mrf.mxu1 }
  0xd7   : > { %v367_v15 = vadd.f32 %v628_v13, %v584_v12  ;;  %v387_v16 = vadd.f32 %v634_v14, %v584_v12 }
  0xd8   : > { %v361_v17 = vpop.f32.mrf.mxu0  ;;  %v381_v18 = vpop.f32.mrf.mxu1 }
  0xd9   : > { %v594_v19 = vmul.f32 -1.442695, %v367_v15  ;;  %v598_v20 = vmul.f32 -1.442695, %v387_v16  ;;  %v362_v21 = vadd.f32 %v584_v12, %v361_v17  ;;  %v382_v22 = vadd.f32 %v584_v12, %v381_v18 }
  0xda   : > { %v631_v23 = vpop.f32.mrf.mxu0  ;;  %v637_v24 = vpop.f32.mrf.mxu1 }
  0xdb   : > { %670 = vpow2.f32 %v594_v19  ;;  %v593_v25 = vmul.f32 -1.442695, %v362_v21  ;;  %v597_v26 = vmul.f32 -1.442695, %v382_v22  ;;  %v377_v27 = vadd.f32 %v631_v23, %v584_v12 }
  0xdc   : > { %672 = vpow2.f32 %v598_v20  ;;  %v397_v28 = vadd.f32 %v637_v24, %v584_v12  ;;  %v371_v29 = vpop.f32.mrf.mxu0  ;;  %v391_v30 = vpop.f32.mrf.mxu1 }
  0xdd   : > { %674 = vpow2.f32 %v593_v25  ;;  %v596_v31 = vmul.f32 -1.442695, %v377_v27  ;;  %v372_v32 = vadd.f32 %v584_v12, %v371_v29  ;;  %v392_v33 = vadd.f32 %v584_v12, %v391_v30 }
  0xde   : > { %676 = vpow2.f32 %v597_v26  ;;  %v600_v34 = vmul.f32 -1.442695, %v397_v28 }
  0xdf   : > { %678 = vpow2.f32 %v596_v31  ;;  %v595_v35 = vmul.f32 -1.442695, %v372_v32  ;;  %v599_v36 = vmul.f32 -1.442695, %v392_v33 }
  0xe0   : > { %680 = vpow2.f32 %v600_v34 }
  0xe1   : > { %682 = vpow2.f32 %v595_v35 }
  0xe2   : > { %684 = vpow2.f32 %v599_v36 }
  0xe8   : > { %v671_v37 = vpop.eup %670 }
  0xe9   : > { %v673_v38 = vpop.eup %672  ;;  %v425_v39 = vadd.f32 1.0, %v671_v37 }
  0xea   : > { %v675_v40 = vpop.eup %674  ;;  %v429_v41 = vadd.f32 1.0, %v673_v38 }
  0xeb   : > { %v677_v42 = vpop.eup %676  ;;  %686 = vrcp.f32 %v425_v39  ;;  %v424_v43 = vadd.f32 1.0, %v675_v40 }
  0xec   : > { %v679_v44 = vpop.eup %678  ;;  %688 = vrcp.f32 %v429_v41  ;;  %v428_v45 = vadd.f32 1.0, %v677_v42 }
  0xed   : > { %v681_v46 = vpop.eup %680  ;;  %690 = vrcp.f32 %v424_v43  ;;  %v427_v47 = vadd.f32 1.0, %v679_v44 }
  0xee   : > { %v683_v48 = vpop.eup %682  ;;  %692 = vrcp.f32 %v428_v45  ;;  %v431_v49 = vadd.f32 1.0, %v681_v46 }
  0xef   : > { %v685_v50 = vpop.eup %684  ;;  %694 = vrcp.f32 %v427_v47  ;;  %v426_v51 = vadd.f32 1.0, %v683_v48 }
  0xf0   : > { %696 = vrcp.f32 %v431_v49  ;;  %v430_v52 = vadd.f32 1.0, %v685_v50 }
  0xf1   : > { %698 = vrcp.f32 %v426_v51 }
  0xf2   : > { %700 = vrcp.f32 %v430_v52 }
  0xf8   : > { %v687_v54 = vpop.eup %686 }
  0xf9   : > { %v689_v55 = vpop.eup %688  ;;  %v456_v56 = vadd.f32 %v687_v54, %v601_v53 }
  0xfa   : > { %v691_v57 = vpop.eup %690  ;;  %v460_v58 = vadd.f32 %v689_v55, %v601_v53 }
  0xfb   : > { %v693_v59 = vpop.eup %692  ;;  %v464_v60 = vmul.f32 %v456_v56, %v793_v6  ;;  %v455_v61 = vadd.f32 %v691_v57, %v601_v53 }
  0xfc   : > { %v695_v62 = vpop.eup %694  ;;  %v468_v63 = vmul.f32 %v460_v58, %v795_v7  ;;  %v459_v0 = vadd.f32 %v693_v59, %v601_v53 }
  0xfd   : > { %v697_v1 = vpop.eup %696  ;;  %472 = vst.msk [vmem:[%s249_s12 + $0x8] sm:$0xff] %vm270_vm0, %v464_v60  ;;  %v463_v2 = vmul.f32 %v455_v61, %v789_v4  ;;  %v458_v3 = vadd.f32 %v695_v62, %v601_v53 }
  0xfe   : > { %v699_v12 = vpop.eup %698  ;;  %476 = vst.msk [vmem:[%s249_s12 + $0x28] sm:$0xff] %vm270_vm0, %v468_v63  ;;  %v467_v13 = vmul.f32 %v459_v0, %v791_v5  ;;  %v462_v14 = vadd.f32 %v697_v1, %v601_v53 }
  0xff   : > { %v701_v15 = vpop.eup %700  ;;  %471 = vst.msk [vmem:[%s249_s12] sm:$0xff] %vm270_vm0, %v463_v2  ;;  %v466_v6 = vmul.f32 %v458_v3, %v813_v10  ;;  %v457_v16 = vadd.f32 %v699_v12, %v601_v53 }
 0x100   : > { %475 = vst.msk [vmem:[%s249_s12 + $0x20] sm:$0xff] %vm270_vm0, %v467_v13  ;;  %v470_v7 = vmul.f32 %v462_v14, %v815_v11  ;;  %v461_v17 = vadd.f32 %v701_v15, %v601_v53 }
 0x101   : > { %474 = vst.msk [vmem:[%s249_s12 + $0x18] sm:$0xff] %vm270_vm0, %v466_v6  ;;  %v465_v4 = vmul.f32 %v457_v16, %v797_v8 }
 0x102   : > { %478 = vst.msk [vmem:[%s249_s12 + $0x38] sm:$0xff] %vm270_vm0, %v470_v7  ;;  %v469_v5 = vmul.f32 %v461_v17, %v799_v9 }
 0x103   : > { %473 = vst.msk [vmem:[%s249_s12 + $0x10] sm:$0xff] %vm270_vm0, %v465_v4 }
 0x104   : > { %477 = vst.msk [vmem:[%s249_s12 + $0x30] sm:$0xff] %vm270_vm0, %v469_v5 }
 0x105 PF: > { %s14_s17 = sadd.s32 1, %s724_s17   ;;  %s863_s15 = smov %s720_s16 }
 0x106   : > { %p11_p5 = scmp.ge.s32.totalorder %s14_s17, 4   ;;  %s864_s16 = smov %s866_s18 }
 0x108   :  { %13 = sbr.rel (!%p11_p5) target bundleno = 2 (0x2), region = 69 }

// kernel: nc_net_forward.11
= control target key start
LH: loop header
LB: loop body
LE: loop exit
PB: predicated region body
PF: predicated region fallthrough
CT: control target
= control target key end

     0   :  { %s1357_s1 = inlined_call_operand.vmem [shape: bf16[512,128], index: 1, kind: input, shape index: {}]   ;;  %s1358_s0 = inlined_call_operand.vmem [shape: bf16[128,512], index: 0, kind: input, shape index: {}]   ;;  %s1359_s2 = inlined_call_operand.vmem [shape: f32[1,128], index: 2, kind: input, shape index: {}]   ;;  %s1360_s3 = inlined_call_operand.vmem [shape: f32[128,128], index: 3, kind: output, shape index: {}]  }
   0x1   :  { %v996_v0 = vld [vmem:[%s1357_s1 + $0x78] sm:$0xff]   ;;  %v1000_v4 = vld [vmem:[%s1357_s1 + $0x70] sm:$0xff]   ;;  %v1004_v8 = vld [vmem:[%s1357_s1 + $0x68] sm:$0xff]  }
   0x2   :  { %v997_v1 = vld [vmem:[%s1357_s1 + $0xf8] sm:$0xff]   ;;  %868 = vmatprep.subr.bf16.mxu0 %v996_v0  ;;  %v1001_v5 = vld [vmem:[%s1357_s1 + $0xf0] sm:$0xff]   ;;  %v1005_v9 = vld [vmem:[%s1357_s1 + $0xe8] sm:$0xff]  }
   0x3   :  { %v998_v2 = vld [vmem:[%s1357_s1 + $0x38] sm:$0xff]   ;;  %932 = vmatprep.subr.bf16.mxu1 %v997_v1  ;;  %v1002_v6 = vld [vmem:[%s1357_s1 + $0x30] sm:$0xff]   ;;  %v1006_v10 = vld [vmem:[%s1357_s1 + $0x28] sm:$0xff]  }
   0x4   :  { %v999_v3 = vld [vmem:[%s1357_s1 + $0xb8] sm:$0xff]   ;;  %869 = vmatpush3.bf16.msra.mxu0 %v998_v2  ;;  %v1003_v7 = vld [vmem:[%s1357_s1 + $0xb0] sm:$0xff]   ;;  %v1007_v11 = vld [vmem:[%s1357_s1 + $0xa8] sm:$0xff]  }
   0x5   :  { %933 = vmatpush3.bf16.msra.mxu1 %v999_v3  ;;  %870 = vmatprep.subr.bf16.mxu0 %v1000_v4  ;;  %v1008_v12 = vld [vmem:[%s1357_s1 + $0x60] sm:$0xff]   ;;  %v1012_v16 = vld [vmem:[%s1357_s1 + $0x58] sm:$0xff]   ;;  %v1016_v20 = vld [vmem:[%s1357_s1 + $0x50] sm:$0xff]  }
   0x6   :  { %934 = vmatprep.subr.bf16.mxu1 %v1001_v5  ;;  %v1009_v13 = vld [vmem:[%s1357_s1 + $0xe0] sm:$0xff]   ;;  %v1013_v17 = vld [vmem:[%s1357_s1 + $0xd8] sm:$0xff]   ;;  %v1017_v21 = vld [vmem:[%s1357_s1 + $0xd0] sm:$0xff]  }
   0x7   :  { %v1010_v14 = vld [vmem:[%s1357_s1 + $0x20] sm:$0xff]   ;;  %v1014_v18 = vld [vmem:[%s1357_s1 + $0x18] sm:$0xff]   ;;  %v1018_v22 = vld [vmem:[%s1357_s1 + $0x10] sm:$0xff]  }
   0x8   :  { %871 = vmatpush3.bf16.msra.mxu0 %v1002_v6  ;;  %v1011_v15 = vld [vmem:[%s1357_s1 + $0xa0] sm:$0xff]   ;;  %v1015_v19 = vld [vmem:[%s1357_s1 + $0x98] sm:$0xff]   ;;  %v1019_v23 = vld [vmem:[%s1357_s1 + $0x90] sm:$0xff]  }
   0x9   :  { %935 = vmatpush3.bf16.msra.mxu1 %v1003_v7  ;;  %872 = vmatprep.subr.bf16.mxu0 %v1004_v8  ;;  %v1020_v24 = vld [vmem:[%s1357_s1 + $0x48] sm:$0xff]   ;;  %v1024_v28 = vld [vmem:[%s1357_s1 + $0x40] sm:$0xff]  }
   0xa   :  { %936 = vmatprep.subr.bf16.mxu1 %v1005_v9  ;;  %v1021_v25 = vld [vmem:[%s1357_s1 + $0xc8] sm:$0xff]   ;;  %v1025_v29 = vld [vmem:[%s1357_s1 + $0xc0] sm:$0xff]  }
   0xb   :  { %v1022_v26 = vld [vmem:[%s1357_s1 + $0x8] sm:$0xff]   ;;  %v1026_v30 = vld [vmem:[%s1357_s1] sm:$0xff]  }
   0xc   :  { %873 = vmatpush3.bf16.msra.mxu0 %v1006_v10  ;;  %v1023_v27 = vld [vmem:[%s1357_s1 + $0x88] sm:$0xff]   ;;  %v1027_v31 = vld [vmem:[%s1357_s1 + $0x80] sm:$0xff]  }
   0xd   :  { %937 = vmatpush3.bf16.msra.mxu1 %v1007_v11  ;;  %874 = vmatprep.subr.bf16.mxu0 %v1008_v12  ;;  %v1028_v32 = vld [vmem:[%s1358_s0] ss:$16 sps:$4 sm:$0xff]   ;;  %v1030_v33 = vld [vmem:[%s1358_s0 + $0x4] ss:$16 sps:$4 sm:$0xff]   ;;  %v1031_v34 = vld [vmem:[%s1358_s0 + $0x8] ss:$16 sps:$4 sm:$0xff]  }
   0xe   :  { %938 = vmatprep.subr.bf16.mxu1 %v1009_v13  ;;  %v1033_v35 = vld [vmem:[%s1358_s0 + $0xc] ss:$16 sps:$4 sm:$0xff]   ;;  %531 = vmatprep.mubr.bf16.mxu0 %v1030_v33  ;;  %v1034_v36 = vld [vmem:[%s1358_s0 + $0x24] ss:$16 sps:$4 sm:$0xff]   ;;  %v1038_v38 = vld [vmem:[%s1358_s0 + $0x20] ss:$16 sps:$4 sm:$0xff]  }
   0xf   :  { %628 = vmatprep.mubr.bf16.mxu1 %v1033_v35  ;;  %v1036_v37 = vld [vmem:[%s1358_s0 + $0x2c] ss:$16 sps:$4 sm:$0xff]   ;;  %v1039_v39 = vld [vmem:[%s1358_s0 + $0x28] ss:$16 sps:$4 sm:$0xff]   ;;  %v1040_v40 = vld [vmem:[%s1358_s0 + $0x44] ss:$16 sps:$4 sm:$0xff]  }
  0x10   :  { %875 = vmatpush3.bf16.msra.mxu0 %v1010_v14  ;;  %v1042_v41 = vld [vmem:[%s1358_s0 + $0x4c] ss:$16 sps:$4 sm:$0xff]   ;;  %v1044_v42 = vld [vmem:[%s1358_s0 + $0x40] ss:$16 sps:$4 sm:$0xff]   ;;  %v1045_v43 = vld [vmem:[%s1358_s0 + $0x48] ss:$16 sps:$4 sm:$0xff]  }
  0x11   :  { %939 = vmatpush3.bf16.msra.mxu1 %v1011_v15  ;;  %876 = vmatprep.subr.bf16.mxu0 %v1012_v16  ;;  %v1046_v44 = vld [vmem:[%s1358_s0 + $0x64] ss:$16 sps:$4 sm:$0xff]   ;;  %v1048_v45 = vld [vmem:[%s1358_s0 + $0x6c] ss:$16 sps:$4 sm:$0xff]   ;;  %v1050_v46 = vld [vmem:[%s1358_s0 + $0x60] ss:$16 sps:$4 sm:$0xff]  }
  0x12   :  { %940 = vmatprep.subr.bf16.mxu1 %v1013_v17  ;;  %v1051_v47 = vld [vmem:[%s1358_s0 + $0x68] ss:$16 sps:$4 sm:$0xff]   ;;  %v1052_v48 = vld [vmem:[%s1358_s0 + $0x84] ss:$16 sps:$4 sm:$0xff]   ;;  %v1054_v49 = vld [vmem:[%s1358_s0 + $0x8c] ss:$16 sps:$4 sm:$0xff]  }
  0x13   :  { %v1056_v50 = vld [vmem:[%s1358_s0 + $0x80] ss:$16 sps:$4 sm:$0xff]   ;;  %v1057_v51 = vld [vmem:[%s1358_s0 + $0x88] ss:$16 sps:$4 sm:$0xff]   ;;  %v1058_v52 = vld [vmem:[%s1358_s0 + $0xa4] ss:$16 sps:$4 sm:$0xff]  }
  0x14   :  { %877 = vmatpush3.bf16.msra.mxu0 %v1014_v18  ;;  %v1060_v53 = vld [vmem:[%s1358_s0 + $0xac] ss:$16 sps:$4 sm:$0xff]   ;;  %v1062_v54 = vld [vmem:[%s1358_s0 + $0xa0] ss:$16 sps:$4 sm:$0xff]   ;;  %v1063_v55 = vld [vmem:[%s1358_s0 + $0xa8] ss:$16 sps:$4 sm:$0xff]  }
  0x15   :  { %941 = vmatpush3.bf16.msra.mxu1 %v1015_v19  ;;  %878 = vmatprep.subr.bf16.mxu0 %v1016_v20  ;;  %v1064_v56 = vld [vmem:[%s1358_s0 + $0xc4] ss:$16 sps:$4 sm:$0xff]   ;;  %v1066_v57 = vld [vmem:[%s1358_s0 + $0xcc] ss:$16 sps:$4 sm:$0xff]   ;;  %v1068_v58 = vld [vmem:[%s1358_s0 + $0xc0] ss:$16 sps:$4 sm:$0xff]  }
  0x16   :  { %942 = vmatprep.subr.bf16.mxu1 %v1017_v21  ;;  %v1069_v59 = vld [vmem:[%s1358_s0 + $0xc8] ss:$16 sps:$4 sm:$0xff]   ;;  %v1070_v60 = vld [vmem:[%s1358_s0 + $0xe4] ss:$16 sps:$4 sm:$0xff]   ;;  %v1072_v61 = vld [vmem:[%s1358_s0 + $0xec] ss:$16 sps:$4 sm:$0xff]  }
  0x17   :  { %v1074_v62 = vld [vmem:[%s1358_s0 + $0xe0] ss:$16 sps:$4 sm:$0xff]   ;;  %v1075_v63 = vld [vmem:[%s1358_s0 + $0xe8] ss:$16 sps:$4 sm:$0xff]  }
  0x18   :  { %879 = vmatpush3.bf16.msra.mxu0 %v1018_v22  ;;  %v1291_v7 = vld [vmem:[%s1359_s2] ss:$0 sm:$0xff] }
  0x19   :  { %943 = vmatpush3.bf16.msra.mxu1 %v1019_v23  ;;  %880 = vmatprep.subr.bf16.mxu0 %v1020_v24 }
  0x1a   :  { %944 = vmatprep.subr.bf16.mxu1 %v1021_v25 }
  0x1c   :  { %881 = vmatpush3.bf16.msra.mxu0 %v1022_v26 }
  0x1d   :  { %945 = vmatpush3.bf16.msra.mxu1 %v1023_v27  ;;  %882 = vmatprep.subr.bf16.mxu0 %v1024_v28 }
  0x1e   :  { %946 = vmatprep.subr.bf16.mxu1 %v1025_v29 }
  0x20   :  { %883 = vmatpush3.bf16.msra.mxu0 %v1026_v30 }
  0x21   :  { %947 = vmatpush3.bf16.msra.mxu1 %v1027_v31 }
  0x23   :  { %532 = vmatmul.mubr.bf16.vlgmr.msra.gmra.mxu0 %v1028_v32 }
  0x24   :  { %629 = vmatmul.mubr.bf16.vlgmr.msra.gmra.mxu1 %v1031_v34  ;;  %539 = vmatprep.mubr.bf16.mxu0 %v1034_v36 }
  0x25   :  { %636 = vmatprep.mubr.bf16.mxu1 %v1036_v37 }
  0x2b   :  { %540 = vmatmul.mubr.bf16.gmra.mxu0 %v1038_v38 }
  0x2c   :  { %637 = vmatmul.mubr.bf16.gmra.mxu1 %v1039_v39  ;;  %547 = vmatprep.mubr.bf16.mxu0 %v1040_v40 }
  0x2d   :  { %644 = vmatprep.mubr.bf16.mxu1 %v1042_v41 }
  0x33   :  { %548 = vmatmul.mubr.bf16.gmra.mxu0 %v1044_v42 }
  0x34   :  { %645 = vmatmul.mubr.bf16.gmra.mxu1 %v1045_v43  ;;  %555 = vmatprep.mubr.bf16.mxu0 %v1046_v44 }
  0x35   :  { %652 = vmatprep.mubr.bf16.mxu1 %v1048_v45 }
  0x3b   :  { %556 = vmatmul.mubr.bf16.gmra.mxu0 %v1050_v46 }
  0x3c   :  { %653 = vmatmul.mubr.bf16.gmra.mxu1 %v1051_v47  ;;  %563 = vmatprep.mubr.bf16.mxu0 %v1052_v48 }
  0x3d   :  { %660 = vmatprep.mubr.bf16.mxu1 %v1054_v49 }
  0x43   :  { %564 = vmatmul.mubr.bf16.gmra.mxu0 %v1056_v50 }
  0x44   :  { %661 = vmatmul.mubr.bf16.gmra.mxu1 %v1057_v51  ;;  %571 = vmatprep.mubr.bf16.mxu0 %v1058_v52 }
  0x45   :  { %668 = vmatprep.mubr.bf16.mxu1 %v1060_v53 }
  0x4b   :  { %572 = vmatmul.mubr.bf16.gmra.mxu0 %v1062_v54 }
  0x4c   :  { %669 = vmatmul.mubr.bf16.gmra.mxu1 %v1063_v55  ;;  %579 = vmatprep.mubr.bf16.mxu0 %v1064_v56 }
  0x4d   :  { %676 = vmatprep.mubr.bf16.mxu1 %v1066_v57 }
  0x53   :  { %580 = vmatmul.mubr.bf16.gmra.mxu0 %v1068_v58 }
  0x54   :  { %677 = vmatmul.mubr.bf16.gmra.mxu1 %v1069_v59  ;;  %587 = vmatprep.mubr.bf16.mxu0 %v1070_v60 }
  0x55   :  { %684 = vmatprep.mubr.bf16.mxu1 %v1072_v61 }
  0x5b   :  { %588 = vmatmul.mubr.bf16.gmra.mxu0 %v1074_v62 }
  0x5c   :  { %685 = vmatmul.mubr.bf16.gmra.mxu1 %v1075_v63 }
  0xe3   :  { %v884_v0 = vpop.f32.mrf.mxu0 }
  0xe4   :  { %v948_v1 = vpop.f32.mrf.mxu1 }
  0xe5   :  { %v885_v2 = vpop.f32.mrf.mxu0 }
  0xe6   :  { %v886_v3 = vadd.f32 %v885_v2, %v884_v0  ;;  %v949_v4 = vpop.f32.mrf.mxu1 }
  0xe7   :  { %v950_v5 = vadd.f32 %v949_v4, %v948_v1  ;;  %v887_v6 = vpop.f32.mrf.mxu0 }
  0xe8   :  { %v951_v8 = vpop.f32.mrf.mxu1 }
  0xe9   :  { %v631_v9 = vadd.f32 %v950_v5, %v886_v3  ;;  %v888_v10 = vpop.f32.mrf.mxu0 }
  0xea   :  { %v889_v11 = vadd.f32 %v888_v10, %v887_v6  ;;  %v952_v12 = vpop.f32.mrf.mxu1 }
  0xeb   :  { %v751_v13 = vadd.f32 %v1291_v7, %v631_v9  ;;  %v953_v14 = vadd.f32 %v952_v12, %v951_v8  ;;  %v890_v15 = vpop.f32.mrf.mxu0 }
  0xec   :  { %v954_v16 = vpop.f32.mrf.mxu1 }
  0xed   :  { %v767_v17 = vmax.f32 %v751_v13, 0.0  ;;  %v634_v18 = vadd.f32 %v953_v14, %v889_v11  ;;  %v891_v19 = vpop.f32.mrf.mxu0 }
  0xee   :  { %v892_v20 = vadd.f32 %v891_v19, %v890_v15  ;;  %v955_v21 = vpop.f32.mrf.mxu1 }
  0xef   :  { %783 = vst [vmem:[%s1360_s3] sm:$0xff] %v767_v17  ;;  %v752_v22 = vadd.f32 %v1291_v7, %v634_v18  ;;  %v956_v23 = vadd.f32 %v955_v21, %v954_v16  ;;  %v893_v24 = vpop.f32.mrf.mxu0 }
  0xf0   :  { %v957_v25 = vpop.f32.mrf.mxu1 }
  0xf1   :  { %v768_v26 = vmax.f32 %v752_v22, 0.0  ;;  %v639_v27 = vadd.f32 %v956_v23, %v892_v20  ;;  %v894_v28 = vpop.f32.mrf.mxu0 }
  0xf2   :  { %v895_v29 = vadd.f32 %v894_v28, %v893_v24  ;;  %v958_v30 = vpop.f32.mrf.mxu1 }
  0xf3   :  { %784 = vst [vmem:[%s1360_s3 + $0x8] sm:$0xff] %v768_v26  ;;  %v753_v31 = vadd.f32 %v1291_v7, %v639_v27  ;;  %v959_v32 = vadd.f32 %v958_v30, %v957_v25  ;;  %v896_v33 = vpop.f32.mrf.mxu0 }
  0xf4   :  { %v960_v34 = vpop.f32.mrf.mxu1 }
  0xf5   :  { %v769_v35 = vmax.f32 %v753_v31, 0.0  ;;  %v642_v36 = vadd.f32 %v959_v32, %v895_v29  ;;  %v897_v37 = vpop.f32.mrf.mxu0 }
  0xf6   :  { %v898_v38 = vadd.f32 %v897_v37, %v896_v33  ;;  %v961_v39 = vpop.f32.mrf.mxu1 }
  0xf7   :  { %785 = vst [vmem:[%s1360_s3 + $0x10] sm:$0xff] %v769_v35  ;;  %v754_v40 = vadd.f32 %v1291_v7, %v642_v36  ;;  %v962_v41 = vadd.f32 %v961_v39, %v960_v34  ;;  %v899_v42 = vpop.f32.mrf.mxu0 }
  0xf8   :  { %v963_v43 = vpop.f32.mrf.mxu1 }
  0xf9   :  { %v770_v44 = vmax.f32 %v754_v40, 0.0  ;;  %v647_v45 = vadd.f32 %v962_v41, %v898_v38  ;;  %v900_v46 = vpop.f32.mrf.mxu0 }
  0xfa   :  { %v901_v47 = vadd.f32 %v900_v46, %v899_v42  ;;  %v964_v48 = vpop.f32.mrf.mxu1 }
  0xfb   :  { %786 = vst [vmem:[%s1360_s3 + $0x18] sm:$0xff] %v770_v44  ;;  %v755_v49 = vadd.f32 %v1291_v7, %v647_v45  ;;  %v965_v50 = vadd.f32 %v964_v48, %v963_v43  ;;  %v902_v51 = vpop.f32.mrf.mxu0 }
  0xfc   :  { %v966_v52 = vpop.f32.mrf.mxu1 }
  0xfd   :  { %v771_v53 = vmax.f32 %v755_v49, 0.0  ;;  %v650_v54 = vadd.f32 %v965_v50, %v901_v47  ;;  %v903_v55 = vpop.f32.mrf.mxu0 }
  0xfe   :  { %v904_v56 = vadd.f32 %v903_v55, %v902_v51  ;;  %v967_v57 = vpop.f32.mrf.mxu1 }
  0xff   :  { %787 = vst [vmem:[%s1360_s3 + $0x20] sm:$0xff] %v771_v53  ;;  %v756_v58 = vadd.f32 %v1291_v7, %v650_v54  ;;  %v968_v59 = vadd.f32 %v967_v57, %v966_v52  ;;  %v905_v60 = vpop.f32.mrf.mxu0 }
 0x100   :  { %v969_v61 = vpop.f32.mrf.mxu1 }
 0x101   :  { %v772_v62 = vmax.f32 %v756_v58, 0.0  ;;  %v655_v63 = vadd.f32 %v968_v59, %v904_v56  ;;  %v906_v0 = vpop.f32.mrf.mxu0 }
 0x102   :  { %v907_v1 = vadd.f32 %v906_v0, %v905_v60  ;;  %v970_v2 = vpop.f32.mrf.mxu1 }
 0x103   :  { %788 = vst [vmem:[%s1360_s3 + $0x28] sm:$0xff] %v772_v62  ;;  %v757_v3 = vadd.f32 %v1291_v7, %v655_v63  ;;  %v971_v4 = vadd.f32 %v970_v2, %v969_v61  ;;  %v908_v5 = vpop.f32.mrf.mxu0 }
 0x104   :  { %v972_v6 = vpop.f32.mrf.mxu1 }
 0x105   :  { %v773_v8 = vmax.f32 %v757_v3, 0.0  ;;  %v658_v9 = vadd.f32 %v971_v4, %v907_v1  ;;  %v909_v10 = vpop.f32.mrf.mxu0 }
 0x106   :  { %v910_v11 = vadd.f32 %v909_v10, %v908_v5  ;;  %v973_v12 = vpop.f32.mrf.mxu1 }
 0x107   :  { %789 = vst [vmem:[%s1360_s3 + $0x30] sm:$0xff] %v773_v8  ;;  %v758_v13 = vadd.f32 %v1291_v7, %v658_v9  ;;  %v974_v14 = vadd.f32 %v973_v12, %v972_v6  ;;  %v911_v15 = vpop.f32.mrf.mxu0 }
 0x108   :  { %v975_v16 = vpop.f32.mrf.mxu1 }
 0x109   :  { %v774_v17 = vmax.f32 %v758_v13, 0.0  ;;  %v663_v18 = vadd.f32 %v974_v14, %v910_v11  ;;  %v912_v19 = vpop.f32.mrf.mxu0 }
 0x10a   :  { %v913_v20 = vadd.f32 %v912_v19, %v911_v15  ;;  %v976_v21 = vpop.f32.mrf.mxu1 }
 0x10b   :  { %790 = vst [vmem:[%s1360_s3 + $0x38] sm:$0xff] %v774_v17  ;;  %v759_v22 = vadd.f32 %v1291_v7, %v663_v18  ;;  %v977_v23 = vadd.f32 %v976_v21, %v975_v16  ;;  %v914_v24 = vpop.f32.mrf.mxu0 }
 0x10c   :  { %v978_v25 = vpop.f32.mrf.mxu1 }
 0x10d   :  { %v775_v26 = vmax.f32 %v759_v22, 0.0  ;;  %v666_v27 = vadd.f32 %v977_v23, %v913_v20  ;;  %v915_v28 = vpop.f32.mrf.mxu0 }
 0x10e   :  { %v916_v29 = vadd.f32 %v915_v28, %v914_v24  ;;  %v979_v30 = vpop.f32.mrf.mxu1 }
 0x10f   :  { %791 = vst [vmem:[%s1360_s3 + $0x40] sm:$0xff] %v775_v26  ;;  %v760_v31 = vadd.f32 %v1291_v7, %v666_v27  ;;  %v980_v32 = vadd.f32 %v979_v30, %v978_v25  ;;  %v917_v33 = vpop.f32.mrf.mxu0 }
 0x110   :  { %v981_v34 = vpop.f32.mrf.mxu1 }
 0x111   :  { %v776_v35 = vmax.f32 %v760_v31, 0.0  ;;  %v671_v36 = vadd.f32 %v980_v32, %v916_v29  ;;  %v918_v37 = vpop.f32.mrf.mxu0 }
 0x112   :  { %v919_v38 = vadd.f32 %v918_v37, %v917_v33  ;;  %v982_v39 = vpop.f32.mrf.mxu1 }
 0x113   :  { %792 = vst [vmem:[%s1360_s3 + $0x48] sm:$0xff] %v776_v35  ;;  %v761_v40 = vadd.f32 %v1291_v7, %v671_v36  ;;  %v983_v41 = vadd.f32 %v982_v39, %v981_v34  ;;  %v920_v42 = vpop.f32.mrf.mxu0 }
 0x114   :  { %v984_v43 = vpop.f32.mrf.mxu1 }
 0x115   :  { %v777_v44 = vmax.f32 %v761_v40, 0.0  ;;  %v674_v45 = vadd.f32 %v983_v41, %v919_v38  ;;  %v921_v46 = vpop.f32.mrf.mxu0 }
 0x116   :  { %v922_v47 = vadd.f32 %v921_v46, %v920_v42  ;;  %v985_v48 = vpop.f32.mrf.mxu1 }
 0x117   :  { %793 = vst [vmem:[%s1360_s3 + $0x50] sm:$0xff] %v777_v44  ;;  %v762_v49 = vadd.f32 %v1291_v7, %v674_v45  ;;  %v986_v50 = vadd.f32 %v985_v48, %v984_v43  ;;  %v923_v51 = vpop.f32.mrf.mxu0 }
 0x118   :  { %v987_v52 = vpop.f32.mrf.mxu1 }
 0x119   :  { %v778_v53 = vmax.f32 %v762_v49, 0.0  ;;  %v679_v54 = vadd.f32 %v986_v50, %v922_v47  ;;  %v924_v55 = vpop.f32.mrf.mxu0 }
 0x11a   :  { %v925_v56 = vadd.f32 %v924_v55, %v923_v51  ;;  %v988_v57 = vpop.f32.mrf.mxu1 }
 0x11b   :  { %794 = vst [vmem:[%s1360_s3 + $0x58] sm:$0xff] %v778_v53  ;;  %v763_v58 = vadd.f32 %v1291_v7, %v679_v54  ;;  %v989_v59 = vadd.f32 %v988_v57, %v987_v52  ;;  %v926_v60 = vpop.f32.mrf.mxu0 }
 0x11c   :  { %v990_v61 = vpop.f32.mrf.mxu1 }
 0x11d   :  { %v779_v62 = vmax.f32 %v763_v58, 0.0  ;;  %v682_v63 = vadd.f32 %v989_v59, %v925_v56  ;;  %v927_v0 = vpop.f32.mrf.mxu0 }
 0x11e   :  { %v928_v1 = vadd.f32 %v927_v0, %v926_v60  ;;  %v991_v2 = vpop.f32.mrf.mxu1 }
 0x11f   :  { %795 = vst [vmem:[%s1360_s3 + $0x60] sm:$0xff] %v779_v62  ;;  %v764_v3 = vadd.f32 %v1291_v7, %v682_v63  ;;  %v992_v4 = vadd.f32 %v991_v2, %v990_v61  ;;  %v929_v5 = vpop.f32.mrf.mxu0 }
 0x120   :  { %v993_v6 = vpop.f32.mrf.mxu1 }
 0x121   :  { %v780_v8 = vmax.f32 %v764_v3, 0.0  ;;  %v687_v9 = vadd.f32 %v992_v4, %v928_v1  ;;  %v930_v10 = vpop.f32.mrf.mxu0 }
 0x122   :  { %v931_v11 = vadd.f32 %v930_v10, %v929_v5  ;;  %v994_v12 = vpop.f32.mrf.mxu1 }
 0x123   :  { %796 = vst [vmem:[%s1360_s3 + $0x68] sm:$0xff] %v780_v8  ;;  %v765_v13 = vadd.f32 %v1291_v7, %v687_v9  ;;  %v995_v14 = vadd.f32 %v994_v12, %v993_v6 }
 0x125   :  { %v781_v15 = vmax.f32 %v765_v13, 0.0  ;;  %v690_v16 = vadd.f32 %v995_v14, %v931_v11 }
 0x127   :  { %797 = vst [vmem:[%s1360_s3 + $0x70] sm:$0xff] %v781_v15  ;;  %v766_v17 = vadd.f32 %v1291_v7, %v690_v16 }
 0x129   :  { %v782_v18 = vmax.f32 %v766_v17, 0.0 }
 0x12b   :  { %798 = vst [vmem:[%s1360_s3 + $0x78] sm:$0xff] %v782_v18 }

// kernel: nc_net_forward.13
= control target key start
LH: loop header
LB: loop body
LE: loop exit
PB: predicated region body
PF: predicated region fallthrough
CT: control target
= control target key end

     0   :  { %s1451_s12 = smov 0   ;;  %s1453_s13 = smov 0   ;;  %s1712_s0 = inlined_call_operand.vmem [shape: bf16[512,384], index: 0, kind: input, shape index: {}]   ;;  %s1713_s1 = inlined_call_operand.vmem [shape: bf16[384,128], index: 1, kind: input, shape index: {}]   ;;  %s1714_s2 = inlined_call_operand.vmem [shape: f32[1,128], index: 2, kind: input, shape index: {}]   ;;  %s1715_s3 = inlined_call_operand.vmem [shape: f32[512,128], index: 3, kind: output, shape index: {}]  }
   0x1   :  { %s1455_s14 = smov 0   ;;  %s1457_s15 = smov 0  }
   0x2   :  { %s1459_s16 = smov 0   ;;  %s1461_s17 = smov 0  }
   0x3   :  { %s1463_s18 = smov 0  }
   0x4 LB: > { %s25_s19 = sadd.s32 1, %s1420_s16  ;;  %s32_s20 = sadd.s32 1, %s1424_s17  ;;  %s1428_s18 = sphi %s1463_s18, %s13_s18   ;;  %s1424_s17 = sphi %s1461_s17, %s1721_s17   ;;  %s1420_s16 = sphi %s1459_s16, %s1720_s16   ;;  %s1416_s15 = sphi %s1457_s15, %s1719_s15   ;;  %s1412_s14 = sphi %s1455_s14, %s1718_s14   ;;  %s1408_s13 = sphi %s1453_s13, %s1717_s13   ;;  %s1404_s12 = sphi %s1451_s12, %s1716_s12  }
   0x5   : > { %p26_p0 = scmp.ge.s32.totalorder %s25_s19, 3  ;;  %p48_p1 = scmp.ne.s32.totalorder %s1408_s13, %s1404_s12 }
   0x6   : > { %p49_p2 = scmp.eq.s32.totalorder %s1428_s18, 0  ;;  %s41_s24 = sadd.s32 1, %s1408_s13 }
   0x7   : > { %s1723_s19 = smov (%p26_p0, %s25_s19), 0  ;;  %s1725_s20 = smov (!%p26_p0, %s32_s20), %s1424_s17 }
   0x8   : > { %p50_p3 = por %p49_p2, %p48_p1  ;;  %p34_p4 = scmp.ge.s32.totalorder %s1725_s20, 2 }
   0x9   : > { %s37_s21 = ssub.s32 %s1420_s16, %s1723_s19  ;;  %p1164_p6 = scmp.ge.s32.totalorder %s1428_s18, 6 }
   0xa   : > { %s1727_s20 = smov (%p34_p4, %s1725_s20), 0 }
   0xb   : > { %s36_s22 = ssub.s32 %s1424_s17, %s1727_s20  ;;  %162 = sbr.rel (%p1164_p6) target bundleno = 44 (0x2c), region = 20 }
   0xc   : > { %s38_s23 = sor.u32 %s37_s21, %s36_s22 }
   0xd   : > { %p39_p5 = scmp.eq.s32.totalorder %s38_s23, 0 }
   0xf   : > { %s1502_s25 = scalar_select %p39_p5, %s1408_s13, %s41_s24  }
  0x10   : > { %165 = sbr.rel (!%p50_p3) target bundleno = 44 (0x2c), region = 24  ;;  %s167_s26 = sand.u32 (%p50_p3), 1, %s1408_s13  }
  0x11   : > { %s1292_s27 = smul.u32 (%p50_p3), 96, %s1424_s17  ;;  %s1165_s28 = sshll.u32 (%p50_p3), %s167_s26, 7 }
  0x12   : > { %s1516_s7 = scalar_lea.vmem (%p50_p3), [#allocation3], %s1165_s28 }
  0x13   : > { %s172_s29 = sadd.s32 (%p50_p3), %s1420_s16, %s1292_s27 }
  0x14   : > { %s1168_s30 = sshll.u32 (%p50_p3), %s172_s29, 2 }
  0x15   : > { %s1511_s6 = scalar_lea.vmem %s1712_s0, %s1168_s30 }
  0x16   : > { %v191_v0 = vld [vmem:[%s1511_s6] sm:$0xf]  ;;  %v193_v1 = vld [vmem:[%s1511_s6 + $0xc] sm:$0xf]  ;;  %v195_v2 = vld [vmem:[%s1511_s6 + $0x18] sm:$0xf] }
  0x17   : > { %192 = vst [vmem:[%s1516_s7] sm:$0xf] %v191_v0  ;;  %194 = vst [vmem:[%s1516_s7 + $0x4] sm:$0xf] %v193_v1  ;;  %v197_v3 = vld [vmem:[%s1511_s6 + $0x24] sm:$0xf] }
  0x18   : > { %196 = vst [vmem:[%s1516_s7 + $0x8] sm:$0xf] %v195_v2  ;;  %v199_v4 = vld [vmem:[%s1511_s6 + $0x30] sm:$0xf]  ;;  %v201_v5 = vld [vmem:[%s1511_s6 + $0x3c] sm:$0xf] }
  0x19   : > { %198 = vst [vmem:[%s1516_s7 + $0xc] sm:$0xf] %v197_v3  ;;  %200 = vst [vmem:[%s1516_s7 + $0x10] sm:$0xf] %v199_v4  ;;  %v203_v6 = vld [vmem:[%s1511_s6 + $0x48] sm:$0xf] }
  0x1a   : > { %202 = vst [vmem:[%s1516_s7 + $0x14] sm:$0xf] %v201_v5  ;;  %v205_v7 = vld [vmem:[%s1511_s6 + $0x54] sm:$0xf]  ;;  %v207_v8 = vld [vmem:[%s1511_s6 + $0x60] sm:$0xf] }
  0x1b   : > { %204 = vst [vmem:[%s1516_s7 + $0x18] sm:$0xf] %v203_v6  ;;  %206 = vst [vmem:[%s1516_s7 + $0x1c] sm:$0xf] %v205_v7  ;;  %v209_v9 = vld [vmem:[%s1511_s6 + $0x6c] sm:$0xf] }
  0x1c   : > { %208 = vst [vmem:[%s1516_s7 + $0x20] sm:$0xf] %v207_v8  ;;  %v211_v10 = vld [vmem:[%s1511_s6 + $0x78] sm:$0xf]  ;;  %v213_v11 = vld [vmem:[%s1511_s6 + $0x84] sm:$0xf] }
  0x1d   : > { %210 = vst [vmem:[%s1516_s7 + $0x24] sm:$0xf] %v209_v9  ;;  %212 = vst [vmem:[%s1516_s7 + $0x28] sm:$0xf] %v211_v10  ;;  %v215_v12 = vld [vmem:[%s1511_s6 + $0x90] sm:$0xf] }
  0x1e   : > { %214 = vst [vmem:[%s1516_s7 + $0x2c] sm:$0xf] %v213_v11  ;;  %v217_v13 = vld [vmem:[%s1511_s6 + $0x9c] sm:$0xf]  ;;  %v219_v14 = vld [vmem:[%s1511_s6 + $0xa8] sm:$0xf] }
  0x1f   : > { %216 = vst [vmem:[%s1516_s7 + $0x30] sm:$0xf] %v215_v12  ;;  %218 = vst [vmem:[%s1516_s7 + $0x34] sm:$0xf] %v217_v13  ;;  %v221_v15 = vld [vmem:[%s1511_s6 + $0xb4] sm:$0xf] }
  0x20   : > { %220 = vst [vmem:[%s1516_s7 + $0x38] sm:$0xf] %v219_v14  ;;  %v223_v16 = vld [vmem:[%s1511_s6 + $0xc0] sm:$0xf]  ;;  %v225_v17 = vld [vmem:[%s1511_s6 + $0xcc] sm:$0xf] }
  0x21   : > { %222 = vst [vmem:[%s1516_s7 + $0x3c] sm:$0xf] %v221_v15  ;;  %224 = vst [vmem:[%s1516_s7 + $0x40] sm:$0xf] %v223_v16  ;;  %v227_v18 = vld [vmem:[%s1511_s6 + $0xd8] sm:$0xf] }
  0x22   : > { %226 = vst [vmem:[%s1516_s7 + $0x44] sm:$0xf] %v225_v17  ;;  %v229_v19 = vld [vmem:[%s1511_s6 + $0xe4] sm:$0xf]  ;;  %v231_v20 = vld [vmem:[%s1511_s6 + $0xf0] sm:$0xf] }
  0x23   : > { %228 = vst [vmem:[%s1516_s7 + $0x48] sm:$0xf] %v227_v18  ;;  %230 = vst [vmem:[%s1516_s7 + $0x4c] sm:$0xf] %v229_v19  ;;  %v233_v21 = vld [vmem:[%s1511_s6 + $0xfc] sm:$0xf] }
  0x24   : > { %232 = vst [vmem:[%s1516_s7 + $0x50] sm:$0xf] %v231_v20  ;;  %v235_v22 = vld [vmem:[%s1511_s6 + $0x108] sm:$0xf]  ;;  %v237_v23 = vld [vmem:[%s1511_s6 + $0x114] sm:$0xf] }
  0x25   : > { %234 = vst [vmem:[%s1516_s7 + $0x54] sm:$0xf] %v233_v21  ;;  %236 = vst [vmem:[%s1516_s7 + $0x58] sm:$0xf] %v235_v22  ;;  %v239_v24 = vld [vmem:[%s1511_s6 + $0x120] sm:$0xf] }
  0x26   : > { %238 = vst [vmem:[%s1516_s7 + $0x5c] sm:$0xf] %v237_v23  ;;  %v241_v25 = vld [vmem:[%s1511_s6 + $0x12c] sm:$0xf]  ;;  %v243_v26 = vld [vmem:[%s1511_s6 + $0x138] sm:$0xf] }
  0x27   : > { %240 = vst [vmem:[%s1516_s7 + $0x60] sm:$0xf] %v239_v24  ;;  %242 = vst [vmem:[%s1516_s7 + $0x64] sm:$0xf] %v241_v25  ;;  %v245_v27 = vld [vmem:[%s1511_s6 + $0x144] sm:$0xf] }
  0x28   : > { %244 = vst [vmem:[%s1516_s7 + $0x68] sm:$0xf] %v243_v26  ;;  %v247_v28 = vld [vmem:[%s1511_s6 + $0x150] sm:$0xf]  ;;  %v249_v29 = vld [vmem:[%s1511_s6 + $0x15c] sm:$0xf] }
  0x29   : > { %246 = vst [vmem:[%s1516_s7 + $0x6c] sm:$0xf] %v245_v27  ;;  %248 = vst [vmem:[%s1516_s7 + $0x70] sm:$0xf] %v247_v28  ;;  %v251_v30 = vld [vmem:[%s1511_s6 + $0x168] sm:$0xf] }
  0x2a   : > { %250 = vst [vmem:[%s1516_s7 + $0x74] sm:$0xf] %v249_v29  ;;  %v253_v31 = vld [vmem:[%s1511_s6 + $0x174] sm:$0xf]  ;;  %252 = vst [vmem:[%s1516_s7 + $0x78] sm:$0xf] %v251_v30 }
  0x2b   : > { %254 = vst [vmem:[%s1516_s7 + $0x7c] sm:$0xf] %v253_v31 }
  0x2c PF: > { %p1169_p7 = scmp.ge.s32.totalorder %s1428_s18, 1  ;;  %p353_p8 = scmp.lt.s32.totalorder %s1428_s18, 7 }
  0x2e   : > { %p354_p9 = pnand %p1169_p7, %p353_p8 }
  0x2f   : > { %s360_s8 = sand.u32 (!%p354_p9), 1, %s1404_s12   ;;  %s1171_s9 = sshll.u32 (!%p354_p9), %s1412_s14, 4 }
  0x30   : > { %357 = sbr.rel (%p354_p9) target bundleno = 358 (0x166), region = 69  ;;  %s1170_s10 = sshll.u32 (!%p354_p9), %s360_s8, 7 }
  0x31   : > { %p399_p10 = scmp.lt.s32.totalorder (!%p354_p9), %s1171_s9, 47  ;;  %s1173_s11 = sshll.u32 (!%p354_p9), %s1416_s15, 5 }
  0x32   : > { %p411_p11 = scmp.lt.s32.totalorder (!%p354_p9), %s1173_s11, 63  ;;  %s1594_s12 = scalar_lea.vmem (!%p354_p9), [#allocation3], %s1170_s10 }
  0x33   : > { %p1175_p12 = scmp.ne.s32.totalorder (!%p354_p9), %s1412_s14, 0 }
  0x35   : > { %s1729_s9 = smov (!%p399_p10, %s1171_s9), 47  ;;  %s1731_s11 = smov (!%p411_p11, %s1173_s11), 63 }
  0x36   : > { %s1172_s21 = sshll.u32 %s1729_s9, 2  ;;  %s1174_s26 = sshll.u32 %s1731_s11, 3 }
  0x37   : > { %s1587_s24 = scalar_lea.vmem %s1713_s1, %s1172_s21  ;;  %s1592_s29 = scalar_lea.vmem %s1715_s3, %s1174_s26 }
  0x38   : > { %423 = sbr.rel (%p1175_p12) target bundleno = 78 (0x4e), region = 77 }
  0x3d   : > { %v1430_v32 = vmov 0.0  }
  0x3e   : > { %424 = vst [vmem:[#allocation2 + $0xb0] sm:$0xff] %v1430_v32  ;;  %425 = vst [vmem:[#allocation2] sm:$0xff] %v1430_v32 }
  0x3f   : > { %426 = vst [vmem:[#allocation2 + $0xd8] sm:$0xff] %v1430_v32  ;;  %427 = vst [vmem:[#allocation2 + $0x18] sm:$0xff] %v1430_v32 }
  0x40   : > { %428 = vst [vmem:[#allocation2 + $0x50] sm:$0xff] %v1430_v32  ;;  %429 = vst [vmem:[#allocation2 + $0x68] sm:$0xff] %v1430_v32 }
  0x41   : > { %430 = vst [vmem:[#allocation2 + $0x30] sm:$0xff] %v1430_v32  ;;  %431 = vst [vmem:[#allocation2 + $0x48] sm:$0xff] %v1430_v32 }
  0x42   : > { %432 = vst [vmem:[#allocation2 + $0x80] sm:$0xff] %v1430_v32  ;;  %433 = vst [vmem:[#allocation2 + $0x88] sm:$0xff] %v1430_v32 }
  0x43   : > { %434 = vst [vmem:[#allocation2 + $0xe8] sm:$0xff] %v1430_v32  ;;  %435 = vst [vmem:[#allocation2 + $0xb8] sm:$0xff] %v1430_v32 }
  0x44   : > { %436 = vst [vmem:[#allocation2 + $0x60] sm:$0xff] %v1430_v32  ;;  %437 = vst [vmem:[#allocation2 + $0xf0] sm:$0xff] %v1430_v32 }
  0x45   : > { %438 = vst [vmem:[#allocation2 + $0x8] sm:$0xff] %v1430_v32  ;;  %439 = vst [vmem:[#allocation2 + $0x78] sm:$0xff] %v1430_v32 }
  0x46   : > { %440 = vst [vmem:[#allocation2 + $0x38] sm:$0xff] %v1430_v32  ;;  %441 = vst [vmem:[#allocation2 + $0x58] sm:$0xff] %v1430_v32 }
  0x47   : > { %442 = vst [vmem:[#allocation2 + $0x40] sm:$0xff] %v1430_v32  ;;  %443 = vst [vmem:[#allocation2 + $0xc8] sm:$0xff] %v1430_v32 }
  0x48   : > { %444 = vst [vmem:[#allocation2 + $0xe0] sm:$0xff] %v1430_v32  ;;  %445 = vst [vmem:[#allocation2 + $0x90] sm:$0xff] %v1430_v32 }
  0x49   : > { %446 = vst [vmem:[#allocation2 + $0x70] sm:$0xff] %v1430_v32  ;;  %447 = vst [vmem:[#allocation2 + $0xc0] sm:$0xff] %v1430_v32 }
  0x4a   : > { %448 = vst [vmem:[#allocation2 + $0xa8] sm:$0xff] %v1430_v32  ;;  %449 = vst [vmem:[#allocation2 + $0xd0] sm:$0xff] %v1430_v32 }
  0x4b   : > { %450 = vst [vmem:[#allocation2 + $0x10] sm:$0xff] %v1430_v32  ;;  %451 = vst [vmem:[#allocation2 + $0x28] sm:$0xff] %v1430_v32 }
  0x4c   : > { %452 = vst [vmem:[#allocation2 + $0xa0] sm:$0xff] %v1430_v32  ;;  %453 = vst [vmem:[#allocation2 + $0xf8] sm:$0xff] %v1430_v32 }
  0x4d   : > { %454 = vst [vmem:[#allocation2 + $0x20] sm:$0xff] %v1430_v32  ;;  %455 = vst [vmem:[#allocation2 + $0x98] sm:$0xff] %v1430_v32 }
  0x4e PF: > { %v1350_v33 = vld [vmem:[%s1587_s24 + $0x38] sm:$0xff]   ;;  %v1351_v34 = vld [vmem:[%s1587_s24 + $0x30] sm:$0xff]   ;;  %v1352_v35 = vld [vmem:[%s1587_s24 + $0x28] sm:$0xff]   ;;  %p1200_p13 = scmp.ne.s32.totalorder %s1412_s14, 2 }
  0x4f   : > { %1228 = vmatprep.subr.bf16.mxu0 %v1350_v33  ;;  %1276 = vmatprep.subr.bf16.mxu1 %v1350_v33  ;;  %v1353_v36 = vld [vmem:[%s1587_s24 + $0x20] sm:$0xff]   ;;  %v1354_v39 = vld [vmem:[%s1587_s24 + $0x18] sm:$0xff]   ;;  %v1355_v40 = vld [vmem:[%s1587_s24 + $0x10] sm:$0xff]  }
  0x50   : > { %1229 = vmatpush3.bf16.msra.mxu0 %v1350_v33  ;;  %1284 = vmatpush3.bf16.msra.mxu1 %v1350_v33  ;;  %v1358_v37 = vld [vmem:[%s1594_s12] sm:$0xff]   ;;  %v1356_v41 = vld [vmem:[%s1587_s24 + $0x8] sm:$0xff]   ;;  %v1362_v45 = vld [vmem:[%s1594_s12 + $0x10] sm:$0xff]  }
  0x51   : > { %1230 = vmatprep.subr.bf16.mxu0 %v1351_v34  ;;  %1277 = vmatprep.subr.bf16.mxu1 %v1351_v34  ;;  %v1359_v38 = vld [vmem:[%s1594_s12 + $0x40] sm:$0xff]   ;;  %v1360_v43 = vld [vmem:[%s1594_s12 + $0x8] sm:$0xff]   ;;  %v1363_v46 = vld [vmem:[%s1594_s12 + $0x50] sm:$0xff]  }
  0x52   : > { %1244 = vmatprep.mubr.bf16.mxu0 %v1358_v37  ;;  %1260 = vmatprep.mubr.bf16.mxu1 %v1359_v38  ;;  %v1357_v42 = vld [vmem:[%s1587_s24] sm:$0xff]   ;;  %v1361_v44 = vld [vmem:[%s1594_s12 + $0x48] sm:$0xff]   ;;  %v1364_v47 = vld [vmem:[%s1594_s12 + $0x18] sm:$0xff]  }
  0x53   : > { %v1365_v48 = vld [vmem:[%s1594_s12 + $0x58] sm:$0xff]   ;;  %v1366_v49 = vld [vmem:[%s1594_s12 + $0x20] sm:$0xff]   ;;  %v1368_v51 = vld [vmem:[%s1594_s12 + $0x28] sm:$0xff]  }
  0x54   : > { %1231 = vmatpush3.bf16.msra.mxu0 %v1351_v34  ;;  %1285 = vmatpush3.bf16.msra.mxu1 %v1351_v34  ;;  %v1367_v50 = vld [vmem:[%s1594_s12 + $0x60] sm:$0xff]   ;;  %v1369_v52 = vld [vmem:[%s1594_s12 + $0x68] sm:$0xff]   ;;  %v1370_v53 = vld [vmem:[%s1594_s12 + $0x30] sm:$0xff]  }
  0x55   : > { %1232 = vmatprep.subr.bf16.mxu0 %v1352_v35  ;;  %1278 = vmatprep.subr.bf16.mxu1 %v1352_v35  ;;  %v1371_v54 = vld [vmem:[%s1594_s12 + $0x70] sm:$0xff]   ;;  %v1372_v55 = vld [vmem:[%s1594_s12 + $0x38] sm:$0xff]   ;;  %v474_v58 = vld [vmem:[#allocation2 + $0x40] sm:$0xff] }
  0x56   : > { %v1373_v56 = vld [vmem:[%s1594_s12 + $0x78] sm:$0xff]   ;;  %v456_v61 = vld [vmem:[#allocation2 + $0xb0] sm:$0xff]  ;;  %v475_v4 = vld [vmem:[#allocation2 + $0xc8] sm:$0xff] }
  0x57   : > { %v458_v57 = vld [vmem:[#allocation2 + $0xd8] sm:$0xff]  ;;  %v457_v9 = vld [vmem:[#allocation2] sm:$0xff]  ;;  %v462_v15 = vld [vmem:[#allocation2 + $0x30] sm:$0xff] }
  0x58   : > { %1233 = vmatpush3.bf16.msra.mxu0 %v1352_v35  ;;  %1286 = vmatpush3.bf16.msra.mxu1 %v1352_v35  ;;  %v472_v62 = vld [vmem:[#allocation2 + $0x38] sm:$0xff]  ;;  %v478_v16 = vld [vmem:[#allocation2 + $0x70] sm:$0xff]  ;;  %v476_v22 = vld [vmem:[#allocation2 + $0xe0] sm:$0xff] }
  0x59   : > { %1234 = vmatprep.subr.bf16.mxu0 %v1353_v36  ;;  %1279 = vmatprep.subr.bf16.mxu1 %v1353_v36  ;;  %v459_v3 = vld [vmem:[#allocation2 + $0x18] sm:$0xff]  ;;  %v460_v21 = vld [vmem:[#allocation2 + $0x50] sm:$0xff]  ;;  %v463_v27 = vld [vmem:[#allocation2 + $0x48] sm:$0xff] }
  0x5a   : > { %v473_v10 = vld [vmem:[#allocation2 + $0x58] sm:$0xff]  ;;  %v479_v28 = vld [vmem:[#allocation2 + $0xc0] sm:$0xff]  ;;  %v461_v33 = vld [vmem:[#allocation2 + $0x68] sm:$0xff] }
  0x5b   : > { %v477_v34 = vld [vmem:[#allocation2 + $0x90] sm:$0xff] }
  0x5c   : > { %1235 = vmatpush3.bf16.msra.mxu0 %v1353_v36  ;;  %1287 = vmatpush3.bf16.msra.mxu1 %v1353_v36 }
  0x5d   : > { %1236 = vmatprep.subr.bf16.mxu0 %v1354_v39  ;;  %1280 = vmatprep.subr.bf16.mxu1 %v1354_v39 }
  0x60   : > { %1237 = vmatpush3.bf16.msra.mxu0 %v1354_v39  ;;  %1288 = vmatpush3.bf16.msra.mxu1 %v1354_v39  ;;  %v466_v39 = vld [vmem:[#allocation2 + $0xe8] sm:$0xff] }
  0x61   : > { %1238 = vmatprep.subr.bf16.mxu0 %v1355_v40  ;;  %1281 = vmatprep.subr.bf16.mxu1 %v1355_v40 }
  0x64   : > { %1239 = vmatpush3.bf16.msra.mxu0 %v1355_v40  ;;  %1289 = vmatpush3.bf16.msra.mxu1 %v1355_v40  ;;  %v482_v40 = vld [vmem:[#allocation2 + $0x10] sm:$0xff] }
  0x65   : > { %1240 = vmatprep.subr.bf16.mxu0 %v1356_v41  ;;  %1282 = vmatprep.subr.bf16.mxu1 %v1356_v41 }
  0x68   : > { %1241 = vmatpush3.bf16.msra.mxu0 %v1356_v41  ;;  %1290 = vmatpush3.bf16.msra.mxu1 %v1356_v41 }
  0x69   : > { %1242 = vmatprep.subr.bf16.mxu0 %v1357_v42  ;;  %1283 = vmatprep.subr.bf16.mxu1 %v1357_v42 }
  0x6c   : > { %1243 = vmatpush3.bf16.msra.mxu0 %v1357_v42  ;;  %1291 = vmatpush3.bf16.msra.mxu1 %v1357_v42 }
  0x6f   : > { %1245 = vmatmul.mubr.bf16.vlgmr.msra.gmra.mxu0 %v1360_v43  ;;  %1261 = vmatmul.mubr.bf16.vlgmr.msra.gmra.mxu1 %v1361_v44 }
  0x70   : > { %1248 = vmatprep.mubr.bf16.mxu0 %v1362_v45  ;;  %1264 = vmatprep.mubr.bf16.mxu1 %v1363_v46  ;;  %v464_v45 = vld [vmem:[#allocation2 + $0x80] sm:$0xff]  ;;  %v480_v46 = vld [vmem:[#allocation2 + $0xa8] sm:$0xff] }
  0x77   : > { %1249 = vmatmul.mubr.bf16.gmra.mxu0 %v1364_v47  ;;  %1265 = vmatmul.mubr.bf16.gmra.mxu1 %v1365_v48 }
  0x78   : > { %1252 = vmatprep.mubr.bf16.mxu0 %v1366_v49  ;;  %1268 = vmatprep.mubr.bf16.mxu1 %v1367_v50 }
  0x7f   : > { %1253 = vmatmul.mubr.bf16.gmra.mxu0 %v1368_v51  ;;  %1269 = vmatmul.mubr.bf16.gmra.mxu1 %v1369_v52  ;;  %v467_v51 = vld [vmem:[#allocation2 + $0xb8] sm:$0xff]  ;;  %v483_v52 = vld [vmem:[#allocation2 + $0x28] sm:$0xff] }
  0x80   : > { %1256 = vmatprep.mubr.bf16.mxu0 %v1370_v53  ;;  %1272 = vmatprep.mubr.bf16.mxu1 %v1371_v54 }
  0x87   : > { %1257 = vmatmul.mubr.bf16.gmra.mxu0 %v1372_v55  ;;  %1273 = vmatmul.mubr.bf16.gmra.mxu1 %v1373_v56 }
 0x12f   : > { %v1246_v59 = vpop.f32.mrf.mxu0  ;;  %v1262_v60 = vpop.f32.mrf.mxu1 }
 0x130   : > { %v843_v63 = vadd.f32 %v1246_v59, %v458_v57  ;;  %v859_v0 = vadd.f32 %v1262_v60, %v474_v58  ;;  %v465_v57 = vld [vmem:[#allocation2 + $0x88] sm:$0xff]  ;;  %v481_v58 = vld [vmem:[#allocation2 + $0xd0] sm:$0xff] }
 0x131   : > { %v714_v1 = vpop.f32.mrf.mxu0  ;;  %v778_v2 = vpop.f32.mrf.mxu1 }
 0x132   : > { %875 = vst [vmem:[#allocation2 + $0xd8] sm:$0xff] %v843_v63  ;;  %891 = vst [vmem:[#allocation2 + $0x40] sm:$0xff] %v859_v0  ;;  %v841_v5 = vadd.f32 %v714_v1, %v456_v61  ;;  %v857_v6 = vadd.f32 %v778_v2, %v472_v62  ;;  %v470_v63 = vld [vmem:[#allocation2 + $0x8] sm:$0xff]  ;;  %v486_v0 = vld [vmem:[#allocation2 + $0x20] sm:$0xff] }
 0x133   : > { %v1247_v7 = vpop.f32.mrf.mxu0  ;;  %v1263_v8 = vpop.f32.mrf.mxu1 }
 0x134   : > { %873 = vst [vmem:[#allocation2 + $0xb0] sm:$0xff] %v841_v5  ;;  %889 = vst [vmem:[#allocation2 + $0x38] sm:$0xff] %v857_v6  ;;  %v844_v11 = vadd.f32 %v1247_v7, %v459_v3  ;;  %v860_v12 = vadd.f32 %v1263_v8, %v475_v4  ;;  %v468_v5 = vld [vmem:[#allocation2 + $0x60] sm:$0xff] }
 0x135   : > { %v717_v13 = vpop.f32.mrf.mxu0  ;;  %v781_v14 = vpop.f32.mrf.mxu1  ;;  %v484_v6 = vld [vmem:[#allocation2 + $0xa0] sm:$0xff] }
 0x136   : > { %876 = vst [vmem:[#allocation2 + $0x18] sm:$0xff] %v844_v11  ;;  %892 = vst [vmem:[#allocation2 + $0xc8] sm:$0xff] %v860_v12  ;;  %v842_v17 = vadd.f32 %v717_v13, %v457_v9  ;;  %v858_v18 = vadd.f32 %v781_v14, %v473_v10  ;;  %v471_v11 = vld [vmem:[#allocation2 + $0x78] sm:$0xff] }
 0x137   : > { %v1250_v19 = vpop.f32.mrf.mxu0  ;;  %v1266_v20 = vpop.f32.mrf.mxu1  ;;  %v487_v12 = vld [vmem:[#allocation2 + $0x98] sm:$0xff] }
 0x138   : > { %874 = vst [vmem:[#allocation2] sm:$0xff] %v842_v17  ;;  %890 = vst [vmem:[#allocation2 + $0x58] sm:$0xff] %v858_v18  ;;  %v847_v23 = vadd.f32 %v1250_v19, %v462_v15  ;;  %v863_v24 = vadd.f32 %v1266_v20, %v478_v16  ;;  %v469_v17 = vld [vmem:[#allocation2 + $0xf0] sm:$0xff]  ;;  %v485_v18 = vld [vmem:[#allocation2 + $0xf8] sm:$0xff] }
 0x139   : > { %v730_v25 = vpop.f32.mrf.mxu0  ;;  %v794_v26 = vpop.f32.mrf.mxu1 }
 0x13a   : > { %879 = vst [vmem:[#allocation2 + $0x30] sm:$0xff] %v847_v23  ;;  %895 = vst [vmem:[#allocation2 + $0x70] sm:$0xff] %v863_v24  ;;  %v845_v29 = vadd.f32 %v730_v25, %v460_v21  ;;  %v861_v30 = vadd.f32 %v794_v26, %v476_v22 }
 0x13b   : > { %v1251_v31 = vpop.f32.mrf.mxu0  ;;  %v1267_v32 = vpop.f32.mrf.mxu1 }
 0x13c   : > { %877 = vst [vmem:[#allocation2 + $0x50] sm:$0xff] %v845_v29  ;;  %893 = vst [vmem:[#allocation2 + $0xe0] sm:$0xff] %v861_v30  ;;  %v848_v35 = vadd.f32 %v1251_v31, %v463_v27  ;;  %v864_v36 = vadd.f32 %v1267_v32, %v479_v28 }
 0x13d   : > { %v733_v37 = vpop.f32.mrf.mxu0  ;;  %v797_v38 = vpop.f32.mrf.mxu1 }
 0x13e   : > { %880 = vst [vmem:[#allocation2 + $0x48] sm:$0xff] %v848_v35  ;;  %896 = vst [vmem:[#allocation2 + $0xc0] sm:$0xff] %v864_v36  ;;  %v846_v41 = vadd.f32 %v733_v37, %v461_v33  ;;  %v862_v42 = vadd.f32 %v797_v38, %v477_v34 }
 0x13f   : > { %v1254_v43 = vpop.f32.mrf.mxu0  ;;  %v1270_v44 = vpop.f32.mrf.mxu1 }
 0x140   : > { %878 = vst [vmem:[#allocation2 + $0x68] sm:$0xff] %v846_v41  ;;  %894 = vst [vmem:[#allocation2 + $0x90] sm:$0xff] %v862_v42  ;;  %v851_v47 = vadd.f32 %v1254_v43, %v466_v39  ;;  %v867_v48 = vadd.f32 %v1270_v44, %v482_v40 }
 0x141   : > { %v746_v49 = vpop.f32.mrf.mxu0  ;;  %v810_v50 = vpop.f32.mrf.mxu1 }
 0x142   : > { %883 = vst [vmem:[#allocation2 + $0xe8] sm:$0xff] %v851_v47  ;;  %899 = vst [vmem:[#allocation2 + $0x10] sm:$0xff] %v867_v48  ;;  %v849_v53 = vadd.f32 %v746_v49, %v464_v45  ;;  %v865_v54 = vadd.f32 %v810_v50, %v480_v46 }
 0x143   : > { %v1255_v55 = vpop.f32.mrf.mxu0  ;;  %v1271_v56 = vpop.f32.mrf.mxu1 }
 0x144   : > { %881 = vst [vmem:[#allocation2 + $0x80] sm:$0xff] %v849_v53  ;;  %897 = vst [vmem:[#allocation2 + $0xa8] sm:$0xff] %v865_v54  ;;  %v852_v59 = vadd.f32 %v1255_v55, %v467_v51  ;;  %v868_v60 = vadd.f32 %v1271_v56, %v483_v52 }
 0x145   : > { %v749_v61 = vpop.f32.mrf.mxu0  ;;  %v813_v62 = vpop.f32.mrf.mxu1 }
 0x146   : > { %884 = vst [vmem:[#allocation2 + $0xb8] sm:$0xff] %v852_v59  ;;  %900 = vst [vmem:[#allocation2 + $0x28] sm:$0xff] %v868_v60  ;;  %v850_v1 = vadd.f32 %v749_v61, %v465_v57  ;;  %v866_v2 = vadd.f32 %v813_v62, %v481_v58 }
 0x147   : > { %v1258_v3 = vpop.f32.mrf.mxu0  ;;  %v1274_v4 = vpop.f32.mrf.mxu1 }
 0x148   : > { %882 = vst [vmem:[#allocation2 + $0x88] sm:$0xff] %v850_v1  ;;  %898 = vst [vmem:[#allocation2 + $0xd0] sm:$0xff] %v866_v2  ;;  %v855_v7 = vadd.f32 %v1258_v3, %v470_v63  ;;  %v871_v8 = vadd.f32 %v1274_v4, %v486_v0 }
 0x149   : > { %v762_v9 = vpop.f32.mrf.mxu0  ;;  %v826_v10 = vpop.f32.mrf.mxu1 }
 0x14a   : > { %887 = vst [vmem:[#allocation2 + $0x8] sm:$0xff] %v855_v7  ;;  %903 = vst [vmem:[#allocation2 + $0x20] sm:$0xff] %v871_v8  ;;  %v853_v13 = vadd.f32 %v762_v9, %v468_v5  ;;  %v869_v14 = vadd.f32 %v826_v10, %v484_v6 }
 0x14b   : > { %v1259_v15 = vpop.f32.mrf.mxu0  ;;  %v1275_v16 = vpop.f32.mrf.mxu1 }
 0x14c   : > { %885 = vst [vmem:[#allocation2 + $0x60] sm:$0xff] %v853_v13  ;;  %901 = vst [vmem:[#allocation2 + $0xa0] sm:$0xff] %v869_v14  ;;  %v856_v19 = vadd.f32 %v1259_v15, %v471_v11  ;;  %v872_v20 = vadd.f32 %v1275_v16, %v487_v12  ;;  %908 = sbr.rel (%p1200_p13) target bundleno = 358 (0x166), region = 81 }
 0x14d   : > { %v765_v21 = vpop.f32.mrf.mxu0  ;;  %v829_v22 = vpop.f32.mrf.mxu1 }
 0x14e   : > { %888 = vst [vmem:[#allocation2 + $0x78] sm:$0xff] %v856_v19  ;;  %904 = vst [vmem:[#allocation2 + $0x98] sm:$0xff] %v872_v20  ;;  %v854_v23 = vadd.f32 %v765_v21, %v469_v17  ;;  %v870_v24 = vadd.f32 %v829_v22, %v485_v18 }
 0x150   : > { %886 = vst [vmem:[#allocation2 + $0xf0] sm:$0xff] %v854_v23  ;;  %902 = vst [vmem:[#allocation2 + $0xf8] sm:$0xff] %v870_v24 }
 0x151   : > { %v909_v25 = vld [vmem:[#allocation2 + $0xb0] sm:$0xff]  ;;  %v1625_v26 = vld [vmem:[%s1714_s2] ss:$0 sm:$0xff]  ;;  %v911_v30 = vld [vmem:[#allocation2 + $0xd8] sm:$0xff] }
 0x152   : > { %v910_v27 = vld [vmem:[#allocation2] sm:$0xff]  ;;  %v948_v28 = vadd.f32 %v1625_v26, %v909_v25  ;;  %v912_v31 = vld [vmem:[#allocation2 + $0x18] sm:$0xff]  ;;  %v913_v32 = vld [vmem:[#allocation2 + $0x50] sm:$0xff]  ;;  %v950_v33 = vadd.f32 %v1625_v26, %v911_v30 }
 0x153   : > { %v949_v29 = vadd.f32 %v1625_v26, %v910_v27  ;;  %v951_v34 = vadd.f32 %v1625_v26, %v912_v31  ;;  %v952_v35 = vadd.f32 %v1625_v26, %v913_v32  ;;  %v914_v36 = vld [vmem:[#allocation2 + $0x68] sm:$0xff]  ;;  %v915_v37 = vld [vmem:[#allocation2 + $0x30] sm:$0xff]  ;;  %v917_v43 = vld [vmem:[#allocation2 + $0x80] sm:$0xff] }
 0x154   : > { %v916_v38 = vld [vmem:[#allocation2 + $0x48] sm:$0xff]  ;;  %v980_v39 = vmax.f32 %v948_v28, 0.0  ;;  %v953_v41 = vadd.f32 %v1625_v26, %v914_v36  ;;  %v954_v42 = vadd.f32 %v1625_v26, %v915_v37  ;;  %v982_v46 = vmax.f32 %v950_v33, 0.0  ;;  %v920_v50 = vld [vmem:[#allocation2 + $0xb8] sm:$0xff]  ;;  %v921_v51 = vld [vmem:[#allocation2 + $0x60] sm:$0xff] }
 0x155   : > { %v981_v40 = vmax.f32 %v949_v29, 0.0  ;;  %v918_v44 = vld [vmem:[#allocation2 + $0x88] sm:$0xff]  ;;  %v983_v47 = vmax.f32 %v951_v34, 0.0  ;;  %v984_v48 = vmax.f32 %v952_v35, 0.0  ;;  %v955_v49 = vadd.f32 %v1625_v26, %v916_v38  ;;  %v924_v58 = vld [vmem:[#allocation2 + $0x78] sm:$0xff]  ;;  %v927_v5 = vld [vmem:[#allocation2 + $0x40] sm:$0xff] }
 0x156   : > { %v919_v45 = vld [vmem:[#allocation2 + $0xe8] sm:$0xff]  ;;  %1012 = vst [vmem:[%s1592_s29] sm:$0xff] %v980_v39  ;;  %v985_v53 = vmax.f32 %v953_v41, 0.0  ;;  %v986_v54 = vmax.f32 %v954_v42, 0.0  ;;  %v956_v55 = vadd.f32 %v1625_v26, %v917_v43  ;;  %v957_v56 = vadd.f32 %v1625_v26, %v918_v44  ;;  %1014 = vst [vmem:[%s1592_s29 + $0x10] sm:$0xff] %v982_v46  ;;  %v925_v63 = vld [vmem:[#allocation2 + $0x38] sm:$0xff] }
 0x157   : > { %v922_v52 = vld [vmem:[#allocation2 + $0xf0] sm:$0xff]  ;;  %1013 = vst [vmem:[%s1592_s29 + $0x8] sm:$0xff] %v981_v40  ;;  %v923_v57 = vld [vmem:[#allocation2 + $0x8] sm:$0xff]  ;;  %1015 = vst [vmem:[%s1592_s29 + $0x18] sm:$0xff] %v983_v47  ;;  %v987_v59 = vmax.f32 %v955_v49, 0.0  ;;  %v958_v60 = vadd.f32 %v1625_v26, %v919_v45  ;;  %v959_v61 = vadd.f32 %v1625_v26, %v920_v50  ;;  %v960_v62 = vadd.f32 %v1625_v26, %v921_v51 }
 0x158   : > { %1016 = vst [vmem:[%s1592_s29 + $0x20] sm:$0xff] %v984_v48  ;;  %v926_v0 = vld [vmem:[#allocation2 + $0x58] sm:$0xff]  ;;  %1017 = vst [vmem:[%s1592_s29 + $0x28] sm:$0xff] %v985_v53  ;;  %v988_v1 = vmax.f32 %v956_v55, 0.0  ;;  %v989_v2 = vmax.f32 %v957_v56, 0.0  ;;  %v961_v3 = vadd.f32 %v1625_v26, %v922_v52  ;;  %v962_v4 = vadd.f32 %v1625_v26, %v923_v57  ;;  %v928_v6 = vld [vmem:[#allocation2 + $0xc8] sm:$0xff] }
 0x159   : > { %1018 = vst [vmem:[%s1592_s29 + $0x30] sm:$0xff] %v986_v54  ;;  %v929_v7 = vld [vmem:[#allocation2 + $0xe0] sm:$0xff]  ;;  %1019 = vst [vmem:[%s1592_s29 + $0x38] sm:$0xff] %v987_v59  ;;  %v990_v8 = vmax.f32 %v958_v60, 0.0  ;;  %v991_v9 = vmax.f32 %v959_v61, 0.0  ;;  %v992_v10 = vmax.f32 %v960_v62, 0.0  ;;  %v963_v11 = vadd.f32 %v1625_v26, %v924_v58 }
 0x15a   : > { %v930_v12 = vld [vmem:[#allocation2 + $0x90] sm:$0xff]  ;;  %1020 = vst [vmem:[%s1592_s29 + $0x40] sm:$0xff] %v988_v1  ;;  %1021 = vst [vmem:[%s1592_s29 + $0x48] sm:$0xff] %v989_v2  ;;  %v993_v14 = vmax.f32 %v961_v3, 0.0  ;;  %v994_v15 = vmax.f32 %v962_v4, 0.0  ;;  %v964_v16 = vadd.f32 %v1625_v26, %v925_v63  ;;  %v965_v17 = vadd.f32 %v1625_v26, %v926_v0  ;;  %v932_v18 = vld [vmem:[#allocation2 + $0xc0] sm:$0xff] }
 0x15b   : > { %v931_v13 = vld [vmem:[#allocation2 + $0x70] sm:$0xff]  ;;  %1022 = vst [vmem:[%s1592_s29 + $0x50] sm:$0xff] %v990_v8  ;;  %1023 = vst [vmem:[%s1592_s29 + $0x58] sm:$0xff] %v991_v9  ;;  %v995_v19 = vmax.f32 %v963_v11, 0.0  ;;  %v966_v20 = vadd.f32 %v1625_v26, %v927_v5  ;;  %v967_v21 = vadd.f32 %v1625_v26, %v928_v6  ;;  %v968_v22 = vadd.f32 %v1625_v26, %v929_v7  ;;  %v933_v23 = vld [vmem:[#allocation2 + $0xa8] sm:$0xff] }
 0x15c   : > { %1024 = vst [vmem:[%s1592_s29 + $0x60] sm:$0xff] %v992_v10  ;;  %v934_v24 = vld [vmem:[#allocation2 + $0xd0] sm:$0xff]  ;;  %1025 = vst [vmem:[%s1592_s29 + $0x68] sm:$0xff] %v993_v14  ;;  %v996_v25 = vmax.f32 %v964_v16, 0.0  ;;  %v997_v27 = vmax.f32 %v965_v17, 0.0  ;;  %v969_v28 = vadd.f32 %v1625_v26, %v930_v12  ;;  %v970_v29 = vadd.f32 %v1625_v26, %v931_v13  ;;  %v936_v31 = vld [vmem:[#allocation2 + $0x28] sm:$0xff] }
 0x15d   : > { %1026 = vst [vmem:[%s1592_s29 + $0x70] sm:$0xff] %v994_v15  ;;  %v935_v30 = vld [vmem:[#allocation2 + $0x10] sm:$0xff]  ;;  %v937_v32 = vld [vmem:[#allocation2 + $0xa0] sm:$0xff]  ;;  %1027 = vst [vmem:[%s1592_s29 + $0x78] sm:$0xff] %v995_v19  ;;  %v998_v33 = vmax.f32 %v966_v20, 0.0  ;;  %v999_v34 = vmax.f32 %v967_v21, 0.0  ;;  %v971_v36 = vadd.f32 %v1625_v26, %v932_v18  ;;  %v972_v41 = vadd.f32 %v1625_v26, %v933_v23 }
 0x15e   : > { %v1000_v35 = vmax.f32 %v968_v22, 0.0  ;;  %v938_v37 = vld [vmem:[#allocation2 + $0xf8] sm:$0xff]  ;;  %v939_v38 = vld [vmem:[#allocation2 + $0x20] sm:$0xff]  ;;  %1028 = vst [vmem:[%s1592_s29 + $0x80] sm:$0xff] %v996_v25  ;;  %1029 = vst [vmem:[%s1592_s29 + $0x88] sm:$0xff] %v997_v27  ;;  %v1001_v39 = vmax.f32 %v969_v28, 0.0  ;;  %v973_v42 = vadd.f32 %v1625_v26, %v934_v24  ;;  %v974_v45 = vadd.f32 %v1625_v26, %v935_v30 }
 0x15f   : > { %v1002_v40 = vmax.f32 %v970_v29, 0.0  ;;  %v940_v43 = vld [vmem:[#allocation2 + $0x98] sm:$0xff]  ;;  %1030 = vst [vmem:[%s1592_s29 + $0x90] sm:$0xff] %v998_v33  ;;  %1031 = vst [vmem:[%s1592_s29 + $0x98] sm:$0xff] %v999_v34  ;;  %v1003_v44 = vmax.f32 %v971_v36, 0.0  ;;  %v975_v46 = vadd.f32 %v1625_v26, %v936_v31  ;;  %v976_v47 = vadd.f32 %v1625_v26, %v937_v32 }
 0x160   : > { %1032 = vst [vmem:[%s1592_s29 + $0xa0] sm:$0xff] %v1000_v35  ;;  %1033 = vst [vmem:[%s1592_s29 + $0xa8] sm:$0xff] %v1001_v39  ;;  %v1004_v48 = vmax.f32 %v972_v41, 0.0  ;;  %v1005_v49 = vmax.f32 %v973_v42, 0.0  ;;  %v977_v50 = vadd.f32 %v1625_v26, %v938_v37  ;;  %v978_v51 = vadd.f32 %v1625_v26, %v939_v38 }
 0x161   : > { %1034 = vst [vmem:[%s1592_s29 + $0xb0] sm:$0xff] %v1002_v40  ;;  %1035 = vst [vmem:[%s1592_s29 + $0xb8] sm:$0xff] %v1003_v44  ;;  %v1006_v52 = vmax.f32 %v974_v45, 0.0  ;;  %v1007_v53 = vmax.f32 %v975_v46, 0.0  ;;  %v1008_v54 = vmax.f32 %v976_v47, 0.0  ;;  %v979_v55 = vadd.f32 %v1625_v26, %v940_v43 }
 0x162   : > { %1036 = vst [vmem:[%s1592_s29 + $0xc0] sm:$0xff] %v1004_v48  ;;  %1037 = vst [vmem:[%s1592_s29 + $0xc8] sm:$0xff] %v1005_v49  ;;  %v1009_v56 = vmax.f32 %v977_v50, 0.0  ;;  %v1010_v57 = vmax.f32 %v978_v51, 0.0 }
 0x163   : > { %1038 = vst [vmem:[%s1592_s29 + $0xd0] sm:$0xff] %v1006_v52  ;;  %1039 = vst [vmem:[%s1592_s29 + $0xd8] sm:$0xff] %v1007_v53  ;;  %v1011_v58 = vmax.f32 %v979_v55, 0.0 }
 0x164   : > { %1040 = vst [vmem:[%s1592_s29 + $0xe0] sm:$0xff] %v1008_v54  ;;  %1041 = vst [vmem:[%s1592_s29 + $0xe8] sm:$0xff] %v1009_v56 }
 0x165   : > { %1042 = vst [vmem:[%s1592_s29 + $0xf0] sm:$0xff] %v1010_v57  ;;  %1043 = vst [vmem:[%s1592_s29 + $0xf8] sm:$0xff] %v1011_v58 }
 0x166 PF: > { %s13_s18 = sadd.s32 1, %s1428_s18   ;;  %s1716_s12 = smov %s1408_s13 }
 0x167   : > { %p10_p0 = scmp.ge.s32.totalorder %s13_s18, 8   ;;  %s1717_s13 = smov %s1502_s25 }
 0x168   : > { %s1718_s14 = smov %s1420_s16  ;;  %s1719_s15 = smov %s1424_s17 }
 0x169   : > { %s1720_s16 = smov %s1723_s19  ;;  %s1721_s17 = smov %s1727_s20 }
 0x16a   :  { %12 = sbr.rel (!%p10_p0) target bundleno = 4 (0x4), region = 122 }

// kernel: nc_net_forward.14
= control target key start
LH: loop header
LB: loop body
LE: loop exit
PB: predicated region body
PF: predicated region fallthrough
CT: control target
= control target key end

     0   :  { %s1375_s15 = smov 0   ;;  %s1377_s16 = smov 0   ;;  %s1756_s0 = inlined_call_operand.vmem [shape: f32[2,256,16], index: 0, kind: input, shape index: {}]   ;;  %s1757_s1 = inlined_call_operand.vmem [shape: f32[2,1,16], index: 1, kind: input, shape index: {}]   ;;  %s1758_s2 = inlined_call_operand.vmem [shape: f32[16,16], index: 2, kind: input, shape index: {}]   ;;  %s1759_s3 = inlined_call_operand.vmem [shape: f32[1,16], index: 3, kind: input, shape index: {}]   ;;  %s1760_s4 = inlined_call_operand.vmem [shape: f32[2,256,16], index: 4, kind: output, shape index: {}]  }
   0x1   :  { %s1379_s17 = smov 0  }
   0x2 LB: > { %s26_s18 = sadd.s32 1, %s1344_s16  ;;  %p1009_p0 = scmp.ge.s32.totalorder %s1348_s17, 1  ;;  %s1348_s17 = sphi %s1379_s17, %s14_s17   ;;  %s1344_s16 = sphi %s1377_s16, %s1762_s16   ;;  %s1340_s15 = sphi %s1375_s15, %s1761_s15  }
   0x3   : > { %p28_p1 = scmp.ge.s32.totalorder %s26_s18, 2  ;;  %p191_p2 = scmp.lt.s32.totalorder %s1348_s17, 3 }
   0x5   : > { %s1764_s18 = smov (%p28_p1, %s26_s18), 0  ;;  %p192_p3 = pnand %p1009_p0, %p191_p2 }
   0x6   : > { %p229_p4 = scmp.lt.s32.totalorder (!%p192_p3), %s1340_s15, 1 }
   0x7   : > { %195 = sbr.rel (%p192_p3) target bundleno = 297 (0x129), region = 36 }
   0xc   : > { %v284_v0 = vld [vmem:[%s1758_s2 + $0x8] sm:$0xff]  ;;  %v283_v1 = vld [vmem:[%s1758_s2] sm:$0xff]  ;;  %s1766_s15 = smov (!%p229_p4, %s1340_s15), 1  ;;  %vm292_vm0 = vcmask 130048  }
   0xd   : > { %1118 = vmatprep.subr.mxu0 %v284_v0  ;;  %1170 = vmatprep.subr.mxu1 %v284_v0  ;;  %s1082_s23 = sshll.u32 %s1766_s15, 8  ;;  %v1572_v34 = vld [vmem:[%s1759_s3] ss:$0 sm:$0xff]  ;;  %s240_s5 = scalar_lea.vmem %s1757_s1, %s1766_s15 }
   0xe   : > { %1119 = vmatpush3.msra.mxu0 %v284_v0  ;;  %1172 = vmatpush3.msra.mxu1 %v284_v0  ;;  %s1407_s26 = scalar_lea.vmem %s1756_s0, %s1082_s23  ;;  %s1613_s8 = scalar_lea.vmem %s1760_s4, %s1082_s23 }
   0xf   : > { %1120 = vmatprep.subr.mxu0 %v283_v1  ;;  %1171 = vmatprep.subr.mxu1 %v283_v1  ;;  %v1410_v2 = vld [vmem:[%s1407_s26] sm:$0xff]  ;;  %v1416_v4 = vld [vmem:[%s1407_s26 + $0x8] sm:$0xff]  ;;  %v1426_v6 = vld [vmem:[%s1407_s26 + $0x10] sm:$0xff] }
  0x10   : > { %1121 = vmatpush3.msra.mxu0 %v283_v1  ;;  %1173 = vmatpush3.msra.mxu1 %v283_v1  ;;  %v1413_v3 = vld [vmem:[%s1407_s26 + $0x80] sm:$0xff]  ;;  %v1423_v5 = vld [vmem:[%s1407_s26 + $0x88] sm:$0xff]  ;;  %v1429_v7 = vld [vmem:[%s1407_s26 + $0x90] sm:$0xff] }
  0x11   : > { %1122 = vmatprep.mubr.msk.f32.mxu0 %vm292_vm0, %v1410_v2  ;;  %1146 = vmatprep.mubr.msk.f32.mxu1 %vm292_vm0, %v1413_v3  ;;  %v1440_v8 = vld [vmem:[%s1407_s26 + $0x18] sm:$0xff]  ;;  %v1446_v10 = vld [vmem:[%s1407_s26 + $0x20] sm:$0xff]  ;;  %v1460_v12 = vld [vmem:[%s1407_s26 + $0x28] sm:$0xff] }
  0x12   : > { %1123 = vmatmul.mubr.msk.f32.vlgmr.msra.gmra.mxu0 %vm292_vm0, %v1416_v4  ;;  %1147 = vmatmul.mubr.msk.f32.vlgmr.msra.gmra.mxu1 %vm292_vm0, %v1423_v5  ;;  %v1443_v9 = vld [vmem:[%s1407_s26 + $0x98] sm:$0xff]  ;;  %v1449_v11 = vld [vmem:[%s1407_s26 + $0xa0] sm:$0xff]  ;;  %v1463_v13 = vld [vmem:[%s1407_s26 + $0xa8] sm:$0xff] }
  0x13   : > { %1125 = vmatprep.mubr.msk.f32.mxu0 %vm292_vm0, %v1426_v6  ;;  %1149 = vmatprep.mubr.msk.f32.mxu1 %vm292_vm0, %v1429_v7  ;;  %v1466_v14 = vld [vmem:[%s1407_s26 + $0x30] sm:$0xff]  ;;  %v1480_v16 = vld [vmem:[%s1407_s26 + $0x38] sm:$0xff]  ;;  %v1486_v18 = vld [vmem:[%s1407_s26 + $0x40] sm:$0xff] }
  0x14   : > { %v1469_v15 = vld [vmem:[%s1407_s26 + $0xb0] sm:$0xff]  ;;  %v1483_v17 = vld [vmem:[%s1407_s26 + $0xb8] sm:$0xff]  ;;  %v1489_v19 = vld [vmem:[%s1407_s26 + $0xc0] sm:$0xff] }
  0x15   : > { %v1500_v20 = vld [vmem:[%s1407_s26 + $0x48] sm:$0xff]  ;;  %v1506_v22 = vld [vmem:[%s1407_s26 + $0x50] sm:$0xff]  ;;  %v1520_v24 = vld [vmem:[%s1407_s26 + $0x58] sm:$0xff] }
  0x16   : > { %1126 = vmatmul.mubr.msk.f32.gmra.mxu0 %vm292_vm0, %v1440_v8  ;;  %1150 = vmatmul.mubr.msk.f32.gmra.mxu1 %vm292_vm0, %v1443_v9  ;;  %v1503_v21 = vld [vmem:[%s1407_s26 + $0xc8] sm:$0xff]  ;;  %v1509_v23 = vld [vmem:[%s1407_s26 + $0xd0] sm:$0xff]  ;;  %v1523_v25 = vld [vmem:[%s1407_s26 + $0xd8] sm:$0xff] }
  0x17   : > { %1128 = vmatprep.mubr.msk.f32.mxu0 %vm292_vm0, %v1446_v10  ;;  %1152 = vmatprep.mubr.msk.f32.mxu1 %vm292_vm0, %v1449_v11  ;;  %v1526_v26 = vld [vmem:[%s1407_s26 + $0x60] sm:$0xff]  ;;  %v1540_v28 = vld [vmem:[%s1407_s26 + $0x68] sm:$0xff]  ;;  %v1546_v30 = vld [vmem:[%s1407_s26 + $0x70] sm:$0xff] }
  0x18   : > { %v1529_v27 = vld [vmem:[%s1407_s26 + $0xe0] sm:$0xff]  ;;  %v1543_v29 = vld [vmem:[%s1407_s26 + $0xe8] sm:$0xff]  ;;  %v1549_v31 = vld [vmem:[%s1407_s26 + $0xf0] sm:$0xff] }
  0x19   : > { %v1560_v32 = vld [vmem:[%s1407_s26 + $0x78] sm:$0xff] }
  0x1a   : > { %1129 = vmatmul.mubr.msk.f32.gmra.mxu0 %vm292_vm0, %v1460_v12  ;;  %1153 = vmatmul.mubr.msk.f32.gmra.mxu1 %vm292_vm0, %v1463_v13  ;;  %v1563_v33 = vld [vmem:[%s1407_s26 + $0xf8] sm:$0xff] }
  0x1b   : > { %1131 = vmatprep.mubr.msk.f32.mxu0 %vm292_vm0, %v1466_v14  ;;  %1155 = vmatprep.mubr.msk.f32.mxu1 %vm292_vm0, %v1469_v15 }
  0x1e   : > { %1132 = vmatmul.mubr.msk.f32.gmra.mxu0 %vm292_vm0, %v1480_v16  ;;  %1156 = vmatmul.mubr.msk.f32.gmra.mxu1 %vm292_vm0, %v1483_v17 }
  0x1f   : > { %1134 = vmatprep.mubr.msk.f32.mxu0 %vm292_vm0, %v1486_v18  ;;  %1158 = vmatprep.mubr.msk.f32.mxu1 %vm292_vm0, %v1489_v19 }
  0x22   : > { %1135 = vmatmul.mubr.msk.f32.gmra.mxu0 %vm292_vm0, %v1500_v20  ;;  %1159 = vmatmul.mubr.msk.f32.gmra.mxu1 %vm292_vm0, %v1503_v21 }
  0x23   : > { %1137 = vmatprep.mubr.msk.f32.mxu0 %vm292_vm0, %v1506_v22  ;;  %1161 = vmatprep.mubr.msk.f32.mxu1 %vm292_vm0, %v1509_v23 }
  0x26   : > { %1138 = vmatmul.mubr.msk.f32.gmra.mxu0 %vm292_vm0, %v1520_v24  ;;  %1162 = vmatmul.mubr.msk.f32.gmra.mxu1 %vm292_vm0, %v1523_v25 }
  0x27   : > { %1140 = vmatprep.mubr.msk.f32.mxu0 %vm292_vm0, %v1526_v26  ;;  %1164 = vmatprep.mubr.msk.f32.mxu1 %vm292_vm0, %v1529_v27 }
  0x2a   : > { %1141 = vmatmul.mubr.msk.f32.gmra.mxu0 %vm292_vm0, %v1540_v28  ;;  %1165 = vmatmul.mubr.msk.f32.gmra.mxu1 %vm292_vm0, %v1543_v29 }
  0x2b   : > { %1143 = vmatprep.mubr.msk.f32.mxu0 %vm292_vm0, %v1546_v30  ;;  %1167 = vmatprep.mubr.msk.f32.mxu1 %vm292_vm0, %v1549_v31 }
  0x2e   : > { %1144 = vmatmul.mubr.msk.f32.gmra.mxu0 %vm292_vm0, %v1560_v32  ;;  %1168 = vmatmul.mubr.msk.f32.gmra.mxu1 %vm292_vm0, %v1563_v33 }
  0xd2   : > { %v1124_v35 = vpop.f32.mrf.mxu0  ;;  %v1148_v36 = vpop.f32.mrf.mxu1 }
  0xd3   : > { %v461_v37 = vadd.f32 %v1124_v35, %v1572_v34  ;;  %v541_v38 = vadd.f32 %v1148_v36, %v1572_v34 }
  0xd4   : > { %v455_v39 = vpop.f32.mrf.mxu0  ;;  %v535_v40 = vpop.f32.mrf.mxu1 }
  0xd5   : > { %v1048_v41 = vmul.f32 -1.442695, %v461_v37  ;;  %v1064_v42 = vmul.f32 -1.442695, %v541_v38  ;;  %v456_v43 = vadd.f32 %v1572_v34, %v455_v39  ;;  %v536_v44 = vadd.f32 %v1572_v34, %v535_v40 }
  0xd6   : > { %v1127_v45 = vpop.f32.mrf.mxu0  ;;  %v1151_v46 = vpop.f32.mrf.mxu1 }
  0xd7   : > { %1198 = vpow2.f32 %v1048_v41  ;;  %v1047_v47 = vmul.f32 -1.442695, %v456_v43  ;;  %v1063_v48 = vmul.f32 -1.442695, %v536_v44  ;;  %v471_v49 = vadd.f32 %v1127_v45, %v1572_v34 }
  0xd8   : > { %1200 = vpow2.f32 %v1064_v42  ;;  %v551_v50 = vadd.f32 %v1151_v46, %v1572_v34  ;;  %v465_v51 = vpop.f32.mrf.mxu0  ;;  %v545_v52 = vpop.f32.mrf.mxu1 }
  0xd9   : > { %1202 = vpow2.f32 %v1047_v47  ;;  %v1050_v53 = vmul.f32 -1.442695, %v471_v49  ;;  %v466_v54 = vadd.f32 %v1572_v34, %v465_v51  ;;  %v546_v55 = vadd.f32 %v1572_v34, %v545_v52 }
  0xda   : > { %1204 = vpow2.f32 %v1063_v48  ;;  %v1066_v56 = vmul.f32 -1.442695, %v551_v50  ;;  %v1130_v57 = vpop.f32.mrf.mxu0  ;;  %v1154_v58 = vpop.f32.mrf.mxu1 }
  0xdb   : > { %1206 = vpow2.f32 %v1050_v53  ;;  %v1049_v59 = vmul.f32 -1.442695, %v466_v54  ;;  %v1065_v60 = vmul.f32 -1.442695, %v546_v55  ;;  %v481_v61 = vadd.f32 %v1130_v57, %v1572_v34 }
  0xdc   : > { %1208 = vpow2.f32 %v1066_v56  ;;  %v561_v62 = vadd.f32 %v1154_v58, %v1572_v34  ;;  %v475_v63 = vpop.f32.mrf.mxu0  ;;  %v555_v0 = vpop.f32.mrf.mxu1 }
  0xdd   : > { %1210 = vpow2.f32 %v1049_v59  ;;  %v1052_v1 = vmul.f32 -1.442695, %v481_v61  ;;  %v476_v35 = vadd.f32 %v1572_v34, %v475_v63  ;;  %v556_v36 = vadd.f32 %v1572_v34, %v555_v0 }
  0xde   : > { %1212 = vpow2.f32 %v1065_v60  ;;  %v1068_v37 = vmul.f32 -1.442695, %v561_v62  ;;  %v1133_v38 = vpop.f32.mrf.mxu0  ;;  %v1157_v39 = vpop.f32.mrf.mxu1 }
  0xdf   : > { %1214 = vpow2.f32 %v1052_v1  ;;  %v1051_v40 = vmul.f32 -1.442695, %v476_v35  ;;  %v1067_v41 = vmul.f32 -1.442695, %v556_v36  ;;  %v491_v42 = vadd.f32 %v1133_v38, %v1572_v34 }
  0xe0   : > { %1216 = vpow2.f32 %v1068_v37  ;;  %v571_v43 = vadd.f32 %v1157_v39, %v1572_v34  ;;  %v485_v44 = vpop.f32.mrf.mxu0  ;;  %v565_v45 = vpop.f32.mrf.mxu1 }
  0xe1   : > { %1218 = vpow2.f32 %v1051_v40  ;;  %v1054_v46 = vmul.f32 -1.442695, %v491_v42  ;;  %v486_v47 = vadd.f32 %v1572_v34, %v485_v44  ;;  %v566_v48 = vadd.f32 %v1572_v34, %v565_v45 }
  0xe2   : > { %1220 = vpow2.f32 %v1067_v41  ;;  %v1070_v49 = vmul.f32 -1.442695, %v571_v43  ;;  %v1136_v50 = vpop.f32.mrf.mxu0  ;;  %v1160_v51 = vpop.f32.mrf.mxu1 }
  0xe3   : > { %1222 = vpow2.f32 %v1054_v46  ;;  %v1053_v52 = vmul.f32 -1.442695, %v486_v47  ;;  %v1069_v53 = vmul.f32 -1.442695, %v566_v48  ;;  %v501_v40 = vadd.f32 %v1136_v50, %v1572_v34 }
  0xe4   : > { %v1199_v54 = vpop.eup %1198  ;;  %1224 = vpow2.f32 %v1070_v49  ;;  %v495_v55 = vpop.f32.mrf.mxu0  ;;  %v581_v47 = vadd.f32 %v1160_v51, %v1572_v34 }
  0xe5   : > { %v575_v56 = vpop.f32.mrf.mxu1  ;;  %v1201_v57 = vpop.eup %1200  ;;  %v711_v58 = vadd.f32 1.0, %v1199_v54  ;;  %1226 = vpow2.f32 %v1053_v52  ;;  %v496_v52 = vadd.f32 %v1572_v34, %v495_v55  ;;  %v1056_v50 = vmul.f32 -1.442695, %v501_v40 }
  0xe6   : > { %v1203_v59 = vpop.eup %1202  ;;  %v727_v60 = vadd.f32 1.0, %v1201_v57  ;;  %1228 = vpow2.f32 %v1069_v53  ;;  %v1139_v61 = vpop.f32.mrf.mxu0 }
  0xe7   : > { %v1205_v62 = vpop.eup %1204  ;;  %1230 = vrcp.f32 %v711_v58  ;;  %v710_v63 = vadd.f32 1.0, %v1203_v59  ;;  %v1163_v0 = vpop.f32.mrf.mxu1  ;;  %v511_v51 = vadd.f32 %v1139_v61, %v1572_v34 }
  0xe8   : > { %v1207_v1 = vpop.eup %1206  ;;  %1232 = vrcp.f32 %v727_v60  ;;  %v726_v35 = vadd.f32 1.0, %v1205_v62  ;;  %v505_v41 = vpop.f32.mrf.mxu0  ;;  %v576_v60 = vadd.f32 %v1572_v34, %v575_v56 }
  0xe9   : > { %v1209_v36 = vpop.eup %1208  ;;  %1234 = vrcp.f32 %v710_v63  ;;  %v713_v37 = vadd.f32 1.0, %v1207_v1  ;;  %v585_v44 = vpop.f32.mrf.mxu1  ;;  %v1072_v1 = vmul.f32 -1.442695, %v581_v47 }
  0xea   : > { %v1211_v38 = vpop.eup %1210  ;;  %1236 = vrcp.f32 %v726_v35  ;;  %v729_v39 = vadd.f32 1.0, %v1209_v36  ;;  %v1142_v57 = vpop.f32.mrf.mxu0  ;;  %v591_v35 = vadd.f32 %v1163_v0, %v1572_v34  ;;  %v586_v61 = vadd.f32 %v1572_v34, %v585_v44 }
  0xeb   : > { %v1213_v42 = vpop.eup %1212  ;;  %1238 = vrcp.f32 %v713_v37  ;;  %v712_v43 = vadd.f32 1.0, %v1211_v38  ;;  %v1166_v62 = vpop.f32.mrf.mxu1  ;;  %v1055_v38 = vmul.f32 -1.442695, %v496_v52  ;;  %v1071_v47 = vmul.f32 -1.442695, %v576_v60 }
  0xec   : > { %v1215_v45 = vpop.eup %1214  ;;  %1240 = vrcp.f32 %v729_v39  ;;  %v728_v46 = vadd.f32 1.0, %v1213_v42  ;;  %v506_v39 = vadd.f32 %v1572_v34, %v505_v41  ;;  %v1601_v42 = vld [vmem:[%s240_s5] ss:$0 sm:$0xff] }
  0xed   : > { %v1217_v48 = vpop.eup %1216  ;;  %1242 = vrcp.f32 %v712_v43  ;;  %v715_v49 = vadd.f32 1.0, %v1215_v45  ;;  %v521_v43 = vadd.f32 %v1142_v57, %v1572_v34  ;;  %v515_v45 = vpop.f32.mrf.mxu0 }
  0xee   : > { %v1219_v53 = vpop.eup %1218  ;;  %1244 = vrcp.f32 %v728_v46  ;;  %v731_v54 = vadd.f32 1.0, %v1217_v48  ;;  %v1058_v48 = vmul.f32 -1.442695, %v511_v51  ;;  %v1057_v44 = vmul.f32 -1.442695, %v506_v39 }
  0xef   : > { %v1221_v58 = vpop.eup %1220  ;;  %1246 = vrcp.f32 %v715_v49  ;;  %v714_v59 = vadd.f32 1.0, %v1219_v53  ;;  %v595_v49 = vpop.f32.mrf.mxu1  ;;  %v1074_v53 = vmul.f32 -1.442695, %v591_v35  ;;  %v516_v57 = vadd.f32 %v1572_v34, %v515_v45 }
  0xf0   : > { %v1223_v63 = vpop.eup %1222  ;;  %1248 = vrcp.f32 %v731_v54  ;;  %v730_v55 = vadd.f32 1.0, %v1221_v58  ;;  %v601_v54 = vadd.f32 %v1166_v62, %v1572_v34  ;;  %v1073_v51 = vmul.f32 -1.442695, %v586_v61 }
  0xf1   : > { %v1225_v36 = vpop.eup %1224  ;;  %1250 = vrcp.f32 %v714_v59  ;;  %v717_v37 = vadd.f32 1.0, %v1223_v63  ;;  %v1060_v62 = vmul.f32 -1.442695, %v521_v43  ;;  %v596_v39 = vadd.f32 %v1572_v34, %v595_v49 }
  0xf2   : > { %v1227_v40 = vpop.eup %1226  ;;  %1252 = vrcp.f32 %v730_v55  ;;  %v733_v56 = vadd.f32 1.0, %v1225_v36  ;;  %v1145_v55 = vpop.f32.mrf.mxu0  ;;  %v1076_v61 = vmul.f32 -1.442695, %v601_v54 }
  0xf3   : > { %v1229_v46 = vpop.eup %1228  ;;  %1254 = vrcp.f32 %v717_v37  ;;  %v716_v0 = vadd.f32 1.0, %v1227_v40  ;;  %v1169_v40 = vpop.f32.mrf.mxu1 }
  0xf4   : > { %v1231_v52 = vpop.eup %1230  ;;  %1256 = vrcp.f32 %v733_v56  ;;  %v732_v41 = vadd.f32 1.0, %v1229_v46 }
  0xf5   : > { %v1233_v58 = vpop.eup %1232  ;;  %v814_v59 = vadd.f32 %v1231_v52, %v1601_v42  ;;  %1258 = vrcp.f32 %v716_v0 }
  0xf6   : > { %v1235_v63 = vpop.eup %1234  ;;  %v830_v60 = vadd.f32 %v1233_v58, %v1601_v42  ;;  %1260 = vrcp.f32 %v732_v41  ;;  %v525_v41 = vpop.f32.mrf.mxu0  ;;  %v1075_v58 = vmul.f32 -1.442695, %v596_v39 }
  0xf7   : > { %v1237_v35 = vpop.eup %1236  ;;  %v846_v36 = vmul.f32 %v814_v59, %v1416_v4  ;;  %v813_v37 = vadd.f32 %v1235_v63, %v1601_v42  ;;  %1262 = vpow2.f32 %v1056_v50  ;;  %v1059_v50 = vmul.f32 -1.442695, %v516_v57  ;;  %v605_v59 = vpop.f32.mrf.mxu1 }
  0xf8   : > { %v1239_v56 = vpop.eup %1238  ;;  %v862_v45 = vmul.f32 %v830_v60, %v1423_v5  ;;  %v829_v46 = vadd.f32 %v1237_v35, %v1601_v42  ;;  %1264 = vpow2.f32 %v1072_v1  ;;  %v531_v1 = vadd.f32 %v1145_v55, %v1572_v34 }
  0xf9   : > { %v1241_v43 = vpop.eup %1240  ;;  %878 = vst.msk [vmem:[%s1613_s8 + $0x8] sm:$0xff] %vm292_vm0, %v846_v36  ;;  %v845_v4 = vmul.f32 %v813_v37, %v1410_v2  ;;  %v816_v0 = vadd.f32 %v1239_v56, %v1601_v42  ;;  %1266 = vpow2.f32 %v1055_v38  ;;  %v611_v63 = vadd.f32 %v1169_v40, %v1572_v34 }
  0xfa   : > { %v1243_v49 = vpop.eup %1242  ;;  %894 = vst.msk [vmem:[%s1613_s8 + $0x88] sm:$0xff] %vm292_vm0, %v862_v45  ;;  %v861_v5 = vmul.f32 %v829_v46, %v1413_v3  ;;  %v832_v52 = vadd.f32 %v1241_v43, %v1601_v42  ;;  %1268 = vpow2.f32 %v1071_v47  ;;  %v526_v55 = vadd.f32 %v1572_v34, %v525_v41 }
  0xfb   : > { %v1245_v54 = vpop.eup %1244  ;;  %877 = vst.msk [vmem:[%s1613_s8] sm:$0xff] %vm292_vm0, %v845_v4  ;;  %v848_v2 = vmul.f32 %v816_v0, %v1440_v8  ;;  %v815_v38 = vadd.f32 %v1243_v49, %v1601_v42  ;;  %1270 = vpow2.f32 %v1058_v48  ;;  %v606_v36 = vadd.f32 %v1572_v34, %v605_v59 }
  0xfc   : > { %v1247_v57 = vpop.eup %1246  ;;  %893 = vst.msk [vmem:[%s1613_s8 + $0x80] sm:$0xff] %vm292_vm0, %v861_v5  ;;  %v864_v3 = vmul.f32 %v832_v52, %v1443_v9  ;;  %v831_v47 = vadd.f32 %v1245_v54, %v1601_v42  ;;  %1272 = vpow2.f32 %v1074_v53  ;;  %v1062_v39 = vmul.f32 -1.442695, %v531_v1 }
  0xfd   : > { %v1249_v60 = vpop.eup %1248  ;;  %880 = vst.msk [vmem:[%s1613_s8 + $0x18] sm:$0xff] %vm292_vm0, %v848_v2  ;;  %v847_v8 = vmul.f32 %v815_v38, %v1426_v6  ;;  %v818_v48 = vadd.f32 %v1247_v57, %v1601_v42  ;;  %1274 = vpow2.f32 %v1057_v44  ;;  %v1078_v34 = vmul.f32 -1.442695, %v611_v63 }
  0xfe   : > { %v1251_v35 = vpop.eup %1250  ;;  %896 = vst.msk [vmem:[%s1613_s8 + $0x98] sm:$0xff] %vm292_vm0, %v864_v3  ;;  %v863_v9 = vmul.f32 %v831_v47, %v1429_v7  ;;  %v834_v53 = vadd.f32 %v1249_v60, %v1601_v42  ;;  %1276 = vpow2.f32 %v1073_v51 }
  0xff   : > { %v1253_v37 = vpop.eup %1252  ;;  %879 = vst.msk [vmem:[%s1613_s8 + $0x10] sm:$0xff] %vm292_vm0, %v847_v8  ;;  %v850_v6 = vmul.f32 %v818_v48, %v1460_v12  ;;  %v817_v44 = vadd.f32 %v1251_v35, %v1601_v42  ;;  %1278 = vpow2.f32 %v1060_v62  ;;  %v1061_v62 = vmul.f32 -1.442695, %v526_v55 }
 0x100   : > { %v1255_v40 = vpop.eup %1254  ;;  %895 = vst.msk [vmem:[%s1613_s8 + $0x90] sm:$0xff] %vm292_vm0, %v863_v9  ;;  %v866_v7 = vmul.f32 %v834_v53, %v1463_v13  ;;  %v833_v56 = vadd.f32 %v1253_v37, %v1601_v42  ;;  %1280 = vpow2.f32 %v1076_v61  ;;  %v1077_v61 = vmul.f32 -1.442695, %v606_v36 }
 0x101   : > { %v1257_v51 = vpop.eup %1256  ;;  %882 = vst.msk [vmem:[%s1613_s8 + $0x28] sm:$0xff] %vm292_vm0, %v850_v6  ;;  %v849_v12 = vmul.f32 %v817_v44, %v1446_v10  ;;  %v820_v45 = vadd.f32 %v1255_v40, %v1601_v42  ;;  %1282 = vpow2.f32 %v1059_v50 }
 0x102   : > { %v1259_v46 = vpop.eup %1258  ;;  %898 = vst.msk [vmem:[%s1613_s8 + $0xa8] sm:$0xff] %vm292_vm0, %v866_v7  ;;  %v865_v13 = vmul.f32 %v833_v56, %v1449_v11  ;;  %v836_v43 = vadd.f32 %v1257_v51, %v1601_v42  ;;  %1284 = vpow2.f32 %v1075_v58 }
 0x103   : > { %v1261_v4 = vpop.eup %1260  ;;  %881 = vst.msk [vmem:[%s1613_s8 + $0x20] sm:$0xff] %vm292_vm0, %v849_v12  ;;  %v852_v10 = vmul.f32 %v820_v45, %v1480_v16  ;;  %v819_v0 = vadd.f32 %v1259_v46, %v1601_v42  ;;  %1286 = vpow2.f32 %v1062_v39 }
 0x104   : > { %v1263_v50 = vpop.eup %1262  ;;  %897 = vst.msk [vmem:[%s1613_s8 + $0xa0] sm:$0xff] %vm292_vm0, %v865_v13  ;;  %v868_v49 = vmul.f32 %v836_v43, %v1483_v17  ;;  %v835_v11 = vadd.f32 %v1261_v4, %v1601_v42  ;;  %1288 = vpow2.f32 %v1078_v34 }
 0x105   : > { %v1265_v5 = vpop.eup %1264  ;;  %884 = vst.msk [vmem:[%s1613_s8 + $0x38] sm:$0xff] %vm292_vm0, %v852_v10  ;;  %v851_v52 = vmul.f32 %v819_v0, %v1466_v14  ;;  %v719_v1 = vadd.f32 1.0, %v1263_v50  ;;  %1290 = vpow2.f32 %v1061_v62 }
 0x106   : > { %v1267_v16 = vpop.eup %1266  ;;  %900 = vst.msk [vmem:[%s1613_s8 + $0xb8] sm:$0xff] %vm292_vm0, %v868_v49  ;;  %v867_v41 = vmul.f32 %v835_v11, %v1469_v15  ;;  %v735_v54 = vadd.f32 1.0, %v1265_v5  ;;  %1292 = vpow2.f32 %v1077_v61 }
 0x107   : > { %v1269_v2 = vpop.eup %1268  ;;  %883 = vst.msk [vmem:[%s1613_s8 + $0x30] sm:$0xff] %vm292_vm0, %v851_v52  ;;  %1294 = vrcp.f32 %v719_v1  ;;  %v718_v17 = vadd.f32 1.0, %v1267_v16 }
 0x108   : > { %v1271_v38 = vpop.eup %1270  ;;  %899 = vst.msk [vmem:[%s1613_s8 + $0xb0] sm:$0xff] %vm292_vm0, %v867_v41  ;;  %1296 = vrcp.f32 %v735_v54  ;;  %v734_v58 = vadd.f32 1.0, %v1269_v2 }
 0x109   : > { %v1273_v14 = vpop.eup %1272  ;;  %1298 = vrcp.f32 %v718_v17  ;;  %v721_v59 = vadd.f32 1.0, %v1271_v38 }
 0x10a   : > { %v1275_v57 = vpop.eup %1274  ;;  %1300 = vrcp.f32 %v734_v58  ;;  %v737_v3 = vadd.f32 1.0, %v1273_v14 }
 0x10b   : > { %v1277_v47 = vpop.eup %1276  ;;  %1302 = vrcp.f32 %v721_v59  ;;  %v720_v15 = vadd.f32 1.0, %v1275_v57 }
 0x10c   : > { %v1279_v63 = vpop.eup %1278  ;;  %1304 = vrcp.f32 %v737_v3  ;;  %v736_v60 = vadd.f32 1.0, %v1277_v47 }
 0x10d   : > { %v1281_v8 = vpop.eup %1280  ;;  %1306 = vrcp.f32 %v720_v15  ;;  %v723_v48 = vadd.f32 1.0, %v1279_v63 }
 0x10e   : > { %v1283_v55 = vpop.eup %1282  ;;  %1308 = vrcp.f32 %v736_v60  ;;  %v739_v35 = vadd.f32 1.0, %v1281_v8 }
 0x10f   : > { %v1285_v9 = vpop.eup %1284  ;;  %1310 = vrcp.f32 %v723_v48  ;;  %v722_v53 = vadd.f32 1.0, %v1283_v55 }
 0x110   : > { %v1287_v36 = vpop.eup %1286  ;;  %1312 = vrcp.f32 %v739_v35  ;;  %v738_v37 = vadd.f32 1.0, %v1285_v9 }
 0x111   : > { %v1289_v6 = vpop.eup %1288  ;;  %1314 = vrcp.f32 %v722_v53  ;;  %v725_v44 = vadd.f32 1.0, %v1287_v36 }
 0x112   : > { %v1291_v39 = vpop.eup %1290  ;;  %1316 = vrcp.f32 %v738_v37  ;;  %v741_v40 = vadd.f32 1.0, %v1289_v6 }
 0x113   : > { %v1293_v7 = vpop.eup %1292  ;;  %1318 = vrcp.f32 %v725_v44  ;;  %v724_v56 = vadd.f32 1.0, %v1291_v39 }
 0x114   : > { %v1295_v34 = vpop.eup %1294  ;;  %1320 = vrcp.f32 %v741_v40  ;;  %v740_v51 = vadd.f32 1.0, %v1293_v7 }
 0x115   : > { %v1297_v12 = vpop.eup %1296  ;;  %v822_v45 = vadd.f32 %v1295_v34, %v1601_v42  ;;  %1322 = vrcp.f32 %v724_v56 }
 0x116   : > { %v1299_v62 = vpop.eup %1298  ;;  %v838_v46 = vadd.f32 %v1297_v12, %v1601_v42  ;;  %1324 = vrcp.f32 %v740_v51 }
 0x117   : > { %v1301_v13 = vpop.eup %1300  ;;  %v854_v43 = vmul.f32 %v822_v45, %v1500_v20  ;;  %v821_v61 = vadd.f32 %v1299_v62, %v1601_v42 }
 0x118   : > { %v1303_v4 = vpop.eup %1302  ;;  %v870_v10 = vmul.f32 %v838_v46, %v1503_v21  ;;  %v837_v0 = vadd.f32 %v1301_v13, %v1601_v42 }
 0x119   : > { %v1305_v50 = vpop.eup %1304  ;;  %886 = vst.msk [vmem:[%s1613_s8 + $0x48] sm:$0xff] %vm292_vm0, %v854_v43  ;;  %v853_v49 = vmul.f32 %v821_v61, %v1486_v18  ;;  %v824_v11 = vadd.f32 %v1303_v4, %v1601_v42 }
 0x11a   : > { %v1307_v5 = vpop.eup %1306  ;;  %902 = vst.msk [vmem:[%s1613_s8 + $0xc8] sm:$0xff] %vm292_vm0, %v870_v10  ;;  %v869_v20 = vmul.f32 %v837_v0, %v1489_v19  ;;  %v840_v52 = vadd.f32 %v1305_v50, %v1601_v42 }
 0x11b   : > { %v1309_v1 = vpop.eup %1308  ;;  %885 = vst.msk [vmem:[%s1613_s8 + $0x40] sm:$0xff] %vm292_vm0, %v853_v49  ;;  %v856_v21 = vmul.f32 %v824_v11, %v1520_v24  ;;  %v823_v16 = vadd.f32 %v1307_v5, %v1601_v42 }
 0x11c   : > { %v1311_v41 = vpop.eup %1310  ;;  %901 = vst.msk [vmem:[%s1613_s8 + $0xc0] sm:$0xff] %vm292_vm0, %v869_v20  ;;  %v872_v18 = vmul.f32 %v840_v52, %v1523_v25  ;;  %v839_v54 = vadd.f32 %v1309_v1, %v1601_v42 }
 0x11d   : > { %v1313_v2 = vpop.eup %1312  ;;  %888 = vst.msk [vmem:[%s1613_s8 + $0x58] sm:$0xff] %vm292_vm0, %v856_v21  ;;  %v855_v19 = vmul.f32 %v823_v16, %v1506_v22  ;;  %v826_v17 = vadd.f32 %v1311_v41, %v1601_v42 }
 0x11e   : > { %v1315_v38 = vpop.eup %1314  ;;  %904 = vst.msk [vmem:[%s1613_s8 + $0xd8] sm:$0xff] %vm292_vm0, %v872_v18  ;;  %v871_v24 = vmul.f32 %v839_v54, %v1509_v23  ;;  %v842_v58 = vadd.f32 %v1313_v2, %v1601_v42 }
 0x11f   : > { %v1317_v14 = vpop.eup %1316  ;;  %887 = vst.msk [vmem:[%s1613_s8 + $0x50] sm:$0xff] %vm292_vm0, %v855_v19  ;;  %v858_v25 = vmul.f32 %v826_v17, %v1540_v28  ;;  %v825_v59 = vadd.f32 %v1315_v38, %v1601_v42 }
 0x120   : > { %v1319_v57 = vpop.eup %1318  ;;  %903 = vst.msk [vmem:[%s1613_s8 + $0xd0] sm:$0xff] %vm292_vm0, %v871_v24  ;;  %v874_v22 = vmul.f32 %v842_v58, %v1543_v29  ;;  %v841_v3 = vadd.f32 %v1317_v14, %v1601_v42 }
 0x121   : > { %v1321_v23 = vpop.eup %1320  ;;  %890 = vst.msk [vmem:[%s1613_s8 + $0x68] sm:$0xff] %vm292_vm0, %v858_v25  ;;  %v857_v47 = vmul.f32 %v825_v59, %v1526_v26  ;;  %v828_v15 = vadd.f32 %v1319_v57, %v1601_v42 }
 0x122   : > { %v1323_v28 = vpop.eup %1322  ;;  %906 = vst.msk [vmem:[%s1613_s8 + $0xe8] sm:$0xff] %vm292_vm0, %v874_v22  ;;  %v873_v63 = vmul.f32 %v841_v3, %v1529_v27  ;;  %v844_v29 = vadd.f32 %v1321_v23, %v1601_v42 }
 0x123   : > { %v1325_v60 = vpop.eup %1324  ;;  %889 = vst.msk [vmem:[%s1613_s8 + $0x60] sm:$0xff] %vm292_vm0, %v857_v47  ;;  %v860_v8 = vmul.f32 %v828_v15, %v1560_v32  ;;  %v827_v48 = vadd.f32 %v1323_v28, %v1601_v42 }
 0x124   : > { %905 = vst.msk [vmem:[%s1613_s8 + $0xe0] sm:$0xff] %vm292_vm0, %v873_v63  ;;  %v876_v26 = vmul.f32 %v844_v29, %v1563_v33  ;;  %v843_v55 = vadd.f32 %v1325_v60, %v1601_v42 }
 0x125   : > { %892 = vst.msk [vmem:[%s1613_s8 + $0x78] sm:$0xff] %vm292_vm0, %v860_v8  ;;  %v859_v35 = vmul.f32 %v827_v48, %v1546_v30 }
 0x126   : > { %908 = vst.msk [vmem:[%s1613_s8 + $0xf8] sm:$0xff] %vm292_vm0, %v876_v26  ;;  %v875_v27 = vmul.f32 %v843_v55, %v1549_v31 }
 0x127   : > { %891 = vst.msk [vmem:[%s1613_s8 + $0x70] sm:$0xff] %vm292_vm0, %v859_v35 }
 0x128   : > { %907 = vst.msk [vmem:[%s1613_s8 + $0xf0] sm:$0xff] %vm292_vm0, %v875_v27 }
 0x129 PF: > { %s14_s17 = sadd.s32 1, %s1348_s17   ;;  %s1761_s15 = smov %s1344_s16 }
 0x12a   : > { %p11_p5 = scmp.ge.s32.totalorder %s14_s17, 4   ;;  %s1762_s16 = smov %s1764_s18 }
 0x12c   :  { %13 = sbr.rel (!%p11_p5) target bundleno = 2 (0x2), region = 69 }

// kernel: nc_net_forward.15
= control target key start
LH: loop header
LB: loop body
LE: loop exit
PB: predicated region body
PF: predicated region fallthrough
CT: control target
= control target key end

     0   :  { %s1425_s12 = smov 0   ;;  %s1427_s13 = smov 0   ;;  %s1618_s0 = inlined_call_operand.vmem [shape: bf16[512,256], index: 0, kind: input, shape index: {}]   ;;  %s1619_s1 = inlined_call_operand.vmem [shape: bf16[256,128], index: 1, kind: input, shape index: {}]   ;;  %s1620_s2 = inlined_call_operand.vmem [shape: f32[1,128], index: 2, kind: input, shape index: {}]   ;;  %s1621_s3 = inlined_call_operand.vmem [shape: f32[512,128], index: 3, kind: output, shape index: {}]  }
   0x1   :  { %s1429_s14 = smov 0  }
   0x2 LB: > { %s32_s15 = sadd.s32 1, %s1399_s13  ;;  %p1107_p0 = scmp.ge.s32.totalorder %s1403_s14, 1  ;;  %s1403_s14 = sphi %s1429_s14, %s13_s14   ;;  %s1399_s13 = sphi %s1427_s13, %s1623_s13   ;;  %s1395_s12 = sphi %s1425_s12, %s1622_s12  }
   0x3   : > { %p34_p1 = scmp.ge.s32.totalorder %s32_s15, 2  ;;  %p191_p2 = scmp.lt.s32.totalorder %s1403_s14, 3 }
   0x5   : > { %s1625_s15 = smov (%p34_p1, %s32_s15), 0  ;;  %p192_p3 = pnand %p1107_p0, %p191_p2 }
   0x6   : > { %s1108_s18 = sshll.u32 (!%p192_p3), %s1395_s12, 5 }
   0x7   : > { %195 = sbr.rel (%p192_p3) target bundleno = 305 (0x131), region = 32  ;;  %p236_p4 = scmp.lt.s32.totalorder (!%p192_p3), %s1108_s18, 63 }
   0xc   : > { %v1317_v0 = vld [vmem:[%s1619_s1 + $0x78] sm:$0xff]   ;;  %v1319_v2 = vld [vmem:[%s1619_s1 + $0x70] sm:$0xff]   ;;  %v1321_v4 = vld [vmem:[%s1619_s1 + $0x68] sm:$0xff]   ;;  %s1627_s18 = smov (!%p236_p4, %s1108_s18), 63 }
   0xd   : > { %v1318_v1 = vld [vmem:[%s1619_s1 + $0x38] sm:$0xff]   ;;  %1165 = vmatprep.subr.bf16.mxu0 %v1317_v0  ;;  %1277 = vmatprep.subr.bf16.mxu1 %v1317_v0  ;;  %v1320_v3 = vld [vmem:[%s1619_s1 + $0x30] sm:$0xff]   ;;  %v1322_v5 = vld [vmem:[%s1619_s1 + $0x28] sm:$0xff]   ;;  %s1164_s6 = sshll.u32 %s1627_s18, 3 }
   0xe   : > { %1166 = vmatpush3.bf16.msra.mxu0 %v1318_v1  ;;  %1285 = vmatpush3.bf16.msra.mxu1 %v1318_v1  ;;  %v1323_v6 = vld [vmem:[%s1619_s1 + $0x60] sm:$0xff]   ;;  %v1325_v8 = vld [vmem:[%s1619_s1 + $0x58] sm:$0xff]   ;;  %s1478_s11 = scalar_lea.vmem %s1618_s0, %s1164_s6  ;;  %v1327_v10 = vld [vmem:[%s1619_s1 + $0x50] sm:$0xff]   ;;  %s1543_s8 = scalar_lea.vmem %s1621_s3, %s1164_s6 }
   0xf   : > { %1167 = vmatprep.subr.bf16.mxu0 %v1319_v2  ;;  %1278 = vmatprep.subr.bf16.mxu1 %v1319_v2  ;;  %v1324_v7 = vld [vmem:[%s1619_s1 + $0x20] sm:$0xff]   ;;  %v1326_v9 = vld [vmem:[%s1619_s1 + $0x18] sm:$0xff]   ;;  %v1328_v13 = vld [vmem:[%s1619_s1 + $0x10] sm:$0xff]  }
  0x10   : > { %v1335_v11 = vld [vmem:[%s1478_s11 + $0x4] ss:$8 sps:$4 sm:$0xff]   ;;  %v1333_v18 = vld [vmem:[%s1478_s11] ss:$8 sps:$4 sm:$0xff]   ;;  %v1339_v20 = vld [vmem:[%s1478_s11 + $0x14] ss:$8 sps:$4 sm:$0xff]  }
  0x11   : > { %v1338_v12 = vld [vmem:[%s1478_s11 + $0x84] ss:$8 sps:$4 sm:$0xff]   ;;  %688 = vmatprep.mubr.bf16.mxu0 %v1335_v11  ;;  %v1336_v19 = vld [vmem:[%s1478_s11 + $0x80] ss:$8 sps:$4 sm:$0xff]   ;;  %v1341_v21 = vld [vmem:[%s1478_s11 + $0x94] ss:$8 sps:$4 sm:$0xff]  }
  0x12   : > { %1168 = vmatpush3.bf16.msra.mxu0 %v1320_v3  ;;  %1286 = vmatpush3.bf16.msra.mxu1 %v1320_v3  ;;  %v1329_v14 = vld [vmem:[%s1619_s1 + $0x48] sm:$0xff]   ;;  %v1331_v16 = vld [vmem:[%s1619_s1 + $0x40] sm:$0xff]   ;;  %v1343_v22 = vld [vmem:[%s1478_s11 + $0x10] ss:$8 sps:$4 sm:$0xff]  }
  0x13   : > { %1169 = vmatprep.subr.bf16.mxu0 %v1321_v4  ;;  %1279 = vmatprep.subr.bf16.mxu1 %v1321_v4  ;;  %v1330_v15 = vld [vmem:[%s1619_s1 + $0x8] sm:$0xff]   ;;  %v1332_v17 = vld [vmem:[%s1619_s1] sm:$0xff]   ;;  %v1344_v23 = vld [vmem:[%s1478_s11 + $0x90] ss:$8 sps:$4 sm:$0xff]  }
  0x14   : > { %752 = vmatprep.mubr.bf16.mxu1 %v1338_v12  ;;  %v1345_v24 = vld [vmem:[%s1478_s11 + $0x24] ss:$8 sps:$4 sm:$0xff]   ;;  %v1349_v26 = vld [vmem:[%s1478_s11 + $0x20] ss:$8 sps:$4 sm:$0xff]   ;;  %v1351_v28 = vld [vmem:[%s1478_s11 + $0x34] ss:$8 sps:$4 sm:$0xff]  }
  0x15   : > { %v1347_v25 = vld [vmem:[%s1478_s11 + $0xa4] ss:$8 sps:$4 sm:$0xff]   ;;  %v1350_v27 = vld [vmem:[%s1478_s11 + $0xa0] ss:$8 sps:$4 sm:$0xff]   ;;  %v1353_v29 = vld [vmem:[%s1478_s11 + $0xb4] ss:$8 sps:$4 sm:$0xff]  }
  0x16   : > { %1170 = vmatpush3.bf16.msra.mxu0 %v1322_v5  ;;  %1287 = vmatpush3.bf16.msra.mxu1 %v1322_v5  ;;  %v1355_v30 = vld [vmem:[%s1478_s11 + $0x30] ss:$8 sps:$4 sm:$0xff]   ;;  %v1357_v32 = vld [vmem:[%s1478_s11 + $0x44] ss:$8 sps:$4 sm:$0xff]   ;;  %v1361_v34 = vld [vmem:[%s1478_s11 + $0x40] ss:$8 sps:$4 sm:$0xff]  }
  0x17   : > { %1171 = vmatprep.subr.bf16.mxu0 %v1323_v6  ;;  %1280 = vmatprep.subr.bf16.mxu1 %v1323_v6  ;;  %v1356_v31 = vld [vmem:[%s1478_s11 + $0xb0] ss:$8 sps:$4 sm:$0xff]   ;;  %v1359_v33 = vld [vmem:[%s1478_s11 + $0xc4] ss:$8 sps:$4 sm:$0xff]   ;;  %v1362_v35 = vld [vmem:[%s1478_s11 + $0xc0] ss:$8 sps:$4 sm:$0xff]  }
  0x18   : > { %v1363_v36 = vld [vmem:[%s1478_s11 + $0x54] ss:$8 sps:$4 sm:$0xff]   ;;  %v1367_v38 = vld [vmem:[%s1478_s11 + $0x50] ss:$8 sps:$4 sm:$0xff]   ;;  %v1369_v40 = vld [vmem:[%s1478_s11 + $0x64] ss:$8 sps:$4 sm:$0xff]  }
  0x19   : > { %v1365_v37 = vld [vmem:[%s1478_s11 + $0xd4] ss:$8 sps:$4 sm:$0xff]   ;;  %v1368_v39 = vld [vmem:[%s1478_s11 + $0xd0] ss:$8 sps:$4 sm:$0xff]   ;;  %v1371_v41 = vld [vmem:[%s1478_s11 + $0xe4] ss:$8 sps:$4 sm:$0xff]  }
  0x1a   : > { %1172 = vmatpush3.bf16.msra.mxu0 %v1324_v7  ;;  %1288 = vmatpush3.bf16.msra.mxu1 %v1324_v7  ;;  %v1373_v42 = vld [vmem:[%s1478_s11 + $0x60] ss:$8 sps:$4 sm:$0xff]   ;;  %v1375_v44 = vld [vmem:[%s1478_s11 + $0x74] ss:$8 sps:$4 sm:$0xff]   ;;  %v1379_v46 = vld [vmem:[%s1478_s11 + $0x70] ss:$8 sps:$4 sm:$0xff]  }
  0x1b   : > { %1173 = vmatprep.subr.bf16.mxu0 %v1325_v8  ;;  %1281 = vmatprep.subr.bf16.mxu1 %v1325_v8  ;;  %v1374_v43 = vld [vmem:[%s1478_s11 + $0xe0] ss:$8 sps:$4 sm:$0xff]   ;;  %v1377_v45 = vld [vmem:[%s1478_s11 + $0xf4] ss:$8 sps:$4 sm:$0xff]   ;;  %v1380_v47 = vld [vmem:[%s1478_s11 + $0xf0] ss:$8 sps:$4 sm:$0xff]  }
  0x1c   : > { %v1536_v51 = vld [vmem:[%s1620_s2] ss:$0 sm:$0xff] }
  0x1e   : > { %1174 = vmatpush3.bf16.msra.mxu0 %v1326_v9  ;;  %1289 = vmatpush3.bf16.msra.mxu1 %v1326_v9 }
  0x1f   : > { %1175 = vmatprep.subr.bf16.mxu0 %v1327_v10  ;;  %1282 = vmatprep.subr.bf16.mxu1 %v1327_v10 }
  0x22   : > { %1176 = vmatpush3.bf16.msra.mxu0 %v1328_v13  ;;  %1290 = vmatpush3.bf16.msra.mxu1 %v1328_v13 }
  0x23   : > { %1177 = vmatprep.subr.bf16.mxu0 %v1329_v14  ;;  %1283 = vmatprep.subr.bf16.mxu1 %v1329_v14 }
  0x26   : > { %1178 = vmatpush3.bf16.msra.mxu0 %v1330_v15  ;;  %1291 = vmatpush3.bf16.msra.mxu1 %v1330_v15 }
  0x27   : > { %1179 = vmatprep.subr.bf16.mxu0 %v1331_v16  ;;  %1284 = vmatprep.subr.bf16.mxu1 %v1331_v16 }
  0x2a   : > { %1180 = vmatpush3.bf16.msra.mxu0 %v1332_v17  ;;  %1292 = vmatpush3.bf16.msra.mxu1 %v1332_v17 }
  0x2d   : > { %689 = vmatmul.mubr.bf16.vlgmr.msra.gmra.mxu0 %v1333_v18  ;;  %753 = vmatmul.mubr.bf16.vlgmr.msra.gmra.mxu1 %v1336_v19 }
  0x2e   : > { %696 = vmatprep.mubr.bf16.mxu0 %v1339_v20  ;;  %760 = vmatprep.mubr.bf16.mxu1 %v1341_v21 }
  0x35   : > { %697 = vmatmul.mubr.bf16.gmra.mxu0 %v1343_v22  ;;  %761 = vmatmul.mubr.bf16.gmra.mxu1 %v1344_v23 }
  0x36   : > { %704 = vmatprep.mubr.bf16.mxu0 %v1345_v24  ;;  %768 = vmatprep.mubr.bf16.mxu1 %v1347_v25 }
  0x3d   : > { %705 = vmatmul.mubr.bf16.gmra.mxu0 %v1349_v26  ;;  %769 = vmatmul.mubr.bf16.gmra.mxu1 %v1350_v27 }
  0x3e   : > { %712 = vmatprep.mubr.bf16.mxu0 %v1351_v28  ;;  %776 = vmatprep.mubr.bf16.mxu1 %v1353_v29 }
  0x45   : > { %713 = vmatmul.mubr.bf16.gmra.mxu0 %v1355_v30  ;;  %777 = vmatmul.mubr.bf16.gmra.mxu1 %v1356_v31 }
  0x46   : > { %720 = vmatprep.mubr.bf16.mxu0 %v1357_v32  ;;  %784 = vmatprep.mubr.bf16.mxu1 %v1359_v33 }
  0x4d   : > { %721 = vmatmul.mubr.bf16.gmra.mxu0 %v1361_v34  ;;  %785 = vmatmul.mubr.bf16.gmra.mxu1 %v1362_v35 }
  0x4e   : > { %728 = vmatprep.mubr.bf16.mxu0 %v1363_v36  ;;  %792 = vmatprep.mubr.bf16.mxu1 %v1365_v37 }
  0x55   : > { %729 = vmatmul.mubr.bf16.gmra.mxu0 %v1367_v38  ;;  %793 = vmatmul.mubr.bf16.gmra.mxu1 %v1368_v39 }
  0x56   : > { %736 = vmatprep.mubr.bf16.mxu0 %v1369_v40  ;;  %800 = vmatprep.mubr.bf16.mxu1 %v1371_v41 }
  0x5d   : > { %737 = vmatmul.mubr.bf16.gmra.mxu0 %v1373_v42  ;;  %801 = vmatmul.mubr.bf16.gmra.mxu1 %v1374_v43 }
  0x5e   : > { %744 = vmatprep.mubr.bf16.mxu0 %v1375_v44  ;;  %808 = vmatprep.mubr.bf16.mxu1 %v1377_v45 }
  0x65   : > { %745 = vmatmul.mubr.bf16.gmra.mxu0 %v1379_v46  ;;  %809 = vmatmul.mubr.bf16.gmra.mxu1 %v1380_v47 }
  0xed   : > { %v1181_v48 = vpop.f32.mrf.mxu0  ;;  %v1229_v49 = vpop.f32.mrf.mxu1 }
  0xef   : > { %v1182_v50 = vpop.f32.mrf.mxu0  ;;  %v1230_v52 = vpop.f32.mrf.mxu1 }
  0xf0   : > { %v1183_v53 = vadd.f32 %v1182_v50, %v1181_v48  ;;  %v1231_v54 = vadd.f32 %v1230_v52, %v1229_v49 }
  0xf1   : > { %v1184_v55 = vpop.f32.mrf.mxu0  ;;  %v1232_v56 = vpop.f32.mrf.mxu1 }
  0xf2   : > { %v923_v57 = vadd.f32 %v1183_v53, %v1536_v51  ;;  %v939_v58 = vadd.f32 %v1231_v54, %v1536_v51 }
  0xf3   : > { %v1185_v59 = vpop.f32.mrf.mxu0  ;;  %v1233_v60 = vpop.f32.mrf.mxu1 }
  0xf4   : > { %955 = vst [vmem:[%s1543_s8] sm:$0xff] %v923_v57  ;;  %971 = vst [vmem:[%s1543_s8 + $0x80] sm:$0xff] %v939_v58  ;;  %v1186_v61 = vadd.f32 %v1185_v59, %v1184_v55  ;;  %v1234_v62 = vadd.f32 %v1233_v60, %v1232_v56 }
  0xf5   : > { %v1187_v63 = vpop.f32.mrf.mxu0  ;;  %v1235_v0 = vpop.f32.mrf.mxu1 }
  0xf6   : > { %v924_v1 = vadd.f32 %v1186_v61, %v1536_v51  ;;  %v940_v2 = vadd.f32 %v1234_v62, %v1536_v51 }
  0xf7   : > { %v1188_v3 = vpop.f32.mrf.mxu0  ;;  %v1236_v4 = vpop.f32.mrf.mxu1 }
  0xf8   : > { %956 = vst [vmem:[%s1543_s8 + $0x8] sm:$0xff] %v924_v1  ;;  %972 = vst [vmem:[%s1543_s8 + $0x88] sm:$0xff] %v940_v2  ;;  %v1189_v5 = vadd.f32 %v1188_v3, %v1187_v63  ;;  %v1237_v6 = vadd.f32 %v1236_v4, %v1235_v0 }
  0xf9   : > { %v1190_v7 = vpop.f32.mrf.mxu0  ;;  %v1238_v8 = vpop.f32.mrf.mxu1 }
  0xfa   : > { %v925_v9 = vadd.f32 %v1189_v5, %v1536_v51  ;;  %v941_v10 = vadd.f32 %v1237_v6, %v1536_v51 }
  0xfb   : > { %v1191_v11 = vpop.f32.mrf.mxu0  ;;  %v1239_v12 = vpop.f32.mrf.mxu1 }
  0xfc   : > { %957 = vst [vmem:[%s1543_s8 + $0x10] sm:$0xff] %v925_v9  ;;  %973 = vst [vmem:[%s1543_s8 + $0x90] sm:$0xff] %v941_v10  ;;  %v1192_v13 = vadd.f32 %v1191_v11, %v1190_v7  ;;  %v1240_v14 = vadd.f32 %v1239_v12, %v1238_v8 }
  0xfd   : > { %v1193_v15 = vpop.f32.mrf.mxu0  ;;  %v1241_v16 = vpop.f32.mrf.mxu1 }
  0xfe   : > { %v926_v17 = vadd.f32 %v1192_v13, %v1536_v51  ;;  %v942_v18 = vadd.f32 %v1240_v14, %v1536_v51 }
  0xff   : > { %v1194_v19 = vpop.f32.mrf.mxu0  ;;  %v1242_v20 = vpop.f32.mrf.mxu1 }
 0x100   : > { %958 = vst [vmem:[%s1543_s8 + $0x18] sm:$0xff] %v926_v17  ;;  %974 = vst [vmem:[%s1543_s8 + $0x98] sm:$0xff] %v942_v18  ;;  %v1195_v21 = vadd.f32 %v1194_v19, %v1193_v15  ;;  %v1243_v22 = vadd.f32 %v1242_v20, %v1241_v16 }
 0x101   : > { %v1196_v23 = vpop.f32.mrf.mxu0  ;;  %v1244_v24 = vpop.f32.mrf.mxu1 }
 0x102   : > { %v927_v25 = vadd.f32 %v1195_v21, %v1536_v51  ;;  %v943_v26 = vadd.f32 %v1243_v22, %v1536_v51 }
 0x103   : > { %v1197_v27 = vpop.f32.mrf.mxu0  ;;  %v1245_v28 = vpop.f32.mrf.mxu1 }
 0x104   : > { %959 = vst [vmem:[%s1543_s8 + $0x20] sm:$0xff] %v927_v25  ;;  %975 = vst [vmem:[%s1543_s8 + $0xa0] sm:$0xff] %v943_v26  ;;  %v1198_v29 = vadd.f32 %v1197_v27, %v1196_v23  ;;  %v1246_v30 = vadd.f32 %v1245_v28, %v1244_v24 }
 0x105   : > { %v1199_v31 = vpop.f32.mrf.mxu0  ;;  %v1247_v32 = vpop.f32.mrf.mxu1 }
 0x106   : > { %v928_v33 = vadd.f32 %v1198_v29, %v1536_v51  ;;  %v944_v34 = vadd.f32 %v1246_v30, %v1536_v51 }
 0x107   : > { %v1200_v35 = vpop.f32.mrf.mxu0  ;;  %v1248_v36 = vpop.f32.mrf.mxu1 }
 0x108   : > { %960 = vst [vmem:[%s1543_s8 + $0x28] sm:$0xff] %v928_v33  ;;  %976 = vst [vmem:[%s1543_s8 + $0xa8] sm:$0xff] %v944_v34  ;;  %v1201_v37 = vadd.f32 %v1200_v35, %v1199_v31  ;;  %v1249_v38 = vadd.f32 %v1248_v36, %v1247_v32 }
 0x109   : > { %v1202_v39 = vpop.f32.mrf.mxu0  ;;  %v1250_v40 = vpop.f32.mrf.mxu1 }
 0x10a   : > { %v929_v41 = vadd.f32 %v1201_v37, %v1536_v51  ;;  %v945_v42 = vadd.f32 %v1249_v38, %v1536_v51 }
 0x10b   : > { %v1203_v43 = vpop.f32.mrf.mxu0  ;;  %v1251_v44 = vpop.f32.mrf.mxu1 }
 0x10c   : > { %961 = vst [vmem:[%s1543_s8 + $0x30] sm:$0xff] %v929_v41  ;;  %977 = vst [vmem:[%s1543_s8 + $0xb0] sm:$0xff] %v945_v42  ;;  %v1204_v45 = vadd.f32 %v1203_v43, %v1202_v39  ;;  %v1252_v46 = vadd.f32 %v1251_v44, %v1250_v40 }
 0x10d   : > { %v1205_v47 = vpop.f32.mrf.mxu0  ;;  %v1253_v48 = vpop.f32.mrf.mxu1 }
 0x10e   : > { %v930_v49 = vadd.f32 %v1204_v45, %v1536_v51  ;;  %v946_v50 = vadd.f32 %v1252_v46, %v1536_v51 }
 0x10f   : > { %v1206_v52 = vpop.f32.mrf.mxu0  ;;  %v1254_v53 = vpop.f32.mrf.mxu1 }
 0x110   : > { %962 = vst [vmem:[%s1543_s8 + $0x38] sm:$0xff] %v930_v49  ;;  %978 = vst [vmem:[%s1543_s8 + $0xb8] sm:$0xff] %v946_v50  ;;  %v1207_v54 = vadd.f32 %v1206_v52, %v1205_v47  ;;  %v1255_v55 = vadd.f32 %v1254_v53, %v1253_v48 }
 0x111   : > { %v1208_v56 = vpop.f32.mrf.mxu0  ;;  %v1256_v57 = vpop.f32.mrf.mxu1 }
 0x112   : > { %v931_v58 = vadd.f32 %v1207_v54, %v1536_v51  ;;  %v947_v59 = vadd.f32 %v1255_v55, %v1536_v51 }
 0x113   : > { %v1209_v60 = vpop.f32.mrf.mxu0  ;;  %v1257_v61 = vpop.f32.mrf.mxu1 }
 0x114   : > { %963 = vst [vmem:[%s1543_s8 + $0x40] sm:$0xff] %v931_v58  ;;  %979 = vst [vmem:[%s1543_s8 + $0xc0] sm:$0xff] %v947_v59  ;;  %v1210_v62 = vadd.f32 %v1209_v60, %v1208_v56  ;;  %v1258_v63 = vadd.f32 %v1257_v61, %v1256_v57 }
 0x115   : > { %v1211_v0 = vpop.f32.mrf.mxu0  ;;  %v1259_v1 = vpop.f32.mrf.mxu1 }
 0x116   : > { %v932_v2 = vadd.f32 %v1210_v62, %v1536_v51  ;;  %v948_v3 = vadd.f32 %v1258_v63, %v1536_v51 }
 0x117   : > { %v1212_v4 = vpop.f32.mrf.mxu0  ;;  %v1260_v5 = vpop.f32.mrf.mxu1 }
 0x118   : > { %964 = vst [vmem:[%s1543_s8 + $0x48] sm:$0xff] %v932_v2  ;;  %980 = vst [vmem:[%s1543_s8 + $0xc8] sm:$0xff] %v948_v3  ;;  %v1213_v6 = vadd.f32 %v1212_v4, %v1211_v0  ;;  %v1261_v7 = vadd.f32 %v1260_v5, %v1259_v1 }
 0x119   : > { %v1214_v8 = vpop.f32.mrf.mxu0  ;;  %v1262_v9 = vpop.f32.mrf.mxu1 }
 0x11a   : > { %v933_v10 = vadd.f32 %v1213_v6, %v1536_v51  ;;  %v949_v11 = vadd.f32 %v1261_v7, %v1536_v51 }
 0x11b   : > { %v1215_v12 = vpop.f32.mrf.mxu0  ;;  %v1263_v13 = vpop.f32.mrf.mxu1 }
 0x11c   : > { %965 = vst [vmem:[%s1543_s8 + $0x50] sm:$0xff] %v933_v10  ;;  %981 = vst [vmem:[%s1543_s8 + $0xd0] sm:$0xff] %v949_v11  ;;  %v1216_v14 = vadd.f32 %v1215_v12, %v1214_v8  ;;  %v1264_v15 = vadd.f32 %v1263_v13, %v1262_v9 }
 0x11d   : > { %v1217_v16 = vpop.f32.mrf.mxu0  ;;  %v1265_v17 = vpop.f32.mrf.mxu1 }
 0x11e   : > { %v934_v18 = vadd.f32 %v1216_v14, %v1536_v51  ;;  %v950_v19 = vadd.f32 %v1264_v15, %v1536_v51 }
 0x11f   : > { %v1218_v20 = vpop.f32.mrf.mxu0  ;;  %v1266_v21 = vpop.f32.mrf.mxu1 }
 0x120   : > { %966 = vst [vmem:[%s1543_s8 + $0x58] sm:$0xff] %v934_v18  ;;  %982 = vst [vmem:[%s1543_s8 + $0xd8] sm:$0xff] %v950_v19  ;;  %v1219_v22 = vadd.f32 %v1218_v20, %v1217_v16  ;;  %v1267_v23 = vadd.f32 %v1266_v21, %v1265_v17 }
 0x121   : > { %v1220_v24 = vpop.f32.mrf.mxu0  ;;  %v1268_v25 = vpop.f32.mrf.mxu1 }
 0x122   : > { %v935_v26 = vadd.f32 %v1219_v22, %v1536_v51  ;;  %v951_v27 = vadd.f32 %v1267_v23, %v1536_v51 }
 0x123   : > { %v1221_v28 = vpop.f32.mrf.mxu0  ;;  %v1269_v29 = vpop.f32.mrf.mxu1 }
 0x124   : > { %967 = vst [vmem:[%s1543_s8 + $0x60] sm:$0xff] %v935_v26  ;;  %983 = vst [vmem:[%s1543_s8 + $0xe0] sm:$0xff] %v951_v27  ;;  %v1222_v30 = vadd.f32 %v1221_v28, %v1220_v24  ;;  %v1270_v31 = vadd.f32 %v1269_v29, %v1268_v25 }
 0x125   : > { %v1223_v32 = vpop.f32.mrf.mxu0  ;;  %v1271_v33 = vpop.f32.mrf.mxu1 }
 0x126   : > { %v936_v34 = vadd.f32 %v1222_v30, %v1536_v51  ;;  %v952_v35 = vadd.f32 %v1270_v31, %v1536_v51 }
 0x127   : > { %v1224_v36 = vpop.f32.mrf.mxu0  ;;  %v1272_v37 = vpop.f32.mrf.mxu1 }
 0x128   : > { %968 = vst [vmem:[%s1543_s8 + $0x68] sm:$0xff] %v936_v34  ;;  %984 = vst [vmem:[%s1543_s8 + $0xe8] sm:$0xff] %v952_v35  ;;  %v1225_v38 = vadd.f32 %v1224_v36, %v1223_v32  ;;  %v1273_v39 = vadd.f32 %v1272_v37, %v1271_v33 }
 0x129   : > { %v1226_v40 = vpop.f32.mrf.mxu0  ;;  %v1274_v41 = vpop.f32.mrf.mxu1 }
 0x12a   : > { %v937_v42 = vadd.f32 %v1225_v38, %v1536_v51  ;;  %v953_v43 = vadd.f32 %v1273_v39, %v1536_v51 }
 0x12b   : > { %v1227_v44 = vpop.f32.mrf.mxu0  ;;  %v1275_v45 = vpop.f32.mrf.mxu1 }
 0x12c   : > { %969 = vst [vmem:[%s1543_s8 + $0x70] sm:$0xff] %v937_v42  ;;  %985 = vst [vmem:[%s1543_s8 + $0xf0] sm:$0xff] %v953_v43  ;;  %v1228_v46 = vadd.f32 %v1227_v44, %v1226_v40  ;;  %v1276_v47 = vadd.f32 %v1275_v45, %v1274_v41 }
 0x12e   : > { %v938_v48 = vadd.f32 %v1228_v46, %v1536_v51  ;;  %v954_v49 = vadd.f32 %v1276_v47, %v1536_v51 }
 0x130   : > { %970 = vst [vmem:[%s1543_s8 + $0x78] sm:$0xff] %v938_v48  ;;  %986 = vst [vmem:[%s1543_s8 + $0xf8] sm:$0xff] %v954_v49 }
 0x131 PF: > { %s13_s14 = sadd.s32 1, %s1403_s14   ;;  %s1622_s12 = smov %s1399_s13 }
 0x132   : > { %p10_p5 = scmp.ge.s32.totalorder %s13_s14, 4   ;;  %s1623_s13 = smov %s1625_s15 }
 0x134   :  { %12 = sbr.rel (!%p10_p5) target bundleno = 2 (0x2), region = 76 }

</bundles_post_ra>
